<compile_context>
chip_gen: v5e
topology: v5e:2x2
jax: 0.10.0
libtpu: 0.0.40
codegen_flags: <defaults>
</compile_context>

<pallas_src>
import functools

import jax
import jax.numpy as jnp
from jax.experimental import pallas as pl
from jax.experimental.pallas import tpu as pltpu

EPS = 1e-5  # PyTorch InstanceNorm1d default eps


# ------------------------- in-kernel helper (traced) -------------------------

def _instance_norm_affine(acc, g, b, n):
    """InstanceNorm over axis 0 (length) with count n, fused affine.

    acc: (n_rows, C) f32, g/b: (1, C). Two-pass stats (no cancellation risk)."""
    inv_n = 1.0 / n
    mean = jnp.sum(acc, axis=0, keepdims=True) * inv_n
    ctr = acc - mean
    var = jnp.sum(ctr * ctr, axis=0, keepdims=True) * inv_n
    return ctr * (g * jax.lax.rsqrt(var + EPS)) + b


# ------------------------------ Pallas kernels --------------------------------

def _conv_block_kernel(x_ref, w_ref, g_ref, b_ref, o_ref, *, k, lo, norm, relu, tanh):
    """Fused stride-1 k-tap conv (+ optional InstanceNorm/affine, ReLU, tanh).

    x_ref: (1, lo+k-1, Cin) padded (or folded) input, channels-last.
    w_ref: (k, Cin, Cout) per-tap weight matrices.
    g_ref/b_ref: (1, Cout) affine params (unused when norm=False).
    o_ref: (1, lo, Cout)."""
    acc = jnp.dot(x_ref[0, 0:lo, :], w_ref[0], preferred_element_type=jnp.float32)
    for j in range(1, k):  # k <= 7, unrolled at trace time
        acc = acc + jnp.dot(x_ref[0, j:j + lo, :], w_ref[j],
                            preferred_element_type=jnp.float32)
    y = _instance_norm_affine(acc, g_ref[...], b_ref[...], lo) if norm else acc
    if relu:
        y = jnp.maximum(y, 0.0)
    if tanh:
        y = jnp.tanh(y)
    o_ref[0] = y


def _upsample_block_kernel(x_ref, w_ref, g_ref, b_ref, o_ref, *, lo):
    """Fused polyphase ConvTranspose1d(k=4, s=2, p=1) + InstanceNorm + ReLU.

    x_ref: (1, lo+2, Cin) input padded by 1 on each side.
    w_ref: (4, Cin, Cout) = [w3, w1, w2, w0] (taps of the PyTorch kernel).
    o_ref: (1, lo, 2*Cout) — row m holds [out[2m] | out[2m+1]]; the wrapper
    reshapes to (2*lo, Cout)."""
    even = (jnp.dot(x_ref[0, 0:lo, :], w_ref[0], preferred_element_type=jnp.float32)
            + jnp.dot(x_ref[0, 1:lo + 1, :], w_ref[1], preferred_element_type=jnp.float32))
    odd = (jnp.dot(x_ref[0, 1:lo + 1, :], w_ref[2], preferred_element_type=jnp.float32)
           + jnp.dot(x_ref[0, 2:lo + 2, :], w_ref[3], preferred_element_type=jnp.float32))
    inv_n = 1.0 / (2 * lo)
    mean = (jnp.sum(even, axis=0, keepdims=True)
            + jnp.sum(odd, axis=0, keepdims=True)) * inv_n
    ce, co = even - mean, odd - mean
    var = (jnp.sum(ce * ce, axis=0, keepdims=True)
           + jnp.sum(co * co, axis=0, keepdims=True)) * inv_n
    scale = g_ref[...] * jax.lax.rsqrt(var + EPS)
    shift = b_ref[...]
    even = jnp.maximum(ce * scale + shift, 0.0)
    odd = jnp.maximum(co * scale + shift, 0.0)
    o_ref[0] = jnp.concatenate([even, odd], axis=-1)


def _resblock_kernel(x_ref, w1_ref, g1_ref, b1_ref, w2_ref, g2_ref, b2_ref, o_ref, *, lo):
    """Whole residual block: conv3 -> IN -> ReLU -> conv3 -> IN -> +x, one kernel.

    x_ref: (1, lo+2, C) zero-padded input (pad=1). Output: (1, lo, C)."""
    c = o_ref.shape[-1]
    acc = (jnp.dot(x_ref[0, 0:lo, :], w1_ref[0], preferred_element_type=jnp.float32)
           + jnp.dot(x_ref[0, 1:lo + 1, :], w1_ref[1], preferred_element_type=jnp.float32)
           + jnp.dot(x_ref[0, 2:lo + 2, :], w1_ref[2], preferred_element_type=jnp.float32))
    h = jnp.maximum(_instance_norm_affine(acc, g1_ref[...], b1_ref[...], lo), 0.0)
    # zero-pad the intermediate in registers (stays in VMEM, never hits HBM)
    zrow = jnp.zeros((1, c), jnp.float32)
    hp = jnp.concatenate([zrow, h, zrow], axis=0)                  # (lo+2, C)
    acc2 = (jnp.dot(hp[0:lo, :], w2_ref[0], preferred_element_type=jnp.float32)
            + jnp.dot(hp[1:lo + 1, :], w2_ref[1], preferred_element_type=jnp.float32)
            + jnp.dot(hp[2:lo + 2, :], w2_ref[2], preferred_element_type=jnp.float32))
    y = _instance_norm_affine(acc2, g2_ref[...], b2_ref[...], lo)
    o_ref[0] = y + x_ref[0, 1:lo + 1, :]                           # residual add


# ------------------------------ layer wrappers --------------------------------

_PARALLEL = pltpu.CompilerParams(dimension_semantics=("parallel",))


def _fused_conv_call(xw, wt, gamma, beta, *, lo, norm, relu, tanh):
    """xw: (B, lo+k-1, Cin) prepared input; wt: (k, Cin, Cout)."""
    B, lp, cin = xw.shape
    k, _, cout = wt.shape
    assert lp == lo + k - 1, (lp, lo, k)
    g = jnp.reshape(gamma, (1, cout)).astype(jnp.float32)
    b = jnp.reshape(beta, (1, cout)).astype(jnp.float32)
    kern = functools.partial(_conv_block_kernel, k=k, lo=lo,
                             norm=norm, relu=relu, tanh=tanh)
    return pl.pallas_call(
        kern,
        out_shape=jax.ShapeDtypeStruct((B, lo, cout), jnp.float32),
        grid=(B,),
        in_specs=[
            pl.BlockSpec((1, lp, cin), lambda i: (i, 0, 0)),
            pl.BlockSpec((k, cin, cout), lambda i: (0, 0, 0)),
            pl.BlockSpec((1, cout), lambda i: (0, 0)),
            pl.BlockSpec((1, cout), lambda i: (0, 0)),
        ],
        out_specs=pl.BlockSpec((1, lo, cout), lambda i: (i, 0, 0)),
        compiler_params=_PARALLEL,
    )(xw, wt, g, b)


def conv_in_act(x, w, gamma, beta, *, pad, norm=True, relu=False, tanh=False):
    """Stride-1 Conv1d (PyTorch weight (Cout, Cin, k), no bias) + optional IN/ReLU/tanh.

    x: (B, L, Cin) channels-last."""
    B, L, Cin = x.shape
    Cout, _, k = w.shape
    xp = jnp.pad(x, ((0, 0), (pad, pad), (0, 0)))
    lo = L + 2 * pad - k + 1
    wt = jnp.transpose(w, (2, 1, 0))                               # (k, Cin, Cout)
    if gamma is None:
        gamma = jnp.ones((Cout,), jnp.float32)
        beta = jnp.zeros((Cout,), jnp.float32)
    return _fused_conv_call(xp, wt, gamma, beta, lo=lo, norm=norm, relu=relu, tanh=tanh)


def downsample_in_relu(x, w, gamma, beta):
    """Conv1d(k=4, stride=2, pad=1) + IN + ReLU via space-to-depth fold.

    x: (B, L, Cin); w: (Cout, Cin, 4). Returns (B, L//2, Cout)."""
    B, L, Cin = x.shape
    Cout = w.shape[0]
    xp = jnp.pad(x, ((0, 0), (1, 1), (0, 0)))                      # (B, L+2, Cin)
    x_fold = xp.reshape(B, (L + 2) // 2, 2 * Cin)                  # row r = [x_pad[2r] | x_pad[2r+1]]
    wt = jnp.transpose(w, (2, 1, 0)).reshape(2, 2 * Cin, Cout)     # folded 2-tap weight
    return _fused_conv_call(x_fold, wt, gamma, beta, lo=L // 2,
                            norm=True, relu=True, tanh=False)


def upsample_in_relu(x, w, gamma, beta):
    """ConvTranspose1d(k=4, stride=2, pad=1) + IN + ReLU via polyphase decomposition.

    x: (B, L, Cin); w: PyTorch ConvTranspose1d weight (Cin, Cout, 4). Returns (B, 2L, Cout)."""
    B, L, Cin = x.shape
    Cout = w.shape[1]
    xp = jnp.pad(x, ((0, 0), (1, 1), (0, 0)))                      # (B, L+2, Cin)
    # out[2m]   = x[m]·w1 + x[m-1]·w3   -> even phase taps [w3, w1]
    # out[2m+1] = x[m+1]·w0 + x[m]·w2   -> odd  phase taps [w2, w0]
    wt = jnp.stack([w[:, :, 3], w[:, :, 1], w[:, :, 2], w[:, :, 0]], axis=0)  # (4, Cin, Cout)
    g = jnp.reshape(gamma, (1, Cout)).astype(jnp.float32)
    b = jnp.reshape(beta, (1, Cout)).astype(jnp.float32)
    kern = functools.partial(_upsample_block_kernel, lo=L)
    out_fold = pl.pallas_call(
        kern,
        out_shape=jax.ShapeDtypeStruct((B, L, 2 * Cout), jnp.float32),
        grid=(B,),
        in_specs=[
            pl.BlockSpec((1, L + 2, Cin), lambda i: (i, 0, 0)),
            pl.BlockSpec((4, Cin, Cout), lambda i: (0, 0, 0)),
            pl.BlockSpec((1, Cout), lambda i: (0, 0)),
            pl.BlockSpec((1, Cout), lambda i: (0, 0)),
        ],
        out_specs=pl.BlockSpec((1, L, 2 * Cout), lambda i: (i, 0, 0)),
        compiler_params=_PARALLEL,
    )(xp, wt, g, b)
    # row m = [out[2m] | out[2m+1]] -> interleave to (B, 2L, Cout) (layout-only reshape)
    return out_fold.reshape(B, 2 * L, Cout)


def residual_block(x, p):
    """Whole ResidualBlock (conv3->IN->ReLU->conv3->IN->+x) as one Pallas kernel."""
    B, L, C = x.shape
    xp = jnp.pad(x, ((0, 0), (1, 1), (0, 0)))                      # (B, L+2, C)
    w1 = jnp.transpose(p["w1"], (2, 1, 0))                         # (3, C, C)
    w2 = jnp.transpose(p["w2"], (2, 1, 0))
    g1 = p["g1"].reshape(1, C).astype(jnp.float32)
    b1 = p["b1"].reshape(1, C).astype(jnp.float32)
    g2 = p["g2"].reshape(1, C).astype(jnp.float32)
    b2 = p["b2"].reshape(1, C).astype(jnp.float32)
    kern = functools.partial(_resblock_kernel, lo=L)
    return pl.pallas_call(
        kern,
        out_shape=jax.ShapeDtypeStruct((B, L, C), jnp.float32),
        grid=(B,),
        in_specs=[
            pl.BlockSpec((1, L + 2, C), lambda i: (i, 0, 0)),
            pl.BlockSpec((3, C, C), lambda i: (0, 0, 0)),
            pl.BlockSpec((1, C), lambda i: (0, 0)),
            pl.BlockSpec((1, C), lambda i: (0, 0)),
            pl.BlockSpec((3, C, C), lambda i: (0, 0, 0)),
            pl.BlockSpec((1, C), lambda i: (0, 0)),
            pl.BlockSpec((1, C), lambda i: (0, 0)),
        ],
        out_specs=pl.BlockSpec((1, L, C), lambda i: (i, 0, 0)),
        compiler_params=_PARALLEL,
    )(xp, w1, g1, b1, w2, g2, b2)


# -------------------------------- parameters ----------------------------------

def _conv_weight(key, shape, fan_in):
    bound = 1.0 / (fan_in ** 0.5)
    return jax.random.uniform(key, shape, jnp.float32, -bound, bound)


def init_generator_params(key, conv_dim=32, num_classes=5, repeat_num=2):
    params = {}
    keys = iter(jax.random.split(key, 64))

    cin = 3 + num_classes
    params["initial"] = {
        "w": _conv_weight(next(keys), (conv_dim, cin, 7), cin * 7),        # Conv1d layout
        "gamma": jnp.ones((conv_dim,), jnp.float32),
        "beta": jnp.zeros((conv_dim,), jnp.float32),
    }
    curr = conv_dim
    for i in range(2):
        params[f"downsample_{i}"] = {
            "w": _conv_weight(next(keys), (curr * 2, curr, 4), curr * 4),
            "gamma": jnp.ones((curr * 2,), jnp.float32),
            "beta": jnp.zeros((curr * 2,), jnp.float32),
        }
        curr *= 2
    for i in range(repeat_num):
        params[f"bottleneck_{i}"] = {
            "w1": _conv_weight(next(keys), (curr, curr, 3), curr * 3),
            "g1": jnp.ones((curr,), jnp.float32),
            "b1": jnp.zeros((curr,), jnp.float32),
            "w2": _conv_weight(next(keys), (curr, curr, 3), curr * 3),
            "g2": jnp.ones((curr,), jnp.float32),
            "b2": jnp.zeros((curr,), jnp.float32),
        }
    for i in range(2):
        params[f"upsample_{i}"] = {
            # ConvTranspose1d weight layout: (Cin, Cout, k)
            "w": _conv_weight(next(keys), (curr, curr // 2, 4), curr * 4),
            "gamma": jnp.ones((curr // 2,), jnp.float32),
            "beta": jnp.zeros((curr // 2,), jnp.float32),
        }
        curr //= 2
    params["final"] = {"w": _conv_weight(next(keys), (3, curr, 7), curr * 7)}
    return params


# ---------------------------------- forward ------------------------------------

@jax.jit
def generator_forward(params, x, c):
    """x: (B, 3, L) f32 (PyTorch NCW), c: (B, num_classes) f32 -> (B, 3, L) f32."""
    B, _, L = x.shape
    nc = c.shape[1]
    h = jnp.transpose(x, (0, 2, 1))                                # channels-last (B, L, 3)
    c_map = jnp.broadcast_to(c[:, None, :], (B, L, nc)).astype(h.dtype)
    h = jnp.concatenate([h, c_map], axis=-1)                       # (B, L, 3+nc)

    p = params["initial"]
    h = conv_in_act(h, p["w"], p["gamma"], p["beta"], pad=3, relu=True)

    for i in range(2):
        p = params[f"downsample_{i}"]
        h = downsample_in_relu(h, p["w"], p["gamma"], p["beta"])

    n_blocks = sum(1 for name in params if name.startswith("bottleneck_"))
    for i in range(n_blocks):
        h = residual_block(h, params[f"bottleneck_{i}"])

    for i in range(2):
        p = params[f"upsample_{i}"]
        h = upsample_in_relu(h, p["w"], p["gamma"], p["beta"])

    p = params["final"]
    h = conv_in_act(h, p["w"], None, None, pad=3, norm=False, tanh=True)
    return jnp.transpose(h, (0, 2, 1))                             # back to (B, 3, L)


# ------------------------------------ main --------------------------------------

if __name__ == "__main__":
    key = jax.random.PRNGKey(0)
    k_par, k_x, k_c = jax.random.split(key, 3)

    B, L = 2, 16
    conv_dim, num_classes, repeat_num = 32, 5, 2

    params = init_generator_params(k_par, conv_dim, num_classes, repeat_num)
    x = jax.random.normal(k_x, (B, 3, L), jnp.float32)
    c = jax.random.normal(k_c, (B, num_classes), jnp.float32)

    out = generator_forward(params, x, c)
    out = jax.block_until_ready(out)

    assert out.shape == (B, 3, L), out.shape
    assert bool(jnp.all(jnp.isfinite(out)))
    assert bool(jnp.all(jnp.abs(out) <= 1.0))  # tanh output range
    print("KERNEL_OK")
</pallas_src>

<mosaic_0001>
module attributes {stable_mosaic.version = 11 : i64} {
  func.func @_conv_block_kernel(%arg0: i32, %arg1: memref<1x22x8xf32, #tpu.memory_space<vmem>>, %arg2: memref<7x8x32xf32, #tpu.memory_space<vmem>>, %arg3: memref<1x32xf32, #tpu.memory_space<vmem>>, %arg4: memref<1x32xf32, #tpu.memory_space<vmem>>, %arg5: memref<1x16x32xf32, #tpu.memory_space<vmem>>) attributes {dimension_semantics = [#tpu.dimension_semantics<parallel>], iteration_bounds = array<i64: 2>, scalar_prefetch = 0 : i64, scratch_operands = 0 : i64, tpu.core_type = #tpu.core_type<tc>, window_params = [{transform_indices = @transform_0, window_bounds = array<i64: 1, 22, 8>}, {pipeline_mode = #tpu.pipeline_mode<synchronous>, transform_indices = @transform_1, window_bounds = array<i64: 7, 8, 32>}, {pipeline_mode = #tpu.pipeline_mode<synchronous>, transform_indices = @transform_2, window_bounds = array<i64: 1, 32>}, {pipeline_mode = #tpu.pipeline_mode<synchronous>, transform_indices = @transform_3, window_bounds = array<i64: 1, 32>}, {transform_indices = @transform_4, window_bounds = array<i64: 1, 16, 32>}]} {
    %c0 = arith.constant 0 : index
    %c0_0 = arith.constant 0 : index
    %c0_1 = arith.constant 0 : index
    %0 = vector.load %arg1[%c0, %c0_0, %c0_1] : memref<1x22x8xf32, #tpu.memory_space<vmem>>, vector<1x16x8xf32>
    %1 = vector.shape_cast %0 : vector<1x16x8xf32> to vector<16x8xf32>
    %c0_2 = arith.constant 0 : index
    %c0_3 = arith.constant 0 : index
    %c0_4 = arith.constant 0 : index
    %2 = vector.load %arg2[%c0_2, %c0_3, %c0_4] : memref<7x8x32xf32, #tpu.memory_space<vmem>>, vector<1x8x32xf32>
    %3 = vector.shape_cast %2 : vector<1x8x32xf32> to vector<8x32xf32>
    %cst = arith.constant dense<0.000000e+00> : vector<16x32xf32>
    %4 = tpu.matmul %1, %3, %cst {dimension_numbers = #tpu.dot_dimension_numbers<[1], [0], [0], [1], [0, 0, 1, 1], [], []>} : vector<16x8xf32>, vector<8x32xf32>, vector<16x32xf32> -> vector<16x32xf32>
    %c0_5 = arith.constant 0 : index
    %c1 = arith.constant 1 : index
    %c0_6 = arith.constant 0 : index
    %5 = vector.load %arg1[%c0_5, %c1, %c0_6] : memref<1x22x8xf32, #tpu.memory_space<vmem>>, vector<1x16x8xf32>
    %6 = vector.shape_cast %5 : vector<1x16x8xf32> to vector<16x8xf32>
    %c1_7 = arith.constant 1 : index
    %c0_8 = arith.constant 0 : index
    %c0_9 = arith.constant 0 : index
    %7 = vector.load %arg2[%c1_7, %c0_8, %c0_9] : memref<7x8x32xf32, #tpu.memory_space<vmem>>, vector<1x8x32xf32>
    %8 = vector.shape_cast %7 : vector<1x8x32xf32> to vector<8x32xf32>
    %cst_10 = arith.constant dense<0.000000e+00> : vector<16x32xf32>
    %9 = tpu.matmul %6, %8, %cst_10 {dimension_numbers = #tpu.dot_dimension_numbers<[1], [0], [0], [1], [0, 0, 1, 1], [], []>} : vector<16x8xf32>, vector<8x32xf32>, vector<16x32xf32> -> vector<16x32xf32>
    %10 = arith.addf %4, %9 : vector<16x32xf32>
    %c0_11 = arith.constant 0 : index
    %c2 = arith.constant 2 : index
    %c0_12 = arith.constant 0 : index
    %11 = vector.load %arg1[%c0_11, %c2, %c0_12] : memref<1x22x8xf32, #tpu.memory_space<vmem>>, vector<1x16x8xf32>
    %12 = vector.shape_cast %11 : vector<1x16x8xf32> to vector<16x8xf32>
    %c2_13 = arith.constant 2 : index
    %c0_14 = arith.constant 0 : index
    %c0_15 = arith.constant 0 : index
    %13 = vector.load %arg2[%c2_13, %c0_14, %c0_15] : memref<7x8x32xf32, #tpu.memory_space<vmem>>, vector<1x8x32xf32>
    %14 = vector.shape_cast %13 : vector<1x8x32xf32> to vector<8x32xf32>
    %cst_16 = arith.constant dense<0.000000e+00> : vector<16x32xf32>
    %15 = tpu.matmul %12, %14, %cst_16 {dimension_numbers = #tpu.dot_dimension_numbers<[1], [0], [0], [1], [0, 0, 1, 1], [], []>} : vector<16x8xf32>, vector<8x32xf32>, vector<16x32xf32> -> vector<16x32xf32>
    %16 = arith.addf %10, %15 : vector<16x32xf32>
    %c0_17 = arith.constant 0 : index
    %c3 = arith.constant 3 : index
    %c0_18 = arith.constant 0 : index
    %17 = vector.load %arg1[%c0_17, %c3, %c0_18] : memref<1x22x8xf32, #tpu.memory_space<vmem>>, vector<1x16x8xf32>
    %18 = vector.shape_cast %17 : vector<1x16x8xf32> to vector<16x8xf32>
    %c3_19 = arith.constant 3 : index
    %c0_20 = arith.constant 0 : index
    %c0_21 = arith.constant 0 : index
    %19 = vector.load %arg2[%c3_19, %c0_20, %c0_21] : memref<7x8x32xf32, #tpu.memory_space<vmem>>, vector<1x8x32xf32>
    %20 = vector.shape_cast %19 : vector<1x8x32xf32> to vector<8x32xf32>
    %cst_22 = arith.constant dense<0.000000e+00> : vector<16x32xf32>
    %21 = tpu.matmul %18, %20, %cst_22 {dimension_numbers = #tpu.dot_dimension_numbers<[1], [0], [0], [1], [0, 0, 1, 1], [], []>} : vector<16x8xf32>, vector<8x32xf32>, vector<16x32xf32> -> vector<16x32xf32>
    %22 = arith.addf %16, %21 : vector<16x32xf32>
    %c0_23 = arith.constant 0 : index
    %c4 = arith.constant 4 : index
    %c0_24 = arith.constant 0 : index
    %23 = vector.load %arg1[%c0_23, %c4, %c0_24] : memref<1x22x8xf32, #tpu.memory_space<vmem>>, vector<1x16x8xf32>
    %24 = vector.shape_cast %23 : vector<1x16x8xf32> to vector<16x8xf32>
    %c4_25 = arith.constant 4 : index
    %c0_26 = arith.constant 0 : index
    %c0_27 = arith.constant 0 : index
    %25 = vector.load %arg2[%c4_25, %c0_26, %c0_27] : memref<7x8x32xf32, #tpu.memory_space<vmem>>, vector<1x8x32xf32>
    %26 = vector.shape_cast %25 : vector<1x8x32xf32> to vector<8x32xf32>
    %cst_28 = arith.constant dense<0.000000e+00> : vector<16x32xf32>
    %27 = tpu.matmul %24, %26, %cst_28 {dimension_numbers = #tpu.dot_dimension_numbers<[1], [0], [0], [1], [0, 0, 1, 1], [], []>} : vector<16x8xf32>, vector<8x32xf32>, vector<16x32xf32> -> vector<16x32xf32>
    %28 = arith.addf %22, %27 : vector<16x32xf32>
    %c0_29 = arith.constant 0 : index
    %c5 = arith.constant 5 : index
    %c0_30 = arith.constant 0 : index
    %29 = vector.load %arg1[%c0_29, %c5, %c0_30] : memref<1x22x8xf32, #tpu.memory_space<vmem>>, vector<1x16x8xf32>
    %30 = vector.shape_cast %29 : vector<1x16x8xf32> to vector<16x8xf32>
    %c5_31 = arith.constant 5 : index
    %c0_32 = arith.constant 0 : index
    %c0_33 = arith.constant 0 : index
    %31 = vector.load %arg2[%c5_31, %c0_32, %c0_33] : memref<7x8x32xf32, #tpu.memory_space<vmem>>, vector<1x8x32xf32>
    %32 = vector.shape_cast %31 : vector<1x8x32xf32> to vector<8x32xf32>
    %cst_34 = arith.constant dense<0.000000e+00> : vector<16x32xf32>
    %33 = tpu.matmul %30, %32, %cst_34 {dimension_numbers = #tpu.dot_dimension_numbers<[1], [0], [0], [1], [0, 0, 1, 1], [], []>} : vector<16x8xf32>, vector<8x32xf32>, vector<16x32xf32> -> vector<16x32xf32>
    %34 = arith.addf %28, %33 : vector<16x32xf32>
    %c0_35 = arith.constant 0 : index
    %c6 = arith.constant 6 : index
    %c0_36 = arith.constant 0 : index
    %35 = vector.load %arg1[%c0_35, %c6, %c0_36] : memref<1x22x8xf32, #tpu.memory_space<vmem>>, vector<1x16x8xf32>
    %36 = vector.shape_cast %35 : vector<1x16x8xf32> to vector<16x8xf32>
    %c6_37 = arith.constant 6 : index
    %c0_38 = arith.constant 0 : index
    %c0_39 = arith.constant 0 : index
    %37 = vector.load %arg2[%c6_37, %c0_38, %c0_39] : memref<7x8x32xf32, #tpu.memory_space<vmem>>, vector<1x8x32xf32>
    %38 = vector.shape_cast %37 : vector<1x8x32xf32> to vector<8x32xf32>
    %cst_40 = arith.constant dense<0.000000e+00> : vector<16x32xf32>
    %39 = tpu.matmul %36, %38, %cst_40 {dimension_numbers = #tpu.dot_dimension_numbers<[1], [0], [0], [1], [0, 0, 1, 1], [], []>} : vector<16x8xf32>, vector<8x32xf32>, vector<16x32xf32> -> vector<16x32xf32>
    %40 = arith.addf %34, %39 : vector<16x32xf32>
    %c0_41 = arith.constant 0 : index
    %c0_42 = arith.constant 0 : index
    %41 = vector.load %arg3[%c0_41, %c0_42] : memref<1x32xf32, #tpu.memory_space<vmem>>, vector<1x32xf32>
    %c0_43 = arith.constant 0 : index
    %c0_44 = arith.constant 0 : index
    %42 = vector.load %arg4[%c0_43, %c0_44] : memref<1x32xf32, #tpu.memory_space<vmem>>, vector<1x32xf32>
    %cst_45 = arith.constant dense<0.000000e+00> : vector<32xf32>
    %43 = vector.multi_reduction <add>, %40, %cst_45 [0] : vector<16x32xf32> to vector<32xf32>
    %44 = vector.shape_cast %43 : vector<32xf32> to vector<1x32xf32>
    %cst_46 = arith.constant 6.250000e-02 : f32
    %45 = vector.broadcast %cst_46 : f32 to vector<1x32xf32>
    %46 = arith.mulf %44, %45 : vector<1x32xf32>
    %47 = vector.broadcast %46 : vector<1x32xf32> to vector<16x32xf32>
    %48 = arith.subf %40, %47 : vector<16x32xf32>
    %49 = arith.mulf %48, %48 : vector<16x32xf32>
    %cst_47 = arith.constant dense<0.000000e+00> : vector<32xf32>
    %50 = vector.multi_reduction <add>, %49, %cst_47 [0] : vector<16x32xf32> to vector<32xf32>
    %51 = vector.shape_cast %50 : vector<32xf32> to vector<1x32xf32>
    %cst_48 = arith.constant 6.250000e-02 : f32
    %52 = vector.broadcast %cst_48 : f32 to vector<1x32xf32>
    %53 = arith.mulf %51, %52 : vector<1x32xf32>
    %cst_49 = arith.constant 9.99999974E-6 : f32
    %54 = vector.broadcast %cst_49 : f32 to vector<1x32xf32>
    %55 = arith.addf %53, %54 : vector<1x32xf32>
    %56 = math.rsqrt %55 : vector<1x32xf32>
    %57 = arith.mulf %41, %56 : vector<1x32xf32>
    %58 = vector.broadcast %57 : vector<1x32xf32> to vector<16x32xf32>
    %59 = arith.mulf %48, %58 : vector<16x32xf32>
    %60 = vector.broadcast %42 : vector<1x32xf32> to vector<16x32xf32>
    %61 = arith.addf %59, %60 : vector<16x32xf32>
    %cst_50 = arith.constant 0.000000e+00 : f32
    %62 = vector.broadcast %cst_50 : f32 to vector<16x32xf32>
    %63 = arith.maximumf %61, %62 : vector<16x32xf32>
    %c0_51 = arith.constant 0 : index
    %c0_52 = arith.constant 0 : index
    %c0_53 = arith.constant 0 : index
    %64 = vector.load %arg5[%c0_51, %c0_52, %c0_53] : memref<1x16x32xf32, #tpu.memory_space<vmem>>, vector<1x16x32xf32>
    %65 = vector.shape_cast %64 : vector<1x16x32xf32> to vector<16x32xf32>
    %66 = vector.shape_cast %63 : vector<16x32xf32> to vector<1x16x32xf32>
    tpu.vector_store %arg5[%c0_51, %c0_52, %c0_53], %66 {strides = array<i32>} : memref<1x16x32xf32, #tpu.memory_space<vmem>>, vector<1x16x32xf32>,
    return
  }
  func.func @transform_0(%arg0: i32) -> (i32, i32, i32) {
    %c0_i32 = arith.constant 0 : i32
    %c0_i32_0 = arith.constant 0 : i32
    %c0_i32_1 = arith.constant 0 : i32
    return %arg0, %c0_i32, %c0_i32_0 : i32, i32, i32
  }
  func.func @transform_1(%arg0: i32) -> (i32, i32, i32) {
    %c0_i32 = arith.constant 0 : i32
    %c0_i32_0 = arith.constant 0 : i32
    %c0_i32_1 = arith.constant 0 : i32
    %c0_i32_2 = arith.constant 0 : i32
    return %c0_i32, %c0_i32_0, %c0_i32_1 : i32, i32, i32
  }
  func.func @transform_2(%arg0: i32) -> (i32, i32) {
    %c0_i32 = arith.constant 0 : i32
    %c0_i32_0 = arith.constant 0 : i32
    %c0_i32_1 = arith.constant 0 : i32
    return %c0_i32, %c0_i32_0 : i32, i32
  }
  func.func @transform_3(%arg0: i32) -> (i32, i32) {
    %c0_i32 = arith.constant 0 : i32
    %c0_i32_0 = arith.constant 0 : i32
    %c0_i32_1 = arith.constant 0 : i32
    return %c0_i32, %c0_i32_0 : i32, i32
  }
  func.func @transform_4(%arg0: i32) -> (i32, i32, i32) {
    %c0_i32 = arith.constant 0 : i32
    %c0_i32_0 = arith.constant 0 : i32
    %c0_i32_1 = arith.constant 0 : i32
    return %arg0, %c0_i32, %c0_i32_0 : i32, i32, i32
  }
}

module attributes {stable_mosaic.version = 11 : i64} {
  func.func @_conv_block_kernel(%arg0: i32, %arg1: memref<1x9x64xf32, #tpu.memory_space<vmem>>, %arg2: memref<2x64x64xf32, #tpu.memory_space<vmem>>, %arg3: memref<1x64xf32, #tpu.memory_space<vmem>>, %arg4: memref<1x64xf32, #tpu.memory_space<vmem>>, %arg5: memref<1x8x64xf32, #tpu.memory_space<vmem>>) attributes {dimension_semantics = [#tpu.dimension_semantics<parallel>], iteration_bounds = array<i64: 2>, scalar_prefetch = 0 : i64, scratch_operands = 0 : i64, tpu.core_type = #tpu.core_type<tc>, window_params = [{transform_indices = @transform_0, window_bounds = array<i64: 1, 9, 64>}, {pipeline_mode = #tpu.pipeline_mode<synchronous>, transform_indices = @transform_1, window_bounds = array<i64: 2, 64, 64>}, {pipeline_mode = #tpu.pipeline_mode<synchronous>, transform_indices = @transform_2, window_bounds = array<i64: 1, 64>}, {pipeline_mode = #tpu.pipeline_mode<synchronous>, transform_indices = @transform_3, window_bounds = array<i64: 1, 64>}, {transform_indices = @transform_4, window_bounds = array<i64: 1, 8, 64>}]} {
    %c0 = arith.constant 0 : index
    %c0_0 = arith.constant 0 : index
    %c0_1 = arith.constant 0 : index
    %0 = vector.load %arg1[%c0, %c0_0, %c0_1] : memref<1x9x64xf32, #tpu.memory_space<vmem>>, vector<1x8x64xf32>
    %1 = vector.shape_cast %0 : vector<1x8x64xf32> to vector<8x64xf32>
    %c0_2 = arith.constant 0 : index
    %c0_3 = arith.constant 0 : index
    %c0_4 = arith.constant 0 : index
    %2 = vector.load %arg2[%c0_2, %c0_3, %c0_4] : memref<2x64x64xf32, #tpu.memory_space<vmem>>, vector<1x64x64xf32>
    %3 = vector.shape_cast %2 : vector<1x64x64xf32> to vector<64x64xf32>
    %cst = arith.constant dense<0.000000e+00> : vector<8x64xf32>
    %4 = tpu.matmul %1, %3, %cst {dimension_numbers = #tpu.dot_dimension_numbers<[1], [0], [0], [1], [0, 0, 1, 1], [], []>} : vector<8x64xf32>, vector<64x64xf32>, vector<8x64xf32> -> vector<8x64xf32>
    %c0_5 = arith.constant 0 : index
    %c1 = arith.constant 1 : index
    %c0_6 = arith.constant 0 : index
    %5 = vector.load %arg1[%c0_5, %c1, %c0_6] : memref<1x9x64xf32, #tpu.memory_space<vmem>>, vector<1x8x64xf32>
    %6 = vector.shape_cast %5 : vector<1x8x64xf32> to vector<8x64xf32>
    %c1_7 = arith.constant 1 : index
    %c0_8 = arith.constant 0 : index
    %c0_9 = arith.constant 0 : index
    %7 = vector.load %arg2[%c1_7, %c0_8, %c0_9] : memref<2x64x64xf32, #tpu.memory_space<vmem>>, vector<1x64x64xf32>
    %8 = vector.shape_cast %7 : vector<1x64x64xf32> to vector<64x64xf32>
    %cst_10 = arith.constant dense<0.000000e+00> : vector<8x64xf32>
    %9 = tpu.matmul %6, %8, %cst_10 {dimension_numbers = #tpu.dot_dimension_numbers<[1], [0], [0], [1], [0, 0, 1, 1], [], []>} : vector<8x64xf32>, vector<64x64xf32>, vector<8x64xf32> -> vector<8x64xf32>
    %10 = arith.addf %4, %9 : vector<8x64xf32>
    %c0_11 = arith.constant 0 : index
    %c0_12 = arith.constant 0 : index
    %11 = vector.load %arg3[%c0_11, %c0_12] : memref<1x64xf32, #tpu.memory_space<vmem>>, vector<1x64xf32>
    %c0_13 = arith.constant 0 : index
    %c0_14 = arith.constant 0 : index
    %12 = vector.load %arg4[%c0_13, %c0_14] : memref<1x64xf32, #tpu.memory_space<vmem>>, vector<1x64xf32>
    %cst_15 = arith.constant dense<0.000000e+00> : vector<64xf32>
    %13 = vector.multi_reduction <add>, %10, %cst_15 [0] : vector<8x64xf32> to vector<64xf32>
    %14 = vector.shape_cast %13 : vector<64xf32> to vector<1x64xf32>
    %cst_16 = arith.constant 1.250000e-01 : f32
    %15 = vector.broadcast %cst_16 : f32 to vector<1x64xf32>
    %16 = arith.mulf %14, %15 : vector<1x64xf32>
    %17 = vector.broadcast %16 : vector<1x64xf32> to vector<8x64xf32>
    %18 = arith.subf %10, %17 : vector<8x64xf32>
    %19 = arith.mulf %18, %18 : vector<8x64xf32>
    %cst_17 = arith.constant dense<0.000000e+00> : vector<64xf32>
    %20 = vector.multi_reduction <add>, %19, %cst_17 [0] : vector<8x64xf32> to vector<64xf32>
    %21 = vector.shape_cast %20 : vector<64xf32> to vector<1x64xf32>
    %cst_18 = arith.constant 1.250000e-01 : f32
    %22 = vector.broadcast %cst_18 : f32 to vector<1x64xf32>
    %23 = arith.mulf %21, %22 : vector<1x64xf32>
    %cst_19 = arith.constant 9.99999974E-6 : f32
    %24 = vector.broadcast %cst_19 : f32 to vector<1x64xf32>
    %25 = arith.addf %23, %24 : vector<1x64xf32>
    %26 = math.rsqrt %25 : vector<1x64xf32>
    %27 = arith.mulf %11, %26 : vector<1x64xf32>
    %28 = vector.broadcast %27 : vector<1x64xf32> to vector<8x64xf32>
    %29 = arith.mulf %18, %28 : vector<8x64xf32>
    %30 = vector.broadcast %12 : vector<1x64xf32> to vector<8x64xf32>
    %31 = arith.addf %29, %30 : vector<8x64xf32>
    %cst_20 = arith.constant 0.000000e+00 : f32
    %32 = vector.broadcast %cst_20 : f32 to vector<8x64xf32>
    %33 = arith.maximumf %31, %32 : vector<8x64xf32>
    %c0_21 = arith.constant 0 : index
    %c0_22 = arith.constant 0 : index
    %c0_23 = arith.constant 0 : index
    %34 = vector.load %arg5[%c0_21, %c0_22, %c0_23] : memref<1x8x64xf32, #tpu.memory_space<vmem>>, vector<1x8x64xf32>
    %35 = vector.shape_cast %34 : vector<1x8x64xf32> to vector<8x64xf32>
    %36 = vector.shape_cast %33 : vector<8x64xf32> to vector<1x8x64xf32>
    tpu.vector_store %arg5[%c0_21, %c0_22, %c0_23], %36 {strides = array<i32>} : memref<1x8x64xf32, #tpu.memory_space<vmem>>, vector<1x8x64xf32>,
    return
  }
  func.func @transform_0(%arg0: i32) -> (i32, i32, i32) {
    %c0_i32 = arith.constant 0 : i32
    %c0_i32_0 = arith.constant 0 : i32
    %c0_i32_1 = arith.constant 0 : i32
    return %arg0, %c0_i32, %c0_i32_0 : i32, i32, i32
  }
  func.func @transform_1(%arg0: i32) -> (i32, i32, i32) {
    %c0_i32 = arith.constant 0 : i32
    %c0_i32_0 = arith.constant 0 : i32
    %c0_i32_1 = arith.constant 0 : i32
    %c0_i32_2 = arith.constant 0 : i32
    return %c0_i32, %c0_i32_0, %c0_i32_1 : i32, i32, i32
  }
  func.func @transform_2(%arg0: i32) -> (i32, i32) {
    %c0_i32 = arith.constant 0 : i32
    %c0_i32_0 = arith.constant 0 : i32
    %c0_i32_1 = arith.constant 0 : i32
    return %c0_i32, %c0_i32_0 : i32, i32
  }
  func.func @transform_3(%arg0: i32) -> (i32, i32) {
    %c0_i32 = arith.constant 0 : i32
    %c0_i32_0 = arith.constant 0 : i32
    %c0_i32_1 = arith.constant 0 : i32
    return %c0_i32, %c0_i32_0 : i32, i32
  }
  func.func @transform_4(%arg0: i32) -> (i32, i32, i32) {
    %c0_i32 = arith.constant 0 : i32
    %c0_i32_0 = arith.constant 0 : i32
    %c0_i32_1 = arith.constant 0 : i32
    return %arg0, %c0_i32, %c0_i32_0 : i32, i32, i32
  }
}

module attributes {stable_mosaic.version = 11 : i64} {
  func.func @_conv_block_kernel(%arg0: i32, %arg1: memref<1x5x128xf32, #tpu.memory_space<vmem>>, %arg2: memref<2x128x128xf32, #tpu.memory_space<vmem>>, %arg3: memref<1x128xf32, #tpu.memory_space<vmem>>, %arg4: memref<1x128xf32, #tpu.memory_space<vmem>>, %arg5: memref<1x4x128xf32, #tpu.memory_space<vmem>>) attributes {dimension_semantics = [#tpu.dimension_semantics<parallel>], iteration_bounds = array<i64: 2>, scalar_prefetch = 0 : i64, scratch_operands = 0 : i64, tpu.core_type = #tpu.core_type<tc>, window_params = [{transform_indices = @transform_0, window_bounds = array<i64: 1, 5, 128>}, {pipeline_mode = #tpu.pipeline_mode<synchronous>, transform_indices = @transform_1, window_bounds = array<i64: 2, 128, 128>}, {pipeline_mode = #tpu.pipeline_mode<synchronous>, transform_indices = @transform_2, window_bounds = array<i64: 1, 128>}, {pipeline_mode = #tpu.pipeline_mode<synchronous>, transform_indices = @transform_3, window_bounds = array<i64: 1, 128>}, {transform_indices = @transform_4, window_bounds = array<i64: 1, 4, 128>}]} {
    %c0 = arith.constant 0 : index
    %c0_0 = arith.constant 0 : index
    %c0_1 = arith.constant 0 : index
    %0 = vector.load %arg1[%c0, %c0_0, %c0_1] : memref<1x5x128xf32, #tpu.memory_space<vmem>>, vector<1x4x128xf32>
    %1 = vector.shape_cast %0 : vector<1x4x128xf32> to vector<4x128xf32>
    %c0_2 = arith.constant 0 : index
    %c0_3 = arith.constant 0 : index
    %c0_4 = arith.constant 0 : index
    %2 = vector.load %arg2[%c0_2, %c0_3, %c0_4] : memref<2x128x128xf32, #tpu.memory_space<vmem>>, vector<1x128x128xf32>
    %3 = vector.shape_cast %2 : vector<1x128x128xf32> to vector<128x128xf32>
    %cst = arith.constant dense<0.000000e+00> : vector<4x128xf32>
    %4 = tpu.matmul %1, %3, %cst {dimension_numbers = #tpu.dot_dimension_numbers<[1], [0], [0], [1], [0, 0, 1, 1], [], []>} : vector<4x128xf32>, vector<128x128xf32>, vector<4x128xf32> -> vector<4x128xf32>
    %c0_5 = arith.constant 0 : index
    %c1 = arith.constant 1 : index
    %c0_6 = arith.constant 0 : index
    %5 = vector.load %arg1[%c0_5, %c1, %c0_6] : memref<1x5x128xf32, #tpu.memory_space<vmem>>, vector<1x4x128xf32>
    %6 = vector.shape_cast %5 : vector<1x4x128xf32> to vector<4x128xf32>
    %c1_7 = arith.constant 1 : index
    %c0_8 = arith.constant 0 : index
    %c0_9 = arith.constant 0 : index
    %7 = vector.load %arg2[%c1_7, %c0_8, %c0_9] : memref<2x128x128xf32, #tpu.memory_space<vmem>>, vector<1x128x128xf32>
    %8 = vector.shape_cast %7 : vector<1x128x128xf32> to vector<128x128xf32>
    %cst_10 = arith.constant dense<0.000000e+00> : vector<4x128xf32>
    %9 = tpu.matmul %6, %8, %cst_10 {dimension_numbers = #tpu.dot_dimension_numbers<[1], [0], [0], [1], [0, 0, 1, 1], [], []>} : vector<4x128xf32>, vector<128x128xf32>, vector<4x128xf32> -> vector<4x128xf32>
    %10 = arith.addf %4, %9 : vector<4x128xf32>
    %c0_11 = arith.constant 0 : index
    %c0_12 = arith.constant 0 : index
    %11 = vector.load %arg3[%c0_11, %c0_12] : memref<1x128xf32, #tpu.memory_space<vmem>>, vector<1x128xf32>
    %c0_13 = arith.constant 0 : index
    %c0_14 = arith.constant 0 : index
    %12 = vector.load %arg4[%c0_13, %c0_14] : memref<1x128xf32, #tpu.memory_space<vmem>>, vector<1x128xf32>
    %cst_15 = arith.constant dense<0.000000e+00> : vector<128xf32>
    %13 = vector.multi_reduction <add>, %10, %cst_15 [0] : vector<4x128xf32> to vector<128xf32>
    %14 = vector.shape_cast %13 : vector<128xf32> to vector<1x128xf32>
    %cst_16 = arith.constant 2.500000e-01 : f32
    %15 = vector.broadcast %cst_16 : f32 to vector<1x128xf32>
    %16 = arith.mulf %14, %15 : vector<1x128xf32>
    %17 = vector.broadcast %16 : vector<1x128xf32> to vector<4x128xf32>
    %18 = arith.subf %10, %17 : vector<4x128xf32>
    %19 = arith.mulf %18, %18 : vector<4x128xf32>
    %cst_17 = arith.constant dense<0.000000e+00> : vector<128xf32>
    %20 = vector.multi_reduction <add>, %19, %cst_17 [0] : vector<4x128xf32> to vector<128xf32>
    %21 = vector.shape_cast %20 : vector<128xf32> to vector<1x128xf32>
    %cst_18 = arith.constant 2.500000e-01 : f32
    %22 = vector.broadcast %cst_18 : f32 to vector<1x128xf32>
    %23 = arith.mulf %21, %22 : vector<1x128xf32>
    %cst_19 = arith.constant 9.99999974E-6 : f32
    %24 = vector.broadcast %cst_19 : f32 to vector<1x128xf32>
    %25 = arith.addf %23, %24 : vector<1x128xf32>
    %26 = math.rsqrt %25 : vector<1x128xf32>
    %27 = arith.mulf %11, %26 : vector<1x128xf32>
    %28 = vector.broadcast %27 : vector<1x128xf32> to vector<4x128xf32>
    %29 = arith.mulf %18, %28 : vector<4x128xf32>
    %30 = vector.broadcast %12 : vector<1x128xf32> to vector<4x128xf32>
    %31 = arith.addf %29, %30 : vector<4x128xf32>
    %cst_20 = arith.constant 0.000000e+00 : f32
    %32 = vector.broadcast %cst_20 : f32 to vector<4x128xf32>
    %33 = arith.maximumf %31, %32 : vector<4x128xf32>
    %c0_21 = arith.constant 0 : index
    %c0_22 = arith.constant 0 : index
    %c0_23 = arith.constant 0 : index
    %34 = vector.load %arg5[%c0_21, %c0_22, %c0_23] : memref<1x4x128xf32, #tpu.memory_space<vmem>>, vector<1x4x128xf32>
    %35 = vector.shape_cast %34 : vector<1x4x128xf32> to vector<4x128xf32>
    %36 = vector.shape_cast %33 : vector<4x128xf32> to vector<1x4x128xf32>
    tpu.vector_store %arg5[%c0_21, %c0_22, %c0_23], %36 {strides = array<i32>} : memref<1x4x128xf32, #tpu.memory_space<vmem>>, vector<1x4x128xf32>,
    return
  }
  func.func @transform_0(%arg0: i32) -> (i32, i32, i32) {
    %c0_i32 = arith.constant 0 : i32
    %c0_i32_0 = arith.constant 0 : i32
    %c0_i32_1 = arith.constant 0 : i32
    return %arg0, %c0_i32, %c0_i32_0 : i32, i32, i32
  }
  func.func @transform_1(%arg0: i32) -> (i32, i32, i32) {
    %c0_i32 = arith.constant 0 : i32
    %c0_i32_0 = arith.constant 0 : i32
    %c0_i32_1 = arith.constant 0 : i32
    %c0_i32_2 = arith.constant 0 : i32
    return %c0_i32, %c0_i32_0, %c0_i32_1 : i32, i32, i32
  }
  func.func @transform_2(%arg0: i32) -> (i32, i32) {
    %c0_i32 = arith.constant 0 : i32
    %c0_i32_0 = arith.constant 0 : i32
    %c0_i32_1 = arith.constant 0 : i32
    return %c0_i32, %c0_i32_0 : i32, i32
  }
  func.func @transform_3(%arg0: i32) -> (i32, i32) {
    %c0_i32 = arith.constant 0 : i32
    %c0_i32_0 = arith.constant 0 : i32
    %c0_i32_1 = arith.constant 0 : i32
    return %c0_i32, %c0_i32_0 : i32, i32
  }
  func.func @transform_4(%arg0: i32) -> (i32, i32, i32) {
    %c0_i32 = arith.constant 0 : i32
    %c0_i32_0 = arith.constant 0 : i32
    %c0_i32_1 = arith.constant 0 : i32
    return %arg0, %c0_i32, %c0_i32_0 : i32, i32, i32
  }
}

module attributes {stable_mosaic.version = 11 : i64} {
  func.func @_resblock_kernel(%arg0: i32, %arg1: memref<1x6x128xf32, #tpu.memory_space<vmem>>, %arg2: memref<3x128x128xf32, #tpu.memory_space<vmem>>, %arg3: memref<1x128xf32, #tpu.memory_space<vmem>>, %arg4: memref<1x128xf32, #tpu.memory_space<vmem>>, %arg5: memref<3x128x128xf32, #tpu.memory_space<vmem>>, %arg6: memref<1x128xf32, #tpu.memory_space<vmem>>, %arg7: memref<1x128xf32, #tpu.memory_space<vmem>>, %arg8: memref<1x4x128xf32, #tpu.memory_space<vmem>>) attributes {dimension_semantics = [#tpu.dimension_semantics<parallel>], iteration_bounds = array<i64: 2>, scalar_prefetch = 0 : i64, scratch_operands = 0 : i64, tpu.core_type = #tpu.core_type<tc>, window_params = [{transform_indices = @transform_0, window_bounds = array<i64: 1, 6, 128>}, {pipeline_mode = #tpu.pipeline_mode<synchronous>, transform_indices = @transform_1, window_bounds = array<i64: 3, 128, 128>}, {pipeline_mode = #tpu.pipeline_mode<synchronous>, transform_indices = @transform_2, window_bounds = array<i64: 1, 128>}, {pipeline_mode = #tpu.pipeline_mode<synchronous>, transform_indices = @transform_3, window_bounds = array<i64: 1, 128>}, {pipeline_mode = #tpu.pipeline_mode<synchronous>, transform_indices = @transform_4, window_bounds = array<i64: 3, 128, 128>}, {pipeline_mode = #tpu.pipeline_mode<synchronous>, transform_indices = @transform_5, window_bounds = array<i64: 1, 128>}, {pipeline_mode = #tpu.pipeline_mode<synchronous>, transform_indices = @transform_6, window_bounds = array<i64: 1, 128>}, {transform_indices = @transform_7, window_bounds = array<i64: 1, 4, 128>}]} {
    %c0 = arith.constant 0 : index
    %c0_0 = arith.constant 0 : index
    %c0_1 = arith.constant 0 : index
    %0 = vector.load %arg1[%c0, %c0_0, %c0_1] : memref<1x6x128xf32, #tpu.memory_space<vmem>>, vector<1x4x128xf32>
    %1 = vector.shape_cast %0 : vector<1x4x128xf32> to vector<4x128xf32>
    %c0_2 = arith.constant 0 : index
    %c0_3 = arith.constant 0 : index
    %c0_4 = arith.constant 0 : index
    %2 = vector.load %arg2[%c0_2, %c0_3, %c0_4] : memref<3x128x128xf32, #tpu.memory_space<vmem>>, vector<1x128x128xf32>
    %3 = vector.shape_cast %2 : vector<1x128x128xf32> to vector<128x128xf32>
    %cst = arith.constant dense<0.000000e+00> : vector<4x128xf32>
    %4 = tpu.matmul %1, %3, %cst {dimension_numbers = #tpu.dot_dimension_numbers<[1], [0], [0], [1], [0, 0, 1, 1], [], []>} : vector<4x128xf32>, vector<128x128xf32>, vector<4x128xf32> -> vector<4x128xf32>
    %c0_5 = arith.constant 0 : index
    %c1 = arith.constant 1 : index
    %c0_6 = arith.constant 0 : index
    %5 = vector.load %arg1[%c0_5, %c1, %c0_6] : memref<1x6x128xf32, #tpu.memory_space<vmem>>, vector<1x4x128xf32>
    %6 = vector.shape_cast %5 : vector<1x4x128xf32> to vector<4x128xf32>
    %c1_7 = arith.constant 1 : index
    %c0_8 = arith.constant 0 : index
    %c0_9 = arith.constant 0 : index
    %7 = vector.load %arg2[%c1_7, %c0_8, %c0_9] : memref<3x128x128xf32, #tpu.memory_space<vmem>>, vector<1x128x128xf32>
    %8 = vector.shape_cast %7 : vector<1x128x128xf32> to vector<128x128xf32>
    %cst_10 = arith.constant dense<0.000000e+00> : vector<4x128xf32>
    %9 = tpu.matmul %6, %8, %cst_10 {dimension_numbers = #tpu.dot_dimension_numbers<[1], [0], [0], [1], [0, 0, 1, 1], [], []>} : vector<4x128xf32>, vector<128x128xf32>, vector<4x128xf32> -> vector<4x128xf32>
    %10 = arith.addf %4, %9 : vector<4x128xf32>
    %c0_11 = arith.constant 0 : index
    %c2 = arith.constant 2 : index
    %c0_12 = arith.constant 0 : index
    %11 = vector.load %arg1[%c0_11, %c2, %c0_12] : memref<1x6x128xf32, #tpu.memory_space<vmem>>, vector<1x4x128xf32>
    %12 = vector.shape_cast %11 : vector<1x4x128xf32> to vector<4x128xf32>
    %c2_13 = arith.constant 2 : index
    %c0_14 = arith.constant 0 : index
    %c0_15 = arith.constant 0 : index
    %13 = vector.load %arg2[%c2_13, %c0_14, %c0_15] : memref<3x128x128xf32, #tpu.memory_space<vmem>>, vector<1x128x128xf32>
    %14 = vector.shape_cast %13 : vector<1x128x128xf32> to vector<128x128xf32>
    %cst_16 = arith.constant dense<0.000000e+00> : vector<4x128xf32>
    %15 = tpu.matmul %12, %14, %cst_16 {dimension_numbers = #tpu.dot_dimension_numbers<[1], [0], [0], [1], [0, 0, 1, 1], [], []>} : vector<4x128xf32>, vector<128x128xf32>, vector<4x128xf32> -> vector<4x128xf32>
    %16 = arith.addf %10, %15 : vector<4x128xf32>
    %c0_17 = arith.constant 0 : index
    %c0_18 = arith.constant 0 : index
    %17 = vector.load %arg3[%c0_17, %c0_18] : memref<1x128xf32, #tpu.memory_space<vmem>>, vector<1x128xf32>
    %c0_19 = arith.constant 0 : index
    %c0_20 = arith.constant 0 : index
    %18 = vector.load %arg4[%c0_19, %c0_20] : memref<1x128xf32, #tpu.memory_space<vmem>>, vector<1x128xf32>
    %cst_21 = arith.constant dense<0.000000e+00> : vector<128xf32>
    %19 = vector.multi_reduction <add>, %16, %cst_21 [0] : vector<4x128xf32> to vector<128xf32>
    %20 = vector.shape_cast %19 : vector<128xf32> to vector<1x128xf32>
    %cst_22 = arith.constant 2.500000e-01 : f32
    %21 = vector.broadcast %cst_22 : f32 to vector<1x128xf32>
    %22 = arith.mulf %20, %21 : vector<1x128xf32>
    %23 = vector.broadcast %22 : vector<1x128xf32> to vector<4x128xf32>
    %24 = arith.subf %16, %23 : vector<4x128xf32>
    %25 = arith.mulf %24, %24 : vector<4x128xf32>
    %cst_23 = arith.constant dense<0.000000e+00> : vector<128xf32>
    %26 = vector.multi_reduction <add>, %25, %cst_23 [0] : vector<4x128xf32> to vector<128xf32>
    %27 = vector.shape_cast %26 : vector<128xf32> to vector<1x128xf32>
    %cst_24 = arith.constant 2.500000e-01 : f32
    %28 = vector.broadcast %cst_24 : f32 to vector<1x128xf32>
    %29 = arith.mulf %27, %28 : vector<1x128xf32>
    %cst_25 = arith.constant 9.99999974E-6 : f32
    %30 = vector.broadcast %cst_25 : f32 to vector<1x128xf32>
    %31 = arith.addf %29, %30 : vector<1x128xf32>
    %32 = math.rsqrt %31 : vector<1x128xf32>
    %33 = arith.mulf %17, %32 : vector<1x128xf32>
    %34 = vector.broadcast %33 : vector<1x128xf32> to vector<4x128xf32>
    %35 = arith.mulf %24, %34 : vector<4x128xf32>
    %36 = vector.broadcast %18 : vector<1x128xf32> to vector<4x128xf32>
    %37 = arith.addf %35, %36 : vector<4x128xf32>
    %cst_26 = arith.constant 0.000000e+00 : f32
    %38 = vector.broadcast %cst_26 : f32 to vector<4x128xf32>
    %39 = arith.maximumf %37, %38 : vector<4x128xf32>
    %cst_27 = arith.constant 0.000000e+00 : f32
    %40 = vector.broadcast %cst_27 : f32 to vector<1x128xf32>
    %41 = tpu.concatenate %40, %39, %40 in 0 : vector<1x128xf32>, vector<4x128xf32>, vector<1x128xf32> -> vector<6x128xf32>
    %42 = vector.extract_strided_slice %41 {offsets = [0, 0], sizes = [4, 128], strides = [1, 1]} : vector<6x128xf32> to vector<4x128xf32>
    %c0_28 = arith.constant 0 : index
    %c0_29 = arith.constant 0 : index
    %c0_30 = arith.constant 0 : index
    %43 = vector.load %arg5[%c0_28, %c0_29, %c0_30] : memref<3x128x128xf32, #tpu.memory_space<vmem>>, vector<1x128x128xf32>
    %44 = vector.shape_cast %43 : vector<1x128x128xf32> to vector<128x128xf32>
    %cst_31 = arith.constant dense<0.000000e+00> : vector<4x128xf32>
    %45 = tpu.matmul %42, %44, %cst_31 {dimension_numbers = #tpu.dot_dimension_numbers<[1], [0], [0], [1], [0, 0, 1, 1], [], []>} : vector<4x128xf32>, vector<128x128xf32>, vector<4x128xf32> -> vector<4x128xf32>
    %46 = vector.extract_strided_slice %41 {offsets = [1, 0], sizes = [4, 128], strides = [1, 1]} : vector<6x128xf32> to vector<4x128xf32>
    %c1_32 = arith.constant 1 : index
    %c0_33 = arith.constant 0 : index
    %c0_34 = arith.constant 0 : index
    %47 = vector.load %arg5[%c1_32, %c0_33, %c0_34] : memref<3x128x128xf32, #tpu.memory_space<vmem>>, vector<1x128x128xf32>
    %48 = vector.shape_cast %47 : vector<1x128x128xf32> to vector<128x128xf32>
    %cst_35 = arith.constant dense<0.000000e+00> : vector<4x128xf32>
    %49 = tpu.matmul %46, %48, %cst_35 {dimension_numbers = #tpu.dot_dimension_numbers<[1], [0], [0], [1], [0, 0, 1, 1], [], []>} : vector<4x128xf32>, vector<128x128xf32>, vector<4x128xf32> -> vector<4x128xf32>
    %50 = arith.addf %45, %49 : vector<4x128xf32>
    %51 = vector.extract_strided_slice %41 {offsets = [2, 0], sizes = [4, 128], strides = [1, 1]} : vector<6x128xf32> to vector<4x128xf32>
    %c2_36 = arith.constant 2 : index
    %c0_37 = arith.constant 0 : index
    %c0_38 = arith.constant 0 : index
    %52 = vector.load %arg5[%c2_36, %c0_37, %c0_38] : memref<3x128x128xf32, #tpu.memory_space<vmem>>, vector<1x128x128xf32>
    %53 = vector.shape_cast %52 : vector<1x128x128xf32> to vector<128x128xf32>
    %cst_39 = arith.constant dense<0.000000e+00> : vector<4x128xf32>
    %54 = tpu.matmul %51, %53, %cst_39 {dimension_numbers = #tpu.dot_dimension_numbers<[1], [0], [0], [1], [0, 0, 1, 1], [], []>} : vector<4x128xf32>, vector<128x128xf32>, vector<4x128xf32> -> vector<4x128xf32>
    %55 = arith.addf %50, %54 : vector<4x128xf32>
    %c0_40 = arith.constant 0 : index
    %c0_41 = arith.constant 0 : index
    %56 = vector.load %arg6[%c0_40, %c0_41] : memref<1x128xf32, #tpu.memory_space<vmem>>, vector<1x128xf32>
    %c0_42 = arith.constant 0 : index
    %c0_43 = arith.constant 0 : index
    %57 = vector.load %arg7[%c0_42, %c0_43] : memref<1x128xf32, #tpu.memory_space<vmem>>, vector<1x128xf32>
    %cst_44 = arith.constant dense<0.000000e+00> : vector<128xf32>
    %58 = vector.multi_reduction <add>, %55, %cst_44 [0] : vector<4x128xf32> to vector<128xf32>
    %59 = vector.shape_cast %58 : vector<128xf32> to vector<1x128xf32>
    %cst_45 = arith.constant 2.500000e-01 : f32
    %60 = vector.broadcast %cst_45 : f32 to vector<1x128xf32>
    %61 = arith.mulf %59, %60 : vector<1x128xf32>
    %62 = vector.broadcast %61 : vector<1x128xf32> to vector<4x128xf32>
    %63 = arith.subf %55, %62 : vector<4x128xf32>
    %64 = arith.mulf %63, %63 : vector<4x128xf32>
    %cst_46 = arith.constant dense<0.000000e+00> : vector<128xf32>
    %65 = vector.multi_reduction <add>, %64, %cst_46 [0] : vector<4x128xf32> to vector<128xf32>
    %66 = vector.shape_cast %65 : vector<128xf32> to vector<1x128xf32>
    %cst_47 = arith.constant 2.500000e-01 : f32
    %67 = vector.broadcast %cst_47 : f32 to vector<1x128xf32>
    %68 = arith.mulf %66, %67 : vector<1x128xf32>
    %cst_48 = arith.constant 9.99999974E-6 : f32
    %69 = vector.broadcast %cst_48 : f32 to vector<1x128xf32>
    %70 = arith.addf %68, %69 : vector<1x128xf32>
    %71 = math.rsqrt %70 : vector<1x128xf32>
    %72 = arith.mulf %56, %71 : vector<1x128xf32>
    %73 = vector.broadcast %72 : vector<1x128xf32> to vector<4x128xf32>
    %74 = arith.mulf %63, %73 : vector<4x128xf32>
    %75 = vector.broadcast %57 : vector<1x128xf32> to vector<4x128xf32>
    %76 = arith.addf %74, %75 : vector<4x128xf32>
    %c0_49 = arith.constant 0 : index
    %c1_50 = arith.constant 1 : index
    %c0_51 = arith.constant 0 : index
    %77 = vector.load %arg1[%c0_49, %c1_50, %c0_51] : memref<1x6x128xf32, #tpu.memory_space<vmem>>, vector<1x4x128xf32>
    %78 = vector.shape_cast %77 : vector<1x4x128xf32> to vector<4x128xf32>
    %79 = arith.addf %76, %78 : vector<4x128xf32>
    %c0_52 = arith.constant 0 : index
    %c0_53 = arith.constant 0 : index
    %c0_54 = arith.constant 0 : index
    %80 = vector.load %arg8[%c0_52, %c0_53, %c0_54] : memref<1x4x128xf32, #tpu.memory_space<vmem>>, vector<1x4x128xf32>
    %81 = vector.shape_cast %80 : vector<1x4x128xf32> to vector<4x128xf32>
    %82 = vector.shape_cast %79 : vector<4x128xf32> to vector<1x4x128xf32>
    tpu.vector_store %arg8[%c0_52, %c0_53, %c0_54], %82 {strides = array<i32>} : memref<1x4x128xf32, #tpu.memory_space<vmem>>, vector<1x4x128xf32>,
    return
  }
  func.func @transform_0(%arg0: i32) -> (i32, i32, i32) {
    %c0_i32 = arith.constant 0 : i32
    %c0_i32_0 = arith.constant 0 : i32
    %c0_i32_1 = arith.constant 0 : i32
    return %arg0, %c0_i32, %c0_i32_0 : i32, i32, i32
  }
  func.func @transform_1(%arg0: i32) -> (i32, i32, i32) {
    %c0_i32 = arith.constant 0 : i32
    %c0_i32_0 = arith.constant 0 : i32
    %c0_i32_1 = arith.constant 0 : i32
    %c0_i32_2 = arith.constant 0 : i32
    return %c0_i32, %c0_i32_0, %c0_i32_1 : i32, i32, i32
  }
  func.func @transform_2(%arg0: i32) -> (i32, i32) {
    %c0_i32 = arith.constant 0 : i32
    %c0_i32_0 = arith.constant 0 : i32
    %c0_i32_1 = arith.constant 0 : i32
    return %c0_i32, %c0_i32_0 : i32, i32
  }
  func.func @transform_3(%arg0: i32) -> (i32, i32) {
    %c0_i32 = arith.constant 0 : i32
    %c0_i32_0 = arith.constant 0 : i32
    %c0_i32_1 = arith.constant 0 : i32
    return %c0_i32, %c0_i32_0 : i32, i32
  }
  func.func @transform_4(%arg0: i32) -> (i32, i32, i32) {
    %c0_i32 = arith.constant 0 : i32
    %c0_i32_0 = arith.constant 0 : i32
    %c0_i32_1 = arith.constant 0 : i32
    %c0_i32_2 = arith.constant 0 : i32
    return %c0_i32, %c0_i32_0, %c0_i32_1 : i32, i32, i32
  }
  func.func @transform_5(%arg0: i32) -> (i32, i32) {
    %c0_i32 = arith.constant 0 : i32
    %c0_i32_0 = arith.constant 0 : i32
    %c0_i32_1 = arith.constant 0 : i32
    return %c0_i32, %c0_i32_0 : i32, i32
  }
  func.func @transform_6(%arg0: i32) -> (i32, i32) {
    %c0_i32 = arith.constant 0 : i32
    %c0_i32_0 = arith.constant 0 : i32
    %c0_i32_1 = arith.constant 0 : i32
    return %c0_i32, %c0_i32_0 : i32, i32
  }
  func.func @transform_7(%arg0: i32) -> (i32, i32, i32) {
    %c0_i32 = arith.constant 0 : i32
    %c0_i32_0 = arith.constant 0 : i32
    %c0_i32_1 = arith.constant 0 : i32
    return %arg0, %c0_i32, %c0_i32_0 : i32, i32, i32
  }
}

module attributes {stable_mosaic.version = 11 : i64} {
  func.func @_upsample_block_kernel(%arg0: i32, %arg1: memref<1x6x128xf32, #tpu.memory_space<vmem>>, %arg2: memref<4x128x64xf32, #tpu.memory_space<vmem>>, %arg3: memref<1x64xf32, #tpu.memory_space<vmem>>, %arg4: memref<1x64xf32, #tpu.memory_space<vmem>>, %arg5: memref<1x4x128xf32, #tpu.memory_space<vmem>>) attributes {dimension_semantics = [#tpu.dimension_semantics<parallel>], iteration_bounds = array<i64: 2>, scalar_prefetch = 0 : i64, scratch_operands = 0 : i64, tpu.core_type = #tpu.core_type<tc>, window_params = [{transform_indices = @transform_0, window_bounds = array<i64: 1, 6, 128>}, {pipeline_mode = #tpu.pipeline_mode<synchronous>, transform_indices = @transform_1, window_bounds = array<i64: 4, 128, 64>}, {pipeline_mode = #tpu.pipeline_mode<synchronous>, transform_indices = @transform_2, window_bounds = array<i64: 1, 64>}, {pipeline_mode = #tpu.pipeline_mode<synchronous>, transform_indices = @transform_3, window_bounds = array<i64: 1, 64>}, {transform_indices = @transform_4, window_bounds = array<i64: 1, 4, 128>}]} {
    %c0 = arith.constant 0 : index
    %c0_0 = arith.constant 0 : index
    %c0_1 = arith.constant 0 : index
    %0 = vector.load %arg1[%c0, %c0_0, %c0_1] : memref<1x6x128xf32, #tpu.memory_space<vmem>>, vector<1x4x128xf32>
    %1 = vector.shape_cast %0 : vector<1x4x128xf32> to vector<4x128xf32>
    %c0_2 = arith.constant 0 : index
    %c0_3 = arith.constant 0 : index
    %c0_4 = arith.constant 0 : index
    %2 = vector.load %arg2[%c0_2, %c0_3, %c0_4] : memref<4x128x64xf32, #tpu.memory_space<vmem>>, vector<1x128x64xf32>
    %3 = vector.shape_cast %2 : vector<1x128x64xf32> to vector<128x64xf32>
    %cst = arith.constant dense<0.000000e+00> : vector<4x64xf32>
    %4 = tpu.matmul %1, %3, %cst {dimension_numbers = #tpu.dot_dimension_numbers<[1], [0], [0], [1], [0, 0, 1, 1], [], []>} : vector<4x128xf32>, vector<128x64xf32>, vector<4x64xf32> -> vector<4x64xf32>
    %c0_5 = arith.constant 0 : index
    %c1 = arith.constant 1 : index
    %c0_6 = arith.constant 0 : index
    %5 = vector.load %arg1[%c0_5, %c1, %c0_6] : memref<1x6x128xf32, #tpu.memory_space<vmem>>, vector<1x4x128xf32>
    %6 = vector.shape_cast %5 : vector<1x4x128xf32> to vector<4x128xf32>
    %c1_7 = arith.constant 1 : index
    %c0_8 = arith.constant 0 : index
    %c0_9 = arith.constant 0 : index
    %7 = vector.load %arg2[%c1_7, %c0_8, %c0_9] : memref<4x128x64xf32, #tpu.memory_space<vmem>>, vector<1x128x64xf32>
    %8 = vector.shape_cast %7 : vector<1x128x64xf32> to vector<128x64xf32>
    %cst_10 = arith.constant dense<0.000000e+00> : vector<4x64xf32>
    %9 = tpu.matmul %6, %8, %cst_10 {dimension_numbers = #tpu.dot_dimension_numbers<[1], [0], [0], [1], [0, 0, 1, 1], [], []>} : vector<4x128xf32>, vector<128x64xf32>, vector<4x64xf32> -> vector<4x64xf32>
    %10 = arith.addf %4, %9 : vector<4x64xf32>
    %c0_11 = arith.constant 0 : index
    %c1_12 = arith.constant 1 : index
    %c0_13 = arith.constant 0 : index
    %11 = vector.load %arg1[%c0_11, %c1_12, %c0_13] : memref<1x6x128xf32, #tpu.memory_space<vmem>>, vector<1x4x128xf32>
    %12 = vector.shape_cast %11 : vector<1x4x128xf32> to vector<4x128xf32>
    %c2 = arith.constant 2 : index
    %c0_14 = arith.constant 0 : index
    %c0_15 = arith.constant 0 : index
    %13 = vector.load %arg2[%c2, %c0_14, %c0_15] : memref<4x128x64xf32, #tpu.memory_space<vmem>>, vector<1x128x64xf32>
    %14 = vector.shape_cast %13 : vector<1x128x64xf32> to vector<128x64xf32>
    %cst_16 = arith.constant dense<0.000000e+00> : vector<4x64xf32>
    %15 = tpu.matmul %12, %14, %cst_16 {dimension_numbers = #tpu.dot_dimension_numbers<[1], [0], [0], [1], [0, 0, 1, 1], [], []>} : vector<4x128xf32>, vector<128x64xf32>, vector<4x64xf32> -> vector<4x64xf32>
    %c0_17 = arith.constant 0 : index
    %c2_18 = arith.constant 2 : index
    %c0_19 = arith.constant 0 : index
    %16 = vector.load %arg1[%c0_17, %c2_18, %c0_19] : memref<1x6x128xf32, #tpu.memory_space<vmem>>, vector<1x4x128xf32>
    %17 = vector.shape_cast %16 : vector<1x4x128xf32> to vector<4x128xf32>
    %c3 = arith.constant 3 : index
    %c0_20 = arith.constant 0 : index
    %c0_21 = arith.constant 0 : index
    %18 = vector.load %arg2[%c3, %c0_20, %c0_21] : memref<4x128x64xf32, #tpu.memory_space<vmem>>, vector<1x128x64xf32>
    %19 = vector.shape_cast %18 : vector<1x128x64xf32> to vector<128x64xf32>
    %cst_22 = arith.constant dense<0.000000e+00> : vector<4x64xf32>
    %20 = tpu.matmul %17, %19, %cst_22 {dimension_numbers = #tpu.dot_dimension_numbers<[1], [0], [0], [1], [0, 0, 1, 1], [], []>} : vector<4x128xf32>, vector<128x64xf32>, vector<4x64xf32> -> vector<4x64xf32>
    %21 = arith.addf %15, %20 : vector<4x64xf32>
    %cst_23 = arith.constant dense<0.000000e+00> : vector<64xf32>
    %22 = vector.multi_reduction <add>, %10, %cst_23 [0] : vector<4x64xf32> to vector<64xf32>
    %23 = vector.shape_cast %22 : vector<64xf32> to vector<1x64xf32>
    %cst_24 = arith.constant dense<0.000000e+00> : vector<64xf32>
    %24 = vector.multi_reduction <add>, %21, %cst_24 [0] : vector<4x64xf32> to vector<64xf32>
    %25 = vector.shape_cast %24 : vector<64xf32> to vector<1x64xf32>
    %26 = arith.addf %23, %25 : vector<1x64xf32>
    %cst_25 = arith.constant 1.250000e-01 : f32
    %27 = vector.broadcast %cst_25 : f32 to vector<1x64xf32>
    %28 = arith.mulf %26, %27 : vector<1x64xf32>
    %29 = vector.broadcast %28 : vector<1x64xf32> to vector<4x64xf32>
    %30 = arith.subf %10, %29 : vector<4x64xf32>
    %31 = vector.broadcast %28 : vector<1x64xf32> to vector<4x64xf32>
    %32 = arith.subf %21, %31 : vector<4x64xf32>
    %33 = arith.mulf %30, %30 : vector<4x64xf32>
    %cst_26 = arith.constant dense<0.000000e+00> : vector<64xf32>
    %34 = vector.multi_reduction <add>, %33, %cst_26 [0] : vector<4x64xf32> to vector<64xf32>
    %35 = vector.shape_cast %34 : vector<64xf32> to vector<1x64xf32>
    %36 = arith.mulf %32, %32 : vector<4x64xf32>
    %cst_27 = arith.constant dense<0.000000e+00> : vector<64xf32>
    %37 = vector.multi_reduction <add>, %36, %cst_27 [0] : vector<4x64xf32> to vector<64xf32>
    %38 = vector.shape_cast %37 : vector<64xf32> to vector<1x64xf32>
    %39 = arith.addf %35, %38 : vector<1x64xf32>
    %cst_28 = arith.constant 1.250000e-01 : f32
    %40 = vector.broadcast %cst_28 : f32 to vector<1x64xf32>
    %41 = arith.mulf %39, %40 : vector<1x64xf32>
    %c0_29 = arith.constant 0 : index
    %c0_30 = arith.constant 0 : index
    %42 = vector.load %arg3[%c0_29, %c0_30] : memref<1x64xf32, #tpu.memory_space<vmem>>, vector<1x64xf32>
    %cst_31 = arith.constant 9.99999974E-6 : f32
    %43 = vector.broadcast %cst_31 : f32 to vector<1x64xf32>
    %44 = arith.addf %41, %43 : vector<1x64xf32>
    %45 = math.rsqrt %44 : vector<1x64xf32>
    %46 = arith.mulf %42, %45 : vector<1x64xf32>
    %c0_32 = arith.constant 0 : index
    %c0_33 = arith.constant 0 : index
    %47 = vector.load %arg4[%c0_32, %c0_33] : memref<1x64xf32, #tpu.memory_space<vmem>>, vector<1x64xf32>
    %48 = vector.broadcast %46 : vector<1x64xf32> to vector<4x64xf32>
    %49 = arith.mulf %30, %48 : vector<4x64xf32>
    %50 = vector.broadcast %47 : vector<1x64xf32> to vector<4x64xf32>
    %51 = arith.addf %49, %50 : vector<4x64xf32>
    %cst_34 = arith.constant 0.000000e+00 : f32
    %52 = vector.broadcast %cst_34 : f32 to vector<4x64xf32>
    %53 = arith.maximumf %51, %52 : vector<4x64xf32>
    %54 = vector.broadcast %46 : vector<1x64xf32> to vector<4x64xf32>
    %55 = arith.mulf %32, %54 : vector<4x64xf32>
    %56 = vector.broadcast %47 : vector<1x64xf32> to vector<4x64xf32>
    %57 = arith.addf %55, %56 : vector<4x64xf32>
    %cst_35 = arith.constant 0.000000e+00 : f32
    %58 = vector.broadcast %cst_35 : f32 to vector<4x64xf32>
    %59 = arith.maximumf %57, %58 : vector<4x64xf32>
    %60 = tpu.concatenate %53, %59 in 1 : vector<4x64xf32>, vector<4x64xf32> -> vector<4x128xf32>
    %c0_36 = arith.constant 0 : index
    %c0_37 = arith.constant 0 : index
    %c0_38 = arith.constant 0 : index
    %61 = vector.load %arg5[%c0_36, %c0_37, %c0_38] : memref<1x4x128xf32, #tpu.memory_space<vmem>>, vector<1x4x128xf32>
    %62 = vector.shape_cast %61 : vector<1x4x128xf32> to vector<4x128xf32>
    %63 = vector.shape_cast %60 : vector<4x128xf32> to vector<1x4x128xf32>
    tpu.vector_store %arg5[%c0_36, %c0_37, %c0_38], %63 {strides = array<i32>} : memref<1x4x128xf32, #tpu.memory_space<vmem>>, vector<1x4x128xf32>,
    return
  }
  func.func @transform_0(%arg0: i32) -> (i32, i32, i32) {
    %c0_i32 = arith.constant 0 : i32
    %c0_i32_0 = arith.constant 0 : i32
    %c0_i32_1 = arith.constant 0 : i32
    return %arg0, %c0_i32, %c0_i32_0 : i32, i32, i32
  }
  func.func @transform_1(%arg0: i32) -> (i32, i32, i32) {
    %c0_i32 = arith.constant 0 : i32
    %c0_i32_0 = arith.constant 0 : i32
    %c0_i32_1 = arith.constant 0 : i32
    %c0_i32_2 = arith.constant 0 : i32
    return %c0_i32, %c0_i32_0, %c0_i32_1 : i32, i32, i32
  }
  func.func @transform_2(%arg0: i32) -> (i32, i32) {
    %c0_i32 = arith.constant 0 : i32
    %c0_i32_0 = arith.constant 0 : i32
    %c0_i32_1 = arith.constant 0 : i32
    return %c0_i32, %c0_i32_0 : i32, i32
  }
  func.func @transform_3(%arg0: i32) -> (i32, i32) {
    %c0_i32 = arith.constant 0 : i32
    %c0_i32_0 = arith.constant 0 : i32
    %c0_i32_1 = arith.constant 0 : i32
    return %c0_i32, %c0_i32_0 : i32, i32
  }
  func.func @transform_4(%arg0: i32) -> (i32, i32, i32) {
    %c0_i32 = arith.constant 0 : i32
    %c0_i32_0 = arith.constant 0 : i32
    %c0_i32_1 = arith.constant 0 : i32
    return %arg0, %c0_i32, %c0_i32_0 : i32, i32, i32
  }
}

module attributes {stable_mosaic.version = 11 : i64} {
  func.func @_upsample_block_kernel(%arg0: i32, %arg1: memref<1x10x64xf32, #tpu.memory_space<vmem>>, %arg2: memref<4x64x32xf32, #tpu.memory_space<vmem>>, %arg3: memref<1x32xf32, #tpu.memory_space<vmem>>, %arg4: memref<1x32xf32, #tpu.memory_space<vmem>>, %arg5: memref<1x8x64xf32, #tpu.memory_space<vmem>>) attributes {dimension_semantics = [#tpu.dimension_semantics<parallel>], iteration_bounds = array<i64: 2>, scalar_prefetch = 0 : i64, scratch_operands = 0 : i64, tpu.core_type = #tpu.core_type<tc>, window_params = [{transform_indices = @transform_0, window_bounds = array<i64: 1, 10, 64>}, {pipeline_mode = #tpu.pipeline_mode<synchronous>, transform_indices = @transform_1, window_bounds = array<i64: 4, 64, 32>}, {pipeline_mode = #tpu.pipeline_mode<synchronous>, transform_indices = @transform_2, window_bounds = array<i64: 1, 32>}, {pipeline_mode = #tpu.pipeline_mode<synchronous>, transform_indices = @transform_3, window_bounds = array<i64: 1, 32>}, {transform_indices = @transform_4, window_bounds = array<i64: 1, 8, 64>}]} {
    %c0 = arith.constant 0 : index
    %c0_0 = arith.constant 0 : index
    %c0_1 = arith.constant 0 : index
    %0 = vector.load %arg1[%c0, %c0_0, %c0_1] : memref<1x10x64xf32, #tpu.memory_space<vmem>>, vector<1x8x64xf32>
    %1 = vector.shape_cast %0 : vector<1x8x64xf32> to vector<8x64xf32>
    %c0_2 = arith.constant 0 : index
    %c0_3 = arith.constant 0 : index
    %c0_4 = arith.constant 0 : index
    %2 = vector.load %arg2[%c0_2, %c0_3, %c0_4] : memref<4x64x32xf32, #tpu.memory_space<vmem>>, vector<1x64x32xf32>
    %3 = vector.shape_cast %2 : vector<1x64x32xf32> to vector<64x32xf32>
    %cst = arith.constant dense<0.000000e+00> : vector<8x32xf32>
    %4 = tpu.matmul %1, %3, %cst {dimension_numbers = #tpu.dot_dimension_numbers<[1], [0], [0], [1], [0, 0, 1, 1], [], []>} : vector<8x64xf32>, vector<64x32xf32>, vector<8x32xf32> -> vector<8x32xf32>
    %c0_5 = arith.constant 0 : index
    %c1 = arith.constant 1 : index
    %c0_6 = arith.constant 0 : index
    %5 = vector.load %arg1[%c0_5, %c1, %c0_6] : memref<1x10x64xf32, #tpu.memory_space<vmem>>, vector<1x8x64xf32>
    %6 = vector.shape_cast %5 : vector<1x8x64xf32> to vector<8x64xf32>
    %c1_7 = arith.constant 1 : index
    %c0_8 = arith.constant 0 : index
    %c0_9 = arith.constant 0 : index
    %7 = vector.load %arg2[%c1_7, %c0_8, %c0_9] : memref<4x64x32xf32, #tpu.memory_space<vmem>>, vector<1x64x32xf32>
    %8 = vector.shape_cast %7 : vector<1x64x32xf32> to vector<64x32xf32>
    %cst_10 = arith.constant dense<0.000000e+00> : vector<8x32xf32>
    %9 = tpu.matmul %6, %8, %cst_10 {dimension_numbers = #tpu.dot_dimension_numbers<[1], [0], [0], [1], [0, 0, 1, 1], [], []>} : vector<8x64xf32>, vector<64x32xf32>, vector<8x32xf32> -> vector<8x32xf32>
    %10 = arith.addf %4, %9 : vector<8x32xf32>
    %c0_11 = arith.constant 0 : index
    %c1_12 = arith.constant 1 : index
    %c0_13 = arith.constant 0 : index
    %11 = vector.load %arg1[%c0_11, %c1_12, %c0_13] : memref<1x10x64xf32, #tpu.memory_space<vmem>>, vector<1x8x64xf32>
    %12 = vector.shape_cast %11 : vector<1x8x64xf32> to vector<8x64xf32>
    %c2 = arith.constant 2 : index
    %c0_14 = arith.constant 0 : index
    %c0_15 = arith.constant 0 : index
    %13 = vector.load %arg2[%c2, %c0_14, %c0_15] : memref<4x64x32xf32, #tpu.memory_space<vmem>>, vector<1x64x32xf32>
    %14 = vector.shape_cast %13 : vector<1x64x32xf32> to vector<64x32xf32>
    %cst_16 = arith.constant dense<0.000000e+00> : vector<8x32xf32>
    %15 = tpu.matmul %12, %14, %cst_16 {dimension_numbers = #tpu.dot_dimension_numbers<[1], [0], [0], [1], [0, 0, 1, 1], [], []>} : vector<8x64xf32>, vector<64x32xf32>, vector<8x32xf32> -> vector<8x32xf32>
    %c0_17 = arith.constant 0 : index
    %c2_18 = arith.constant 2 : index
    %c0_19 = arith.constant 0 : index
    %16 = vector.load %arg1[%c0_17, %c2_18, %c0_19] : memref<1x10x64xf32, #tpu.memory_space<vmem>>, vector<1x8x64xf32>
    %17 = vector.shape_cast %16 : vector<1x8x64xf32> to vector<8x64xf32>
    %c3 = arith.constant 3 : index
    %c0_20 = arith.constant 0 : index
    %c0_21 = arith.constant 0 : index
    %18 = vector.load %arg2[%c3, %c0_20, %c0_21] : memref<4x64x32xf32, #tpu.memory_space<vmem>>, vector<1x64x32xf32>
    %19 = vector.shape_cast %18 : vector<1x64x32xf32> to vector<64x32xf32>
    %cst_22 = arith.constant dense<0.000000e+00> : vector<8x32xf32>
    %20 = tpu.matmul %17, %19, %cst_22 {dimension_numbers = #tpu.dot_dimension_numbers<[1], [0], [0], [1], [0, 0, 1, 1], [], []>} : vector<8x64xf32>, vector<64x32xf32>, vector<8x32xf32> -> vector<8x32xf32>
    %21 = arith.addf %15, %20 : vector<8x32xf32>
    %cst_23 = arith.constant dense<0.000000e+00> : vector<32xf32>
    %22 = vector.multi_reduction <add>, %10, %cst_23 [0] : vector<8x32xf32> to vector<32xf32>
    %23 = vector.shape_cast %22 : vector<32xf32> to vector<1x32xf32>
    %cst_24 = arith.constant dense<0.000000e+00> : vector<32xf32>
    %24 = vector.multi_reduction <add>, %21, %cst_24 [0] : vector<8x32xf32> to vector<32xf32>
    %25 = vector.shape_cast %24 : vector<32xf32> to vector<1x32xf32>
    %26 = arith.addf %23, %25 : vector<1x32xf32>
    %cst_25 = arith.constant 6.250000e-02 : f32
    %27 = vector.broadcast %cst_25 : f32 to vector<1x32xf32>
    %28 = arith.mulf %26, %27 : vector<1x32xf32>
    %29 = vector.broadcast %28 : vector<1x32xf32> to vector<8x32xf32>
    %30 = arith.subf %10, %29 : vector<8x32xf32>
    %31 = vector.broadcast %28 : vector<1x32xf32> to vector<8x32xf32>
    %32 = arith.subf %21, %31 : vector<8x32xf32>
    %33 = arith.mulf %30, %30 : vector<8x32xf32>
    %cst_26 = arith.constant dense<0.000000e+00> : vector<32xf32>
    %34 = vector.multi_reduction <add>, %33, %cst_26 [0] : vector<8x32xf32> to vector<32xf32>
    %35 = vector.shape_cast %34 : vector<32xf32> to vector<1x32xf32>
    %36 = arith.mulf %32, %32 : vector<8x32xf32>
    %cst_27 = arith.constant dense<0.000000e+00> : vector<32xf32>
    %37 = vector.multi_reduction <add>, %36, %cst_27 [0] : vector<8x32xf32> to vector<32xf32>
    %38 = vector.shape_cast %37 : vector<32xf32> to vector<1x32xf32>
    %39 = arith.addf %35, %38 : vector<1x32xf32>
    %cst_28 = arith.constant 6.250000e-02 : f32
    %40 = vector.broadcast %cst_28 : f32 to vector<1x32xf32>
    %41 = arith.mulf %39, %40 : vector<1x32xf32>
    %c0_29 = arith.constant 0 : index
    %c0_30 = arith.constant 0 : index
    %42 = vector.load %arg3[%c0_29, %c0_30] : memref<1x32xf32, #tpu.memory_space<vmem>>, vector<1x32xf32>
    %cst_31 = arith.constant 9.99999974E-6 : f32
    %43 = vector.broadcast %cst_31 : f32 to vector<1x32xf32>
    %44 = arith.addf %41, %43 : vector<1x32xf32>
    %45 = math.rsqrt %44 : vector<1x32xf32>
    %46 = arith.mulf %42, %45 : vector<1x32xf32>
    %c0_32 = arith.constant 0 : index
    %c0_33 = arith.constant 0 : index
    %47 = vector.load %arg4[%c0_32, %c0_33] : memref<1x32xf32, #tpu.memory_space<vmem>>, vector<1x32xf32>
    %48 = vector.broadcast %46 : vector<1x32xf32> to vector<8x32xf32>
    %49 = arith.mulf %30, %48 : vector<8x32xf32>
    %50 = vector.broadcast %47 : vector<1x32xf32> to vector<8x32xf32>
    %51 = arith.addf %49, %50 : vector<8x32xf32>
    %cst_34 = arith.constant 0.000000e+00 : f32
    %52 = vector.broadcast %cst_34 : f32 to vector<8x32xf32>
    %53 = arith.maximumf %51, %52 : vector<8x32xf32>
    %54 = vector.broadcast %46 : vector<1x32xf32> to vector<8x32xf32>
    %55 = arith.mulf %32, %54 : vector<8x32xf32>
    %56 = vector.broadcast %47 : vector<1x32xf32> to vector<8x32xf32>
    %57 = arith.addf %55, %56 : vector<8x32xf32>
    %cst_35 = arith.constant 0.000000e+00 : f32
    %58 = vector.broadcast %cst_35 : f32 to vector<8x32xf32>
    %59 = arith.maximumf %57, %58 : vector<8x32xf32>
    %60 = tpu.concatenate %53, %59 in 1 : vector<8x32xf32>, vector<8x32xf32> -> vector<8x64xf32>
    %c0_36 = arith.constant 0 : index
    %c0_37 = arith.constant 0 : index
    %c0_38 = arith.constant 0 : index
    %61 = vector.load %arg5[%c0_36, %c0_37, %c0_38] : memref<1x8x64xf32, #tpu.memory_space<vmem>>, vector<1x8x64xf32>
    %62 = vector.shape_cast %61 : vector<1x8x64xf32> to vector<8x64xf32>
    %63 = vector.shape_cast %60 : vector<8x64xf32> to vector<1x8x64xf32>
    tpu.vector_store %arg5[%c0_36, %c0_37, %c0_38], %63 {strides = array<i32>} : memref<1x8x64xf32, #tpu.memory_space<vmem>>, vector<1x8x64xf32>,
    return
  }
  func.func @transform_0(%arg0: i32) -> (i32, i32, i32) {
    %c0_i32 = arith.constant 0 : i32
    %c0_i32_0 = arith.constant 0 : i32
    %c0_i32_1 = arith.constant 0 : i32
    return %arg0, %c0_i32, %c0_i32_0 : i32, i32, i32
  }
  func.func @transform_1(%arg0: i32) -> (i32, i32, i32) {
    %c0_i32 = arith.constant 0 : i32
    %c0_i32_0 = arith.constant 0 : i32
    %c0_i32_1 = arith.constant 0 : i32
    %c0_i32_2 = arith.constant 0 : i32
    return %c0_i32, %c0_i32_0, %c0_i32_1 : i32, i32, i32
  }
  func.func @transform_2(%arg0: i32) -> (i32, i32) {
    %c0_i32 = arith.constant 0 : i32
    %c0_i32_0 = arith.constant 0 : i32
    %c0_i32_1 = arith.constant 0 : i32
    return %c0_i32, %c0_i32_0 : i32, i32
  }
  func.func @transform_3(%arg0: i32) -> (i32, i32) {
    %c0_i32 = arith.constant 0 : i32
    %c0_i32_0 = arith.constant 0 : i32
    %c0_i32_1 = arith.constant 0 : i32
    return %c0_i32, %c0_i32_0 : i32, i32
  }
  func.func @transform_4(%arg0: i32) -> (i32, i32, i32) {
    %c0_i32 = arith.constant 0 : i32
    %c0_i32_0 = arith.constant 0 : i32
    %c0_i32_1 = arith.constant 0 : i32
    return %arg0, %c0_i32, %c0_i32_0 : i32, i32, i32
  }
}

module attributes {stable_mosaic.version = 11 : i64} {
  func.func @_conv_block_kernel(%arg0: i32, %arg1: memref<1x22x32xf32, #tpu.memory_space<vmem>>, %arg2: memref<7x32x3xf32, #tpu.memory_space<vmem>>, %arg3: memref<1x3xf32, #tpu.memory_space<vmem>>, %arg4: memref<1x3xf32, #tpu.memory_space<vmem>>, %arg5: memref<1x16x3xf32, #tpu.memory_space<vmem>>) attributes {dimension_semantics = [#tpu.dimension_semantics<parallel>], iteration_bounds = array<i64: 2>, scalar_prefetch = 0 : i64, scratch_operands = 0 : i64, tpu.core_type = #tpu.core_type<tc>, window_params = [{transform_indices = @transform_0, window_bounds = array<i64: 1, 22, 32>}, {pipeline_mode = #tpu.pipeline_mode<synchronous>, transform_indices = @transform_1, window_bounds = array<i64: 7, 32, 3>}, {pipeline_mode = #tpu.pipeline_mode<synchronous>, transform_indices = @transform_2, window_bounds = array<i64: 1, 3>}, {pipeline_mode = #tpu.pipeline_mode<synchronous>, transform_indices = @transform_3, window_bounds = array<i64: 1, 3>}, {transform_indices = @transform_4, window_bounds = array<i64: 1, 16, 3>}]} {
    %c0 = arith.constant 0 : index
    %c0_0 = arith.constant 0 : index
    %c0_1 = arith.constant 0 : index
    %0 = vector.load %arg1[%c0, %c0_0, %c0_1] : memref<1x22x32xf32, #tpu.memory_space<vmem>>, vector<1x16x32xf32>
    %1 = vector.shape_cast %0 : vector<1x16x32xf32> to vector<16x32xf32>
    %c0_2 = arith.constant 0 : index
    %c0_3 = arith.constant 0 : index
    %c0_4 = arith.constant 0 : index
    %2 = vector.load %arg2[%c0_2, %c0_3, %c0_4] : memref<7x32x3xf32, #tpu.memory_space<vmem>>, vector<1x32x3xf32>
    %3 = vector.shape_cast %2 : vector<1x32x3xf32> to vector<32x3xf32>
    %cst = arith.constant dense<0.000000e+00> : vector<16x3xf32>
    %4 = tpu.matmul %1, %3, %cst {dimension_numbers = #tpu.dot_dimension_numbers<[1], [0], [0], [1], [0, 0, 1, 1], [], []>} : vector<16x32xf32>, vector<32x3xf32>, vector<16x3xf32> -> vector<16x3xf32>
    %c0_5 = arith.constant 0 : index
    %c1 = arith.constant 1 : index
    %c0_6 = arith.constant 0 : index
    %5 = vector.load %arg1[%c0_5, %c1, %c0_6] : memref<1x22x32xf32, #tpu.memory_space<vmem>>, vector<1x16x32xf32>
    %6 = vector.shape_cast %5 : vector<1x16x32xf32> to vector<16x32xf32>
    %c1_7 = arith.constant 1 : index
    %c0_8 = arith.constant 0 : index
    %c0_9 = arith.constant 0 : index
    %7 = vector.load %arg2[%c1_7, %c0_8, %c0_9] : memref<7x32x3xf32, #tpu.memory_space<vmem>>, vector<1x32x3xf32>
    %8 = vector.shape_cast %7 : vector<1x32x3xf32> to vector<32x3xf32>
    %cst_10 = arith.constant dense<0.000000e+00> : vector<16x3xf32>
    %9 = tpu.matmul %6, %8, %cst_10 {dimension_numbers = #tpu.dot_dimension_numbers<[1], [0], [0], [1], [0, 0, 1, 1], [], []>} : vector<16x32xf32>, vector<32x3xf32>, vector<16x3xf32> -> vector<16x3xf32>
    %10 = arith.addf %4, %9 : vector<16x3xf32>
    %c0_11 = arith.constant 0 : index
    %c2 = arith.constant 2 : index
    %c0_12 = arith.constant 0 : index
    %11 = vector.load %arg1[%c0_11, %c2, %c0_12] : memref<1x22x32xf32, #tpu.memory_space<vmem>>, vector<1x16x32xf32>
    %12 = vector.shape_cast %11 : vector<1x16x32xf32> to vector<16x32xf32>
    %c2_13 = arith.constant 2 : index
    %c0_14 = arith.constant 0 : index
    %c0_15 = arith.constant 0 : index
    %13 = vector.load %arg2[%c2_13, %c0_14, %c0_15] : memref<7x32x3xf32, #tpu.memory_space<vmem>>, vector<1x32x3xf32>
    %14 = vector.shape_cast %13 : vector<1x32x3xf32> to vector<32x3xf32>
    %cst_16 = arith.constant dense<0.000000e+00> : vector<16x3xf32>
    %15 = tpu.matmul %12, %14, %cst_16 {dimension_numbers = #tpu.dot_dimension_numbers<[1], [0], [0], [1], [0, 0, 1, 1], [], []>} : vector<16x32xf32>, vector<32x3xf32>, vector<16x3xf32> -> vector<16x3xf32>
    %16 = arith.addf %10, %15 : vector<16x3xf32>
    %c0_17 = arith.constant 0 : index
    %c3 = arith.constant 3 : index
    %c0_18 = arith.constant 0 : index
    %17 = vector.load %arg1[%c0_17, %c3, %c0_18] : memref<1x22x32xf32, #tpu.memory_space<vmem>>, vector<1x16x32xf32>
    %18 = vector.shape_cast %17 : vector<1x16x32xf32> to vector<16x32xf32>
    %c3_19 = arith.constant 3 : index
    %c0_20 = arith.constant 0 : index
    %c0_21 = arith.constant 0 : index
    %19 = vector.load %arg2[%c3_19, %c0_20, %c0_21] : memref<7x32x3xf32, #tpu.memory_space<vmem>>, vector<1x32x3xf32>
    %20 = vector.shape_cast %19 : vector<1x32x3xf32> to vector<32x3xf32>
    %cst_22 = arith.constant dense<0.000000e+00> : vector<16x3xf32>
    %21 = tpu.matmul %18, %20, %cst_22 {dimension_numbers = #tpu.dot_dimension_numbers<[1], [0], [0], [1], [0, 0, 1, 1], [], []>} : vector<16x32xf32>, vector<32x3xf32>, vector<16x3xf32> -> vector<16x3xf32>
    %22 = arith.addf %16, %21 : vector<16x3xf32>
    %c0_23 = arith.constant 0 : index
    %c4 = arith.constant 4 : index
    %c0_24 = arith.constant 0 : index
    %23 = vector.load %arg1[%c0_23, %c4, %c0_24] : memref<1x22x32xf32, #tpu.memory_space<vmem>>, vector<1x16x32xf32>
    %24 = vector.shape_cast %23 : vector<1x16x32xf32> to vector<16x32xf32>
    %c4_25 = arith.constant 4 : index
    %c0_26 = arith.constant 0 : index
    %c0_27 = arith.constant 0 : index
    %25 = vector.load %arg2[%c4_25, %c0_26, %c0_27] : memref<7x32x3xf32, #tpu.memory_space<vmem>>, vector<1x32x3xf32>
    %26 = vector.shape_cast %25 : vector<1x32x3xf32> to vector<32x3xf32>
    %cst_28 = arith.constant dense<0.000000e+00> : vector<16x3xf32>
    %27 = tpu.matmul %24, %26, %cst_28 {dimension_numbers = #tpu.dot_dimension_numbers<[1], [0], [0], [1], [0, 0, 1, 1], [], []>} : vector<16x32xf32>, vector<32x3xf32>, vector<16x3xf32> -> vector<16x3xf32>
    %28 = arith.addf %22, %27 : vector<16x3xf32>
    %c0_29 = arith.constant 0 : index
    %c5 = arith.constant 5 : index
    %c0_30 = arith.constant 0 : index
    %29 = vector.load %arg1[%c0_29, %c5, %c0_30] : memref<1x22x32xf32, #tpu.memory_space<vmem>>, vector<1x16x32xf32>
    %30 = vector.shape_cast %29 : vector<1x16x32xf32> to vector<16x32xf32>
    %c5_31 = arith.constant 5 : index
    %c0_32 = arith.constant 0 : index
    %c0_33 = arith.constant 0 : index
    %31 = vector.load %arg2[%c5_31, %c0_32, %c0_33] : memref<7x32x3xf32, #tpu.memory_space<vmem>>, vector<1x32x3xf32>
    %32 = vector.shape_cast %31 : vector<1x32x3xf32> to vector<32x3xf32>
    %cst_34 = arith.constant dense<0.000000e+00> : vector<16x3xf32>
    %33 = tpu.matmul %30, %32, %cst_34 {dimension_numbers = #tpu.dot_dimension_numbers<[1], [0], [0], [1], [0, 0, 1, 1], [], []>} : vector<16x32xf32>, vector<32x3xf32>, vector<16x3xf32> -> vector<16x3xf32>
    %34 = arith.addf %28, %33 : vector<16x3xf32>
    %c0_35 = arith.constant 0 : index
    %c6 = arith.constant 6 : index
    %c0_36 = arith.constant 0 : index
    %35 = vector.load %arg1[%c0_35, %c6, %c0_36] : memref<1x22x32xf32, #tpu.memory_space<vmem>>, vector<1x16x32xf32>
    %36 = vector.shape_cast %35 : vector<1x16x32xf32> to vector<16x32xf32>
    %c6_37 = arith.constant 6 : index
    %c0_38 = arith.constant 0 : index
    %c0_39 = arith.constant 0 : index
    %37 = vector.load %arg2[%c6_37, %c0_38, %c0_39] : memref<7x32x3xf32, #tpu.memory_space<vmem>>, vector<1x32x3xf32>
    %38 = vector.shape_cast %37 : vector<1x32x3xf32> to vector<32x3xf32>
    %cst_40 = arith.constant dense<0.000000e+00> : vector<16x3xf32>
    %39 = tpu.matmul %36, %38, %cst_40 {dimension_numbers = #tpu.dot_dimension_numbers<[1], [0], [0], [1], [0, 0, 1, 1], [], []>} : vector<16x32xf32>, vector<32x3xf32>, vector<16x3xf32> -> vector<16x3xf32>
    %40 = arith.addf %34, %39 : vector<16x3xf32>
    %41 = math.tanh %40 : vector<16x3xf32>
    %c0_41 = arith.constant 0 : index
    %c0_42 = arith.constant 0 : index
    %c0_43 = arith.constant 0 : index
    %42 = vector.load %arg5[%c0_41, %c0_42, %c0_43] : memref<1x16x3xf32, #tpu.memory_space<vmem>>, vector<1x16x3xf32>
    %43 = vector.shape_cast %42 : vector<1x16x3xf32> to vector<16x3xf32>
    %44 = vector.shape_cast %41 : vector<16x3xf32> to vector<1x16x3xf32>
    tpu.vector_store %arg5[%c0_41, %c0_42, %c0_43], %44 {strides = array<i32>} : memref<1x16x3xf32, #tpu.memory_space<vmem>>, vector<1x16x3xf32>,
    return
  }
  func.func @transform_0(%arg0: i32) -> (i32, i32, i32) {
    %c0_i32 = arith.constant 0 : i32
    %c0_i32_0 = arith.constant 0 : i32
    %c0_i32_1 = arith.constant 0 : i32
    return %arg0, %c0_i32, %c0_i32_0 : i32, i32, i32
  }
  func.func @transform_1(%arg0: i32) -> (i32, i32, i32) {
    %c0_i32 = arith.constant 0 : i32
    %c0_i32_0 = arith.constant 0 : i32
    %c0_i32_1 = arith.constant 0 : i32
    %c0_i32_2 = arith.constant 0 : i32
    return %c0_i32, %c0_i32_0, %c0_i32_1 : i32, i32, i32
  }
  func.func @transform_2(%arg0: i32) -> (i32, i32) {
    %c0_i32 = arith.constant 0 : i32
    %c0_i32_0 = arith.constant 0 : i32
    %c0_i32_1 = arith.constant 0 : i32
    return %c0_i32, %c0_i32_0 : i32, i32
  }
  func.func @transform_3(%arg0: i32) -> (i32, i32) {
    %c0_i32 = arith.constant 0 : i32
    %c0_i32_0 = arith.constant 0 : i32
    %c0_i32_1 = arith.constant 0 : i32
    return %c0_i32, %c0_i32_0 : i32, i32
  }
  func.func @transform_4(%arg0: i32) -> (i32, i32, i32) {
    %c0_i32 = arith.constant 0 : i32
    %c0_i32_0 = arith.constant 0 : i32
    %c0_i32_1 = arith.constant 0 : i32
    return %arg0, %c0_i32, %c0_i32_0 : i32, i32, i32
  }
}

</mosaic_0001>

<bundles_post_ra>
// kernel: generator_forward.9
= control target key start
LH: loop header
LB: loop body
LE: loop exit
PB: predicated region body
PF: predicated region fallthrough
CT: control target
= control target key end

     0   :  { %s422_s15 = smov 0   ;;  %s502_s0 = inlined_call_operand.vmem [shape: f32[2,9,64], index: 0, kind: input, shape index: {}]   ;;  %s503_s1 = inlined_call_operand.vmem [shape: f32[2,64,64], index: 1, kind: input, shape index: {}]   ;;  %s504_s2 = inlined_call_operand.vmem [shape: f32[1,64], index: 2, kind: input, shape index: {}]   ;;  %s505_s3 = inlined_call_operand.vmem [shape: f32[1,64], index: 3, kind: input, shape index: {}]   ;;  %s506_s4 = inlined_call_operand.vmem [shape: f32[2,8,64], index: 4, kind: output, shape index: {}]  }
   0x1 LB: > { %s357_s16 = sadd.s32 4294967295, %s395_s15   ;;  %p361_p0 = scmp.ge.s32.totalorder %s395_s15, 1  ;;  %s395_s15 = sphi %s422_s15, %s14_s15  }
   0x2   : > { %p162_p1 = scmp.lt.s32.totalorder %s395_s15, 3 }
   0x4   : > { %p163_p2 = pnand %p361_p0, %p162_p1 }
   0x5   : > { %p187_p3 = scmp.lt.s32.totalorder (!%p163_p2), %s357_s16, 1 }
   0x6   : > { %166 = sbr.rel (%p163_p2) target bundleno = 221 (0xdd), region = 36 }
   0xb   : > { %v372_v0 = vld [vmem:[%s503_s1 + $0x78] sm:$0xff]  ;;  %v371_v2 = vld [vmem:[%s503_s1 + $0x70] sm:$0xff]  ;;  %v370_v4 = vld [vmem:[%s503_s1 + $0x68] sm:$0xff]  ;;  %s508_s16 = smov (!%p187_p3, %s357_s16), 1  ;;  %vm215_vm0 = vcmask 523264  }
   0xc   : > { %v204_v1 = vld [vmem:[%s503_s1 + $0x38] sm:$0xff]  ;;  %227 = vmatpush.msra.mxu0 %v372_v0  ;;  %v203_v3 = vld [vmem:[%s503_s1 + $0x30] sm:$0xff]  ;;  %v202_v5 = vld [vmem:[%s503_s1 + $0x28] sm:$0xff]  ;;  %s377_s11 = sshll.u32 %s508_s16, 4  ;;  %s364_s7 = sshll.u32 %s508_s16, 3 }
   0xd   : > { %250 = vmatpush.msra.mxu1 %v204_v1  ;;  %v369_v6 = vld [vmem:[%s503_s1 + $0x60] sm:$0xff]  ;;  %v368_v8 = vld [vmem:[%s503_s1 + $0x58] sm:$0xff]  ;;  %v367_v10 = vld [vmem:[%s503_s1 + $0x50] sm:$0xff]  ;;  %s191_s24 = scalar_lea.vmem %s502_s0, %s377_s11  ;;  %s195_s10 = scalar_lea.vmem %s506_s4, %s364_s7 }
   0xe   : > { %228 = vmatpush.msra.mxu0 %v371_v2  ;;  %v201_v7 = vld [vmem:[%s503_s1 + $0x20] sm:$0xff]  ;;  %v200_v9 = vld [vmem:[%s503_s1 + $0x18] sm:$0xff]  ;;  %v199_v11 = vld [vmem:[%s503_s1 + $0x10] sm:$0xff] }
   0xf   : > { %251 = vmatpush.msra.mxu1 %v203_v3  ;;  %v366_v12 = vld [vmem:[%s503_s1 + $0x48] sm:$0xff]  ;;  %v365_v14 = vld [vmem:[%s503_s1 + $0x40] sm:$0xff] }
  0x10   : > { %229 = vmatpush.msra.mxu0 %v370_v4  ;;  %v198_v13 = vld [vmem:[%s503_s1 + $0x8] sm:$0xff]  ;;  %v197_v15 = vld [vmem:[%s503_s1] sm:$0xff] }
  0x11   : > { %252 = vmatpush.msra.mxu1 %v202_v5  ;;  %v205_v16 = vld [vmem:[%s191_s24 + $0x1] sm:$0xff]  ;;  %v262_v45 = vld [vmem:[%s504_s2] sm:$0x1] }
  0x12   : > { %230 = vmatpush.msra.mxu0 %v369_v6  ;;  %v196_v17 = vld [vmem:[%s191_s24] sm:$0xff] }
  0x13   : > { %253 = vmatpush.msra.mxu1 %v201_v7  ;;  %v386_v50 = vld [vmem:[%s505_s3] ss:$0 sm:$0xff] }
  0x14   : > { %231 = vmatpush.msra.mxu0 %v368_v8 }
  0x15   : > { %254 = vmatpush.msra.mxu1 %v200_v9 }
  0x16   : > { %232 = vmatpush.msra.mxu0 %v367_v10 }
  0x17   : > { %255 = vmatpush.msra.mxu1 %v199_v11 }
  0x18   : > { %233 = vmatpush.msra.mxu0 %v366_v12 }
  0x19   : > { %256 = vmatpush.msra.mxu1 %v198_v13 }
  0x1a   : > { %234 = vmatpush.msra.mxu0 %v365_v14 }
  0x1b   : > { %257 = vmatpush.msra.mxu1 %v197_v15  ;;  %373 = vmatmul.msk.f32.vlgmr.msra.gmra.mxu0 %vm215_vm0, %v205_v16 }
  0x1c   : > { %374 = vmatmul.msk.f32.vlgmr.msra.gmra.mxu1 %vm215_vm0, %v196_v17 }
  0x98   : > { %v236_v18 = vpop.f32.mrf.mxu0 }
  0x99   : > { %v259_v19 = vpop.f32.mrf.mxu1 }
  0x9a   : > { %v260_v20 = vadd.f32 %v259_v19, %v236_v18 }
  0x9c   : > { %v264_v21 = vsel %vm215_vm0, %v260_v20, 0.0 }
  0x9d   : > { %v265_v22 = vrot.slane %v264_v21, 4 }
  0x9f   : > { %v266_v23 = vadd.f32 %v265_v22, %v264_v21 }
  0xa1   : > { %v267_v24 = vrot.slane %v266_v23, 2 }
  0xa3   : > { %v268_v25 = vadd.f32 %v267_v24, %v266_v23 }
  0xa5   : > { %v269_v26 = vrot.slane %v268_v25, 1 }
  0xa7   : > { %v270_v27 = vadd.f32 %v269_v26, %v268_v25 }
  0xa9   : > { %v271_v28 = vmul.f32 0.125, %v270_v27 }
  0xab   : > { %v272_v29 = vsub.f32 %v260_v20, %v271_v28 }
  0xad   : > { %v273_v30 = vmul.f32 %v272_v29, %v272_v29 }
  0xaf   : > { %v274_v31 = vsel %vm215_vm0, %v273_v30, 0.0 }
  0xb0   : > { %v275_v32 = vrot.slane %v274_v31, 4 }
  0xb2   : > { %v276_v33 = vadd.f32 %v275_v32, %v274_v31 }
  0xb4   : > { %v277_v34 = vrot.slane %v276_v33, 2 }
  0xb6   : > { %v278_v35 = vadd.f32 %v277_v34, %v276_v33 }
  0xb8   : > { %v279_v36 = vrot.slane %v278_v35, 1 }
  0xba   : > { %v280_v37 = vadd.f32 %v279_v36, %v278_v35 }
  0xbc   : > { %v281_v38 = vmul.f32 0.125, %v280_v37 }
  0xbe   : > { %v282_v39 = vadd.f32 1e-05, %v281_v38 }
  0xc0   : > { %387 = vrsqrt.f32 %v282_v39  ;;  %vm289_vm2 = vweird.f32 %v282_v39 }
  0xc6   : > { %v388_v40 = vpop.eup %387 }
  0xc7   : > { %v284_v41 = vmul.f32 %v388_v40, %v282_v39  ;;  %vm290_vm1 = vweird.f32 %v388_v40 }
  0xc8   : > { %vm291_vm3 = vmor %vm289_vm2, %vm290_vm1 }
  0xc9   : > { %v285_v42 = vmul.f32 %v388_v40, %v284_v41 }
  0xcb   : > { %v286_v43 = vmul.f32 0.5, %v285_v42 }
  0xcd   : > { %v287_v44 = vsub.f32 1.5, %v286_v43 }
  0xcf   : > { %v288_v46 = vmul.f32 %v388_v40, %v287_v44 }
  0xd1   : > { %v292_v47 = vsel %vm291_vm3, %v388_v40, %v288_v46 }
  0xd2   : > { %v293_v48 = vmul.f32 %v292_v47, %v262_v45 }
  0xd4   : > { %v295_v49 = vperm.slane %v293_v48, 0 }
  0xd6   : > { %v297_v51 = vmul.f32 %v295_v49, %v272_v29 }
  0xd8   : > { %v301_v52 = vadd.f32 %v386_v50, %v297_v51 }
  0xda   : > { %v302_v53 = vmax.f32 %v301_v52, 0.0 }
  0xdc   : > { %303 = vst.msk [vmem:[%s195_s10] sm:$0xff] %vm215_vm0, %v302_v53 }
  0xdd PF: > { %s14_s15 = sadd.s32 1, %s395_s15  }
  0xde   : > { %p11_p4 = scmp.ge.s32.totalorder %s14_s15, 4  }
  0xe0   :  { %13 = sbr.rel (!%p11_p4) target bundleno = 1 (0x1), region = 67 }

// kernel: generator_forward.8
= control target key start
LH: loop header
LB: loop body
LE: loop exit
PB: predicated region body
PF: predicated region fallthrough
CT: control target
= control target key end

     0   :  { %s624_s15 = smov 0   ;;  %s692_s0 = inlined_call_operand.vmem [shape: f32[2,22,8], index: 0, kind: input, shape index: {}]   ;;  %s693_s1 = inlined_call_operand.vmem [shape: f32[7,8,32], index: 1, kind: input, shape index: {}]   ;;  %s694_s2 = inlined_call_operand.vmem [shape: f32[1,32], index: 2, kind: input, shape index: {}]   ;;  %s695_s3 = inlined_call_operand.vmem [shape: f32[1,32], index: 3, kind: input, shape index: {}]   ;;  %s696_s4 = inlined_call_operand.vmem [shape: f32[2,16,32], index: 4, kind: output, shape index: {}]  }
   0x1 LB: > { %s547_s16 = sadd.s32 4294967295, %s597_s15   ;;  %p551_p0 = scmp.ge.s32.totalorder %s597_s15, 1  ;;  %s597_s15 = sphi %s624_s15, %s14_s15  }
   0x2   : > { %p162_p1 = scmp.lt.s32.totalorder %s597_s15, 3 }
   0x4   : > { %p163_p2 = pnand %p551_p0, %p162_p1 }
   0x5   : > { %p188_p3 = scmp.lt.s32.totalorder (!%p163_p2), %s547_s16, 1 }
   0x6   : > { %166 = sbr.rel (%p163_p2) target bundleno = 245 (0xf5), region = 36 }
   0xb   : > { %v555_v0 = vld [vmem:[%s693_s1 + $0x8] sm:$0xff]  ;;  %v200_v1 = vld [vmem:[%s693_s1] sm:$0xff]  ;;  %v560_v2 = vld [vmem:[%s693_s1 + $0x10] sm:$0xff]  ;;  %s698_s16 = smov (!%p188_p3, %s547_s16), 1  ;;  %vm205_vm0 = vcmask 64512   ;;  %vm441_vm1 = vcmask 261120  }
   0xc   : > { %578 = vmatpush.msra.mxu3 %v555_v0  ;;  %256 = vmatpush.msra.mxu1 %v200_v1  ;;  %v572_v3 = vld [vmem:[%s693_s1 + $0x30] sm:$0xff]  ;;  %v563_v4 = vld [vmem:[%s693_s1 + $0x18] sm:$0xff]  ;;  %v569_v5 = vld [vmem:[%s693_s1 + $0x28] sm:$0xff]  ;;  %s579_s5 = smul.u32 24, %s698_s16  ;;  %s577_s13 = sshll.u32 %s698_s16, 4 }
   0xd   : > { %289 = vmatpush.msra.mxu2 %v560_v2  ;;  %v566_v6 = vld [vmem:[%s693_s1 + $0x20] sm:$0xff]  ;;  %227 = vmatpush.msra.mxu0 %v555_v0  ;;  %s197_s18 = scalar_lea.vmem %s696_s4, %s577_s13 }
   0xe   : > { %324 = vmatpush.msrb.mxu3 %v563_v4  ;;  %394 = vmatpush.msrb.mxu1 %v569_v5  ;;  %s192_s8 = scalar_lea.vmem %s692_s0, %s579_s5 }
   0xf   : > { %429 = vmatpush.msrb.mxu2 %v572_v3  ;;  %359 = vmatpush.msrb.mxu0 %v566_v6  ;;  %v202_v7 = vld [vmem:[%s192_s8 + $0x9] sm:$0xff]  ;;  %v198_v8 = vld [vmem:[%s192_s8] sm:$0xff] }
  0x10   : > { %v264_v9 = vld [vmem:[%s192_s8 + $0x2] sm:$0xff]  ;;  %557 = vmatmul.msk.f32.vlgmr.msra.gmra.mxu3 %vm205_vm0, %v202_v7  ;;  %558 = vmatmul.msk.f32.vlgmr.msra.gmra.mxu1 %vm205_vm0, %v198_v8  ;;  %v265_v13 = vld [vmem:[%s192_s8 + $0xa] sm:$0xff] }
  0x11   : > { %v201_v10 = vld [vmem:[%s192_s8 + $0x1] sm:$0xff]  ;;  %561 = vmatmul.msk.f32.vlgmr.msra.gmra.mxu2 %vm205_vm0, %v264_v9  ;;  %v300_v15 = vld [vmem:[%s192_s8 + $0xb] sm:$0xff] }
  0x12   : > { %556 = vmatmul.msk.f32.vlgmr.msra.gmra.mxu0 %vm205_vm0, %v201_v10  ;;  %v199_v11 = vld [vmem:[%s192_s8 + $0x8] sm:$0xff] }
  0x13   : > { %v299_v12 = vld [vmem:[%s192_s8 + $0x3] sm:$0xff]  ;;  %v335_v18 = vld [vmem:[%s192_s8 + $0xc] sm:$0xff] }
  0x14   : > { %v334_v14 = vld [vmem:[%s192_s8 + $0x4] sm:$0xff]  ;;  %v370_v19 = vld [vmem:[%s192_s8 + $0xd] sm:$0xff] }
  0x15   : > { %v369_v16 = vld [vmem:[%s192_s8 + $0x5] sm:$0xff]  ;;  %v405_v20 = vld [vmem:[%s192_s8 + $0xe] sm:$0xff] }
  0x16   : > { %v404_v17 = vld [vmem:[%s192_s8 + $0x6] sm:$0xff] }
  0x18   : > { %559 = vmatmul.msk.f32.gmra.mxu1 %vm205_vm0, %v199_v11  ;;  %564 = vmatmul.msk.f32.vlgmr.msrb.gmra.mxu3 %vm205_vm0, %v299_v12 }
  0x19   : > { %562 = vmatmul.msk.f32.gmra.mxu2 %vm205_vm0, %v265_v13  ;;  %v439_v13 = vld [vmem:[%s694_s2] sm:$0x1] }
  0x1a   : > { %567 = vmatmul.msk.f32.vlgmr.msrb.gmra.mxu0 %vm205_vm0, %v334_v14 }
  0x20   : > { %565 = vmatmul.msk.f32.gmra.mxu3 %vm205_vm0, %v300_v15  ;;  %570 = vmatmul.msk.f32.vlgmr.msrb.gmra.mxu1 %vm205_vm0, %v369_v16 }
  0x21   : > { %573 = vmatmul.msk.f32.vlgmr.msrb.gmra.mxu2 %vm205_vm0, %v404_v17 }
  0x22   : > { %568 = vmatmul.msk.f32.gmra.mxu0 %vm205_vm0, %v335_v18  ;;  %v588_v18 = vld [vmem:[%s695_s3] ss:$0 sm:$0xff] }
  0x28   : > { %571 = vmatmul.msk.f32.gmra.mxu1 %vm205_vm0, %v370_v19 }
  0x29   : > { %574 = vmatmul.msk.f32.gmra.mxu2 %vm205_vm0, %v405_v20 }
  0x8d   : > { %v258_v21 = vpop.f32.mrf.mxu1 }
  0x8f   : > { %v229_v22 = vpop.f32.mrf.mxu0 }
  0x90   : > { %v259_v27 = vadd.f32 %v258_v21, %v229_v22 }
  0x93   : > { %v232_v23 = vpop.f32.mrf.mxu3 }
  0x94   : > { %v291_v24 = vpop.f32.mrf.mxu2 }
  0x95   : > { %v261_v25 = vpop.f32.mrf.mxu1  ;;  %v297_v31 = vadd.f32 %v291_v24, %v259_v27 }
  0x96   : > { %v262_v32 = vadd.f32 %v261_v25, %v232_v23 }
  0x97   : > { %v361_v26 = vpop.f32.mrf.mxu0 }
  0x9b   : > { %v326_v28 = vpop.f32.mrf.mxu3 }
  0x9c   : > { %v294_v29 = vpop.f32.mrf.mxu2  ;;  %v332_v33 = vadd.f32 %v326_v28, %v297_v31 }
  0x9d   : > { %v396_v30 = vpop.f32.mrf.mxu1  ;;  %v298_v34 = vadd.f32 %v294_v29, %v262_v32 }
  0x9e   : > { %v367_v39 = vadd.f32 %v361_v26, %v332_v33 }
  0x9f   : > { %v364_v38 = vpop.f32.mrf.mxu0 }
  0xa0   : > { %v402_v42 = vadd.f32 %v396_v30, %v367_v39 }
  0xa3   : > { %v329_v35 = vpop.f32.mrf.mxu3 }
  0xa4   : > { %v333_v36 = vadd.f32 %v329_v35, %v298_v34  ;;  %v431_v37 = vpop.f32.mrf.mxu2 }
  0xa5   : > { %v399_v41 = vpop.f32.mrf.mxu1  ;;  %v437_v43 = vadd.f32 %v431_v37, %v402_v42 }
  0xa6   : > { %v368_v40 = vadd.f32 %v364_v38, %v333_v36 }
  0xa7   : > { %v442_v47 = vsel %vm441_vm1, %v437_v43, 0.0 }
  0xa8   : > { %v403_v44 = vadd.f32 %v399_v41, %v368_v40 }
  0xac   : > { %v434_v45 = vpop.f32.mrf.mxu2 }
  0xad   : > { %v438_v46 = vadd.f32 %v434_v45, %v403_v44 }
  0xaf   : > { %v443_v48 = vsel %vm441_vm1, %v438_v46, 0.0 }
  0xb0   : > { %v444_v49 = vadd.f32 %v443_v48, %v442_v47 }
  0xb2   : > { %v445_v50 = vrot.slane %v444_v49, 4 }
  0xb4   : > { %v446_v51 = vadd.f32 %v445_v50, %v444_v49 }
  0xb6   : > { %v447_v52 = vrot.slane %v446_v51, 2 }
  0xb8   : > { %v448_v53 = vadd.f32 %v447_v52, %v446_v51 }
  0xba   : > { %v449_v54 = vrot.slane %v448_v53, 1 }
  0xbc   : > { %v450_v55 = vadd.f32 %v449_v54, %v448_v53 }
  0xbe   : > { %v451_v56 = vmul.f32 0.0625, %v450_v55 }
  0xc0   : > { %v452_v57 = vsub.f32 %v437_v43, %v451_v56  ;;  %v453_v58 = vsub.f32 %v438_v46, %v451_v56 }
  0xc2   : > { %v454_v59 = vmul.f32 %v452_v57, %v452_v57  ;;  %v455_v60 = vmul.f32 %v453_v58, %v453_v58 }
  0xc4   : > { %v456_v61 = vsel %vm441_vm1, %v454_v59, 0.0  ;;  %v457_v62 = vsel %vm441_vm1, %v455_v60, 0.0 }
  0xc5   : > { %v458_v63 = vadd.f32 %v457_v62, %v456_v61 }
  0xc7   : > { %v459_v0 = vrot.slane %v458_v63, 4 }
  0xc9   : > { %v460_v1 = vadd.f32 %v459_v0, %v458_v63 }
  0xcb   : > { %v461_v2 = vrot.slane %v460_v1, 2 }
  0xcd   : > { %v462_v3 = vadd.f32 %v461_v2, %v460_v1 }
  0xcf   : > { %v463_v4 = vrot.slane %v462_v3, 1 }
  0xd1   : > { %v464_v5 = vadd.f32 %v463_v4, %v462_v3 }
  0xd3   : > { %v465_v6 = vmul.f32 0.0625, %v464_v5 }
  0xd5   : > { %v466_v7 = vadd.f32 1e-05, %v465_v6 }
  0xd7   : > { %589 = vrsqrt.f32 %v466_v7  ;;  %vm473_vm3 = vweird.f32 %v466_v7 }
  0xdd   : > { %v590_v8 = vpop.eup %589 }
  0xde   : > { %v468_v9 = vmul.f32 %v590_v8, %v466_v7  ;;  %vm474_vm2 = vweird.f32 %v590_v8 }
  0xdf   : > { %vm475_vm4 = vmor %vm473_vm3, %vm474_vm2 }
  0xe0   : > { %v469_v10 = vmul.f32 %v590_v8, %v468_v9 }
  0xe2   : > { %v470_v11 = vmul.f32 0.5, %v469_v10 }
  0xe4   : > { %v471_v12 = vsub.f32 1.5, %v470_v11 }
  0xe6   : > { %v472_v14 = vmul.f32 %v590_v8, %v471_v12 }
  0xe8   : > { %v476_v15 = vsel %vm475_vm4, %v590_v8, %v472_v14 }
  0xe9   : > { %v477_v16 = vmul.f32 %v476_v15, %v439_v13 }
  0xeb   : > { %v479_v17 = vperm.slane %v477_v16, 0 }
  0xed   : > { %v481_v19 = vmul.f32 %v479_v17, %v452_v57  ;;  %v482_v20 = vmul.f32 %v479_v17, %v453_v58 }
  0xef   : > { %v486_v21 = vadd.f32 %v588_v18, %v481_v19  ;;  %v487_v22 = vadd.f32 %v588_v18, %v482_v20 }
  0xf1   : > { %v488_v23 = vmax.f32 %v486_v21, 0.0  ;;  %v489_v24 = vmax.f32 %v487_v22, 0.0 }
  0xf3   : > { %490 = vst.msk [vmem:[%s197_s18] sm:$0xff] %vm441_vm1, %v488_v23 }
  0xf4   : > { %491 = vst.msk [vmem:[%s197_s18 + $0x8] sm:$0xff] %vm441_vm1, %v489_v24 }
  0xf5 PF: > { %s14_s15 = sadd.s32 1, %s597_s15  }
  0xf6   : > { %p11_p4 = scmp.ge.s32.totalorder %s14_s15, 4  }
  0xf8   :  { %13 = sbr.rel (!%p11_p4) target bundleno = 1 (0x1), region = 72 }

// kernel: generator_forward.10
= control target key start
LH: loop header
LB: loop body
LE: loop exit
PB: predicated region body
PF: predicated region fallthrough
CT: control target
= control target key end

     0   :  { %s433_s15 = smov 0   ;;  %s560_s0 = inlined_call_operand.vmem [shape: f32[2,5,128], index: 0, kind: input, shape index: {}]   ;;  %s561_s1 = inlined_call_operand.vmem [shape: f32[2,128,128], index: 1, kind: input, shape index: {}]   ;;  %s562_s2 = inlined_call_operand.vmem [shape: f32[1,128], index: 2, kind: input, shape index: {}]   ;;  %s563_s3 = inlined_call_operand.vmem [shape: f32[1,128], index: 3, kind: input, shape index: {}]   ;;  %s564_s4 = inlined_call_operand.vmem [shape: f32[2,4,128], index: 4, kind: output, shape index: {}]  }
   0x1 LB: > { %s364_s16 = sadd.s32 4294967295, %s406_s15   ;;  %p368_p0 = scmp.ge.s32.totalorder %s406_s15, 1  ;;  %s406_s15 = sphi %s433_s15, %s14_s15  }
   0x2   : > { %p161_p1 = scmp.lt.s32.totalorder %s406_s15, 3 }
   0x4   : > { %p162_p2 = pnand %p368_p0, %p161_p1 }
   0x5   : > { %p185_p3 = scmp.lt.s32.totalorder (!%p162_p2), %s364_s16, 1 }
   0x6   : > { %165 = sbr.rel (%p162_p2) target bundleno = 237 (0xed), region = 36 }
   0xb   : > { %v386_v0 = vld [vmem:[%s561_s1 + $0xf8] sm:$0xff]  ;;  %v385_v2 = vld [vmem:[%s561_s1 + $0xf0] sm:$0xff]  ;;  %v384_v4 = vld [vmem:[%s561_s1 + $0xe8] sm:$0xff]  ;;  %s566_s16 = smov (!%p185_p3, %s364_s16), 1  ;;  %vm270_vm0 = vcmask 1043456  }
   0xc   : > { %v209_v1 = vld [vmem:[%s561_s1 + $0x78] sm:$0xff]  ;;  %228 = vmatpush.msra.mxu0 %v386_v0  ;;  %v208_v3 = vld [vmem:[%s561_s1 + $0x70] sm:$0xff]  ;;  %v207_v5 = vld [vmem:[%s561_s1 + $0x68] sm:$0xff]  ;;  %s369_s21 = sshll.u32 %s566_s16, 3  ;;  %s370_s17 = sshll.u32 %s566_s16, 2 }
   0xd   : > { %248 = vmatpush.msra.mxu1 %v209_v1  ;;  %v383_v6 = vld [vmem:[%s561_s1 + $0xe0] sm:$0xff]  ;;  %v382_v8 = vld [vmem:[%s561_s1 + $0xd8] sm:$0xff]  ;;  %v381_v10 = vld [vmem:[%s561_s1 + $0xd0] sm:$0xff]  ;;  %s188_s6 = scalar_lea.vmem %s560_s0, %s369_s21  ;;  %s192_s20 = scalar_lea.vmem %s564_s4, %s370_s17 }
   0xe   : > { %229 = vmatpush.msra.mxu0 %v385_v2  ;;  %v206_v7 = vld [vmem:[%s561_s1 + $0x60] sm:$0xff]  ;;  %v205_v9 = vld [vmem:[%s561_s1 + $0x58] sm:$0xff]  ;;  %v204_v11 = vld [vmem:[%s561_s1 + $0x50] sm:$0xff] }
   0xf   : > { %249 = vmatpush.msra.mxu1 %v208_v3  ;;  %v380_v12 = vld [vmem:[%s561_s1 + $0xc8] sm:$0xff]  ;;  %v379_v14 = vld [vmem:[%s561_s1 + $0xc0] sm:$0xff]  ;;  %v378_v16 = vld [vmem:[%s561_s1 + $0xb8] sm:$0xff] }
  0x10   : > { %230 = vmatpush.msra.mxu0 %v384_v4  ;;  %v203_v13 = vld [vmem:[%s561_s1 + $0x48] sm:$0xff]  ;;  %v202_v15 = vld [vmem:[%s561_s1 + $0x40] sm:$0xff]  ;;  %v201_v17 = vld [vmem:[%s561_s1 + $0x38] sm:$0xff] }
  0x11   : > { %250 = vmatpush.msra.mxu1 %v207_v5  ;;  %v377_v18 = vld [vmem:[%s561_s1 + $0xb0] sm:$0xff]  ;;  %v376_v20 = vld [vmem:[%s561_s1 + $0xa8] sm:$0xff]  ;;  %v375_v22 = vld [vmem:[%s561_s1 + $0xa0] sm:$0xff] }
  0x12   : > { %231 = vmatpush.msra.mxu0 %v383_v6  ;;  %v200_v19 = vld [vmem:[%s561_s1 + $0x30] sm:$0xff]  ;;  %v199_v21 = vld [vmem:[%s561_s1 + $0x28] sm:$0xff]  ;;  %v198_v23 = vld [vmem:[%s561_s1 + $0x20] sm:$0xff] }
  0x13   : > { %251 = vmatpush.msra.mxu1 %v206_v7  ;;  %v374_v24 = vld [vmem:[%s561_s1 + $0x98] sm:$0xff]  ;;  %v373_v26 = vld [vmem:[%s561_s1 + $0x90] sm:$0xff]  ;;  %v372_v28 = vld [vmem:[%s561_s1 + $0x88] sm:$0xff] }
  0x14   : > { %232 = vmatpush.msra.mxu0 %v382_v8  ;;  %v197_v25 = vld [vmem:[%s561_s1 + $0x18] sm:$0xff]  ;;  %v196_v27 = vld [vmem:[%s561_s1 + $0x10] sm:$0xff]  ;;  %v195_v29 = vld [vmem:[%s561_s1 + $0x8] sm:$0xff] }
  0x15   : > { %252 = vmatpush.msra.mxu1 %v205_v9  ;;  %v371_v30 = vld [vmem:[%s561_s1 + $0x80] sm:$0xff] }
  0x16   : > { %233 = vmatpush.msra.mxu0 %v381_v10  ;;  %v194_v31 = vld [vmem:[%s561_s1] sm:$0xff] }
  0x17   : > { %253 = vmatpush.msra.mxu1 %v204_v11  ;;  %v210_v32 = vld [vmem:[%s188_s6 + $0x1] sm:$0xf]  ;;  %v268_v61 = vld [vmem:[%s562_s2] sm:$0x1] }
  0x18   : > { %234 = vmatpush.msra.mxu0 %v380_v12  ;;  %v193_v33 = vld [vmem:[%s188_s6] sm:$0xf] }
  0x19   : > { %254 = vmatpush.msra.mxu1 %v203_v13  ;;  %v397_v2 = vld [vmem:[%s563_s3] ss:$0 sm:$0xff] }
  0x1a   : > { %235 = vmatpush.msra.mxu0 %v379_v14 }
  0x1b   : > { %255 = vmatpush.msra.mxu1 %v202_v15 }
  0x1c   : > { %236 = vmatpush.msra.mxu0 %v378_v16 }
  0x1d   : > { %256 = vmatpush.msra.mxu1 %v201_v17 }
  0x1e   : > { %237 = vmatpush.msra.mxu0 %v377_v18 }
  0x1f   : > { %257 = vmatpush.msra.mxu1 %v200_v19 }
  0x20   : > { %238 = vmatpush.msra.mxu0 %v376_v20 }
  0x21   : > { %258 = vmatpush.msra.mxu1 %v199_v21 }
  0x22   : > { %239 = vmatpush.msra.mxu0 %v375_v22 }
  0x23   : > { %259 = vmatpush.msra.mxu1 %v198_v23 }
  0x24   : > { %240 = vmatpush.msra.mxu0 %v374_v24 }
  0x25   : > { %260 = vmatpush.msra.mxu1 %v197_v25 }
  0x26   : > { %241 = vmatpush.msra.mxu0 %v373_v26 }
  0x27   : > { %261 = vmatpush.msra.mxu1 %v196_v27 }
  0x28   : > { %242 = vmatpush.msra.mxu0 %v372_v28 }
  0x29   : > { %262 = vmatpush.msra.mxu1 %v195_v29 }
  0x2a   : > { %243 = vmatpush.msra.mxu0 %v371_v30 }
  0x2b   : > { %263 = vmatpush.msra.mxu1 %v194_v31  ;;  %244 = vmatmul.f32.vlgmr.msra.gmra.mxu0 %v210_v32 }
  0x2c   : > { %264 = vmatmul.f32.vlgmr.msra.gmra.mxu1 %v193_v33 }
  0xa8   : > { %v245_v34 = vpop.f32.mrf.mxu0 }
  0xa9   : > { %v265_v35 = vpop.f32.mrf.mxu1 }
  0xaa   : > { %v266_v36 = vadd.f32 %v265_v35, %v245_v34 }
  0xac   : > { %v271_v37 = vsel %vm270_vm0, %v266_v36, 0.0 }
  0xad   : > { %v272_v38 = vrot.slane %v271_v37, 4 }
  0xaf   : > { %v273_v39 = vadd.f32 %v272_v38, %v271_v37 }
  0xb1   : > { %v274_v40 = vrot.slane %v273_v39, 2 }
  0xb3   : > { %v275_v41 = vadd.f32 %v274_v40, %v273_v39 }
  0xb5   : > { %v276_v42 = vrot.slane %v275_v41, 1 }
  0xb7   : > { %v277_v43 = vadd.f32 %v276_v42, %v275_v41 }
  0xb9   : > { %v278_v44 = vmul.f32 0.25, %v277_v43 }
  0xbb   : > { %v279_v45 = vsub.f32 %v266_v36, %v278_v44 }
  0xbd   : > { %v280_v46 = vmul.f32 %v279_v45, %v279_v45 }
  0xbf   : > { %v281_v47 = vsel %vm270_vm0, %v280_v46, 0.0 }
  0xc0   : > { %v282_v48 = vrot.slane %v281_v47, 4 }
  0xc2   : > { %v283_v49 = vadd.f32 %v282_v48, %v281_v47 }
  0xc4   : > { %v284_v50 = vrot.slane %v283_v49, 2 }
  0xc6   : > { %v285_v51 = vadd.f32 %v284_v50, %v283_v49 }
  0xc8   : > { %v286_v52 = vrot.slane %v285_v51, 1 }
  0xca   : > { %v287_v53 = vadd.f32 %v286_v52, %v285_v51 }
  0xcc   : > { %v288_v54 = vmul.f32 0.25, %v287_v53 }
  0xce   : > { %v289_v55 = vadd.f32 1e-05, %v288_v54 }
  0xd0   : > { %398 = vrsqrt.f32 %v289_v55  ;;  %vm296_vm2 = vweird.f32 %v289_v55 }
  0xd6   : > { %v399_v56 = vpop.eup %398 }
  0xd7   : > { %v291_v57 = vmul.f32 %v399_v56, %v289_v55  ;;  %vm297_vm1 = vweird.f32 %v399_v56 }
  0xd8   : > { %vm298_vm3 = vmor %vm296_vm2, %vm297_vm1 }
  0xd9   : > { %v292_v58 = vmul.f32 %v399_v56, %v291_v57 }
  0xdb   : > { %v293_v59 = vmul.f32 0.5, %v292_v58 }
  0xdd   : > { %v294_v60 = vsub.f32 1.5, %v293_v59 }
  0xdf   : > { %v295_v62 = vmul.f32 %v399_v56, %v294_v60 }
  0xe1   : > { %v299_v63 = vsel %vm298_vm3, %v399_v56, %v295_v62 }
  0xe2   : > { %v300_v0 = vmul.f32 %v299_v63, %v268_v61 }
  0xe4   : > { %v302_v1 = vperm.slane %v300_v0, 0 }
  0xe6   : > { %v304_v3 = vmul.f32 %v302_v1, %v279_v45 }
  0xe8   : > { %v308_v4 = vadd.f32 %v397_v2, %v304_v3 }
  0xea   : > { %v309_v5 = vmax.f32 %v308_v4, 0.0 }
  0xec   : > { %310 = vst [vmem:[%s192_s20] sm:$0xf] %v309_v5 }
  0xed PF: > { %s14_s15 = sadd.s32 1, %s406_s15  }
  0xee   : > { %p11_p4 = scmp.ge.s32.totalorder %s14_s15, 4  }
  0xf0   :  { %13 = sbr.rel (!%p11_p4) target bundleno = 1 (0x1), region = 67 }

// kernel: generator_forward.11
= control target key start
LH: loop header
LB: loop body
LE: loop exit
PB: predicated region body
PF: predicated region fallthrough
CT: control target
= control target key end

     0   :  { %s784_s24 = smov 0   ;;  %s1122_s0 = inlined_call_operand.vmem [shape: f32[2,6,128], index: 0, kind: input, shape index: {}]   ;;  %s1123_s1 = inlined_call_operand.vmem [shape: f32[3,128,128], index: 1, kind: input, shape index: {}]   ;;  %s1124_s2 = inlined_call_operand.vmem [shape: f32[1,128], index: 2, kind: input, shape index: {}]   ;;  %s1125_s3 = inlined_call_operand.vmem [shape: f32[1,128], index: 3, kind: input, shape index: {}]   ;;  %s1126_s4 = inlined_call_operand.vmem [shape: f32[3,128,128], index: 4, kind: input, shape index: {}]   ;;  %s1127_s5 = inlined_call_operand.vmem [shape: f32[1,128], index: 5, kind: input, shape index: {}]   ;;  %s1128_s6 = inlined_call_operand.vmem [shape: f32[1,128], index: 6, kind: input, shape index: {}]   ;;  %s1129_s7 = inlined_call_operand.vmem [shape: f32[2,4,128], index: 7, kind: output, shape index: {}]  }
   0x1 LB: > { %s648_s25 = sadd.s32 4294967295, %s742_s24   ;;  %p652_p0 = scmp.ge.s32.totalorder %s742_s24, 1  ;;  %s742_s24 = sphi %s784_s24, %s17_s24  }
   0x2   : > { %p236_p1 = scmp.lt.s32.totalorder %s742_s24, 3 }
   0x4   : > { %p237_p2 = pnand %p652_p0, %p236_p1 }
   0x5   : > { %p266_p3 = scmp.lt.s32.totalorder (!%p237_p2), %s648_s25, 1 }
   0x6   : > { %240 = sbr.rel (%p237_p2) target bundleno = 448 (0x1c0), region = 48 }
   0xb   : > { %v686_v0 = vld [vmem:[%s1123_s1 + $0x178] sm:$0xff]  ;;  %v685_v1 = vld [vmem:[%s1123_s1 + $0x170] sm:$0xff]  ;;  %v684_v5 = vld [vmem:[%s1123_s1 + $0x168] sm:$0xff]  ;;  %s1131_s25 = smov (!%p266_p3, %s648_s25), 1  ;;  %vm390_vm0 = vcmask 1043456   ;;  %vm433_vm4 = vcmask 1040384  }
   0xc   : > { %v670_v2 = vld [vmem:[%s1123_s1 + $0xf8] sm:$0xff]  ;;  %367 = vmatpush.msra.mxu2 %v686_v0  ;;  %v669_v4 = vld [vmem:[%s1123_s1 + $0xf0] sm:$0xff]  ;;  %v668_v7 = vld [vmem:[%s1123_s1 + $0xe8] sm:$0xff]  ;;  %s653_s18 = sshll.u32 %s1131_s25, 3  ;;  %vm435_vm5 = vcmask 1044480  }
   0xd   : > { %309 = vmatpush.msra.mxu0 %v670_v2  ;;  %v290_v3 = vld [vmem:[%s1123_s1 + $0x78] sm:$0xff]  ;;  %v289_v6 = vld [vmem:[%s1123_s1 + $0x70] sm:$0xff]  ;;  %v288_v8 = vld [vmem:[%s1123_s1 + $0x68] sm:$0xff]  ;;  %s269_s8 = scalar_lea.vmem %s1122_s0, %s653_s18  ;;  %s654_s18 = sshll.u32 %s1131_s25, 2 }
   0xe   : > { %329 = vmatpush.msra.mxu1 %v290_v3  ;;  %368 = vmatpush.msra.mxu2 %v685_v1  ;;  %v683_v9 = vld [vmem:[%s1123_s1 + $0x160] sm:$0xff]  ;;  %v682_v12 = vld [vmem:[%s1123_s1 + $0x158] sm:$0xff]  ;;  %v681_v15 = vld [vmem:[%s1123_s1 + $0x150] sm:$0xff]  ;;  %s273_s21 = scalar_lea.vmem %s1129_s7, %s654_s18 }
   0xf   : > { %310 = vmatpush.msra.mxu0 %v669_v4  ;;  %v667_v10 = vld [vmem:[%s1123_s1 + $0xe0] sm:$0xff]  ;;  %v666_v13 = vld [vmem:[%s1123_s1 + $0xd8] sm:$0xff]  ;;  %v665_v16 = vld [vmem:[%s1123_s1 + $0xd0] sm:$0xff] }
  0x10   : > { %330 = vmatpush.msra.mxu1 %v289_v6  ;;  %369 = vmatpush.msra.mxu2 %v684_v5  ;;  %v287_v11 = vld [vmem:[%s1123_s1 + $0x60] sm:$0xff]  ;;  %v286_v14 = vld [vmem:[%s1123_s1 + $0x58] sm:$0xff]  ;;  %v285_v17 = vld [vmem:[%s1123_s1 + $0x50] sm:$0xff] }
  0x11   : > { %311 = vmatpush.msra.mxu0 %v668_v7  ;;  %v680_v18 = vld [vmem:[%s1123_s1 + $0x148] sm:$0xff]  ;;  %v679_v21 = vld [vmem:[%s1123_s1 + $0x140] sm:$0xff]  ;;  %v678_v24 = vld [vmem:[%s1123_s1 + $0x138] sm:$0xff] }
  0x12   : > { %331 = vmatpush.msra.mxu1 %v288_v8  ;;  %370 = vmatpush.msra.mxu2 %v683_v9  ;;  %v664_v19 = vld [vmem:[%s1123_s1 + $0xc8] sm:$0xff]  ;;  %v663_v22 = vld [vmem:[%s1123_s1 + $0xc0] sm:$0xff]  ;;  %v662_v25 = vld [vmem:[%s1123_s1 + $0xb8] sm:$0xff] }
  0x13   : > { %312 = vmatpush.msra.mxu0 %v667_v10  ;;  %v284_v20 = vld [vmem:[%s1123_s1 + $0x48] sm:$0xff]  ;;  %v283_v23 = vld [vmem:[%s1123_s1 + $0x40] sm:$0xff]  ;;  %v282_v26 = vld [vmem:[%s1123_s1 + $0x38] sm:$0xff] }
  0x14   : > { %332 = vmatpush.msra.mxu1 %v287_v11  ;;  %371 = vmatpush.msra.mxu2 %v682_v12  ;;  %v677_v27 = vld [vmem:[%s1123_s1 + $0x130] sm:$0xff]  ;;  %v676_v30 = vld [vmem:[%s1123_s1 + $0x128] sm:$0xff]  ;;  %v675_v33 = vld [vmem:[%s1123_s1 + $0x120] sm:$0xff] }
  0x15   : > { %313 = vmatpush.msra.mxu0 %v666_v13  ;;  %v661_v28 = vld [vmem:[%s1123_s1 + $0xb0] sm:$0xff]  ;;  %v660_v31 = vld [vmem:[%s1123_s1 + $0xa8] sm:$0xff]  ;;  %v659_v34 = vld [vmem:[%s1123_s1 + $0xa0] sm:$0xff] }
  0x16   : > { %333 = vmatpush.msra.mxu1 %v286_v14  ;;  %372 = vmatpush.msra.mxu2 %v681_v15  ;;  %v281_v29 = vld [vmem:[%s1123_s1 + $0x30] sm:$0xff]  ;;  %v280_v32 = vld [vmem:[%s1123_s1 + $0x28] sm:$0xff]  ;;  %v279_v35 = vld [vmem:[%s1123_s1 + $0x20] sm:$0xff] }
  0x17   : > { %314 = vmatpush.msra.mxu0 %v665_v16  ;;  %v674_v36 = vld [vmem:[%s1123_s1 + $0x118] sm:$0xff]  ;;  %v673_v39 = vld [vmem:[%s1123_s1 + $0x110] sm:$0xff]  ;;  %v672_v42 = vld [vmem:[%s1123_s1 + $0x108] sm:$0xff] }
  0x18   : > { %334 = vmatpush.msra.mxu1 %v285_v17  ;;  %373 = vmatpush.msra.mxu2 %v680_v18  ;;  %v658_v37 = vld [vmem:[%s1123_s1 + $0x98] sm:$0xff]  ;;  %v657_v40 = vld [vmem:[%s1123_s1 + $0x90] sm:$0xff]  ;;  %v656_v43 = vld [vmem:[%s1123_s1 + $0x88] sm:$0xff] }
  0x19   : > { %315 = vmatpush.msra.mxu0 %v664_v19  ;;  %v278_v38 = vld [vmem:[%s1123_s1 + $0x18] sm:$0xff]  ;;  %v277_v41 = vld [vmem:[%s1123_s1 + $0x10] sm:$0xff]  ;;  %v276_v44 = vld [vmem:[%s1123_s1 + $0x8] sm:$0xff] }
  0x1a   : > { %335 = vmatpush.msra.mxu1 %v284_v20  ;;  %374 = vmatpush.msra.mxu2 %v679_v21  ;;  %v671_v45 = vld [vmem:[%s1123_s1 + $0x100] sm:$0xff]  ;;  %v452_v59 = vld [vmem:[%s1126_s4 + $0x78] sm:$0xff]  ;;  %v451_v61 = vld [vmem:[%s1126_s4 + $0x70] sm:$0xff] }
  0x1b   : > { %316 = vmatpush.msra.mxu0 %v663_v22  ;;  %v655_v46 = vld [vmem:[%s1123_s1 + $0x80] sm:$0xff]  ;;  %v702_v62 = vld [vmem:[%s1126_s4 + $0xf8] sm:$0xff]  ;;  %v450_v1 = vld [vmem:[%s1126_s4 + $0x68] sm:$0xff] }
  0x1c   : > { %336 = vmatpush.msra.mxu1 %v283_v23  ;;  %375 = vmatpush.msra.mxu2 %v678_v24  ;;  %v349_v47 = vld [vmem:[%s269_s8 + $0x2] sm:$0xf]  ;;  %v719_v63 = vld [vmem:[%s1126_s4 + $0x178] sm:$0xff]  ;;  %v701_v2 = vld [vmem:[%s1126_s4 + $0xf0] sm:$0xff] }
  0x1d   : > { %317 = vmatpush.msra.mxu0 %v662_v25  ;;  %v275_v48 = vld [vmem:[%s1123_s1] sm:$0xff]  ;;  %473 = vmatpush.msra.mxu3 %v702_v62  ;;  %v718_v3 = vld [vmem:[%s1126_s4 + $0x170] sm:$0xff]  ;;  %v700_v6 = vld [vmem:[%s1126_s4 + $0xe8] sm:$0xff] }
  0x1e   : > { %337 = vmatpush.msra.mxu1 %v282_v26  ;;  %376 = vmatpush.msra.mxu2 %v677_v27  ;;  %v946_v49 = vld [vmem:[%s269_s8 + $0x1] sm:$0xf]  ;;  %v717_v7 = vld [vmem:[%s1126_s4 + $0x168] sm:$0xff]  ;;  %v448_v9 = vld [vmem:[%s1126_s4 + $0x58] sm:$0xff] }
  0x1f   : > { %318 = vmatpush.msra.mxu0 %v661_v28  ;;  %v274_v50 = vld [vmem:[%s269_s8] sm:$0xf]  ;;  %474 = vmatpush.msra.mxu3 %v701_v2  ;;  %v447_v13 = vld [vmem:[%s1126_s4 + $0x50] sm:$0xff]  ;;  %v698_v14 = vld [vmem:[%s1126_s4 + $0xd8] sm:$0xff] }
  0x20   : > { %338 = vmatpush.msra.mxu1 %v281_v29  ;;  %377 = vmatpush.msra.mxu2 %v676_v30  ;;  %v449_v5 = vld [vmem:[%s1126_s4 + $0x60] sm:$0xff]  ;;  %v715_v15 = vld [vmem:[%s1126_s4 + $0x158] sm:$0xff]  ;;  %v446_v17 = vld [vmem:[%s1126_s4 + $0x48] sm:$0xff] }
  0x21   : > { %319 = vmatpush.msra.mxu0 %v660_v31  ;;  %475 = vmatpush.msra.mxu3 %v700_v6  ;;  %v699_v10 = vld [vmem:[%s1126_s4 + $0xe0] sm:$0xff]  ;;  %v697_v18 = vld [vmem:[%s1126_s4 + $0xd0] sm:$0xff]  ;;  %v696_v22 = vld [vmem:[%s1126_s4 + $0xc8] sm:$0xff] }
  0x22   : > { %339 = vmatpush.msra.mxu1 %v280_v32  ;;  %378 = vmatpush.msra.mxu2 %v675_v33  ;;  %v716_v11 = vld [vmem:[%s1126_s4 + $0x160] sm:$0xff]  ;;  %v714_v19 = vld [vmem:[%s1126_s4 + $0x150] sm:$0xff]  ;;  %v713_v23 = vld [vmem:[%s1126_s4 + $0x148] sm:$0xff] }
  0x23   : > { %320 = vmatpush.msra.mxu0 %v659_v34  ;;  %476 = vmatpush.msra.mxu3 %v699_v10  ;;  %v445_v21 = vld [vmem:[%s1126_s4 + $0x40] sm:$0xff]  ;;  %v444_v25 = vld [vmem:[%s1126_s4 + $0x38] sm:$0xff]  ;;  %v443_v29 = vld [vmem:[%s1126_s4 + $0x30] sm:$0xff] }
  0x24   : > { %340 = vmatpush.msra.mxu1 %v279_v35  ;;  %379 = vmatpush.msra.mxu2 %v674_v36  ;;  %v695_v27 = vld [vmem:[%s1126_s4 + $0xc0] sm:$0xff]  ;;  %v694_v31 = vld [vmem:[%s1126_s4 + $0xb8] sm:$0xff]  ;;  %v442_v33 = vld [vmem:[%s1126_s4 + $0x28] sm:$0xff] }
  0x25   : > { %321 = vmatpush.msra.mxu0 %v658_v37  ;;  %477 = vmatpush.msra.mxu3 %v698_v14  ;;  %v712_v28 = vld [vmem:[%s1126_s4 + $0x140] sm:$0xff]  ;;  %v711_v32 = vld [vmem:[%s1126_s4 + $0x138] sm:$0xff]  ;;  %v693_v35 = vld [vmem:[%s1126_s4 + $0xb0] sm:$0xff] }
  0x26   : > { %341 = vmatpush.msra.mxu1 %v278_v38  ;;  %380 = vmatpush.msra.mxu2 %v673_v39  ;;  %v710_v36 = vld [vmem:[%s1126_s4 + $0x130] sm:$0xff]  ;;  %v441_v37 = vld [vmem:[%s1126_s4 + $0x20] sm:$0xff]  ;;  %v692_v39 = vld [vmem:[%s1126_s4 + $0xa8] sm:$0xff] }
  0x27   : > { %322 = vmatpush.msra.mxu0 %v657_v40  ;;  %478 = vmatpush.msra.mxu3 %v697_v18  ;;  %v709_v40 = vld [vmem:[%s1126_s4 + $0x128] sm:$0xff]  ;;  %v730_v6 = vld [vmem:[%s1125_s3] ss:$0 sm:$0xff] }
  0x28   : > { %342 = vmatpush.msra.mxu1 %v277_v41  ;;  %381 = vmatpush.msra.mxu2 %v672_v42  ;;  %v440_v41 = vld [vmem:[%s1126_s4 + $0x18] sm:$0xff]  ;;  %v691_v42 = vld [vmem:[%s1126_s4 + $0xa0] sm:$0xff] }
  0x29   : > { %323 = vmatpush.msra.mxu0 %v656_v43  ;;  %479 = vmatpush.msra.mxu3 %v696_v22  ;;  %v708_v43 = vld [vmem:[%s1126_s4 + $0x120] sm:$0xff] }
  0x2a   : > { %343 = vmatpush.msra.mxu1 %v276_v44  ;;  %382 = vmatpush.msra.mxu2 %v671_v45  ;;  %v439_v44 = vld [vmem:[%s1126_s4 + $0x10] sm:$0xff] }
  0x2b   : > { %324 = vmatpush.msra.mxu0 %v655_v46  ;;  %383 = vmatmul.f32.vlgmr.msra.gmra.mxu2 %v349_v47  ;;  %v690_v46 = vld [vmem:[%s1126_s4 + $0x98] sm:$0xff] }
  0x2c   : > { %344 = vmatpush.msra.mxu1 %v275_v48  ;;  %325 = vmatmul.f32.vlgmr.msra.gmra.mxu0 %v946_v49  ;;  %v707_v47 = vld [vmem:[%s1126_s4 + $0x118] sm:$0xff]  ;;  %v438_v48 = vld [vmem:[%s1126_s4 + $0x8] sm:$0xff] }
  0x2d   : > { %345 = vmatmul.f32.vlgmr.msra.gmra.mxu1 %v274_v50  ;;  %493 = vmatpush.msrb.mxu0 %v452_v59  ;;  %v704_v59 = vld [vmem:[%s1126_s4 + $0x100] sm:$0xff] }
  0x2e   : > { %532 = vmatpush.msrb.mxu1 %v719_v63  ;;  %480 = vmatpush.msra.mxu3 %v695_v27 }
  0x2f   : > { %494 = vmatpush.msrb.mxu0 %v451_v61 }
  0x30   : > { %533 = vmatpush.msrb.mxu1 %v718_v3  ;;  %481 = vmatpush.msra.mxu3 %v694_v31 }
  0x31   : > { %495 = vmatpush.msrb.mxu0 %v450_v1  ;;  %v388_v1 = vld [vmem:[%s1124_s2] sm:$0x1] }
  0x32   : > { %534 = vmatpush.msrb.mxu1 %v717_v7  ;;  %482 = vmatpush.msra.mxu3 %v693_v35 }
  0x33   : > { %496 = vmatpush.msrb.mxu0 %v449_v5 }
  0x34   : > { %535 = vmatpush.msrb.mxu1 %v716_v11  ;;  %483 = vmatpush.msra.mxu3 %v692_v39 }
  0x35   : > { %497 = vmatpush.msrb.mxu0 %v448_v9 }
  0x36   : > { %536 = vmatpush.msrb.mxu1 %v715_v15  ;;  %484 = vmatpush.msra.mxu3 %v691_v42 }
  0x37   : > { %498 = vmatpush.msrb.mxu0 %v447_v13 }
  0x38   : > { %537 = vmatpush.msrb.mxu1 %v714_v19  ;;  %485 = vmatpush.msra.mxu3 %v690_v46 }
  0x39   : > { %499 = vmatpush.msrb.mxu0 %v446_v17 }
  0x3a   : > { %538 = vmatpush.msrb.mxu1 %v713_v23 }
  0x3b   : > { %500 = vmatpush.msrb.mxu0 %v445_v21 }
  0x3c   : > { %539 = vmatpush.msrb.mxu1 %v712_v28 }
  0x3d   : > { %501 = vmatpush.msrb.mxu0 %v444_v25 }
  0x3e   : > { %540 = vmatpush.msrb.mxu1 %v711_v32 }
  0x3f   : > { %502 = vmatpush.msrb.mxu0 %v443_v29 }
  0x40   : > { %541 = vmatpush.msrb.mxu1 %v710_v36 }
  0x41   : > { %503 = vmatpush.msrb.mxu0 %v442_v33 }
  0x42   : > { %542 = vmatpush.msrb.mxu1 %v709_v40 }
  0x43   : > { %504 = vmatpush.msrb.mxu0 %v441_v37 }
  0x44   : > { %543 = vmatpush.msrb.mxu1 %v708_v43 }
  0x45   : > { %505 = vmatpush.msrb.mxu0 %v440_v41 }
  0x46   : > { %544 = vmatpush.msrb.mxu1 %v707_v47 }
  0x47   : > { %506 = vmatpush.msrb.mxu0 %v439_v44  ;;  %v553_v44 = vld [vmem:[%s1127_s5] sm:$0x1] }
  0x49   : > { %507 = vmatpush.msrb.mxu0 %v438_v48 }
  0xa9   : > { %v326_v51 = vpop.f32.mrf.mxu0 }
  0xaa   : > { %v346_v52 = vpop.f32.mrf.mxu1 }
  0xab   : > { %v347_v53 = vadd.f32 %v346_v52, %v326_v51  ;;  %v689_v51 = vld [vmem:[%s1126_s4 + $0x90] sm:$0xff] }
  0xac   : > { %v706_v52 = vld [vmem:[%s1126_s4 + $0x110] sm:$0xff]  ;;  %486 = vmatpush.msra.mxu3 %v689_v51 }
  0xad   : > { %545 = vmatpush.msrb.mxu1 %v706_v52 }
  0xae   : > { %v384_v54 = vpop.f32.mrf.mxu2 }
  0xaf   : > { %v387_v55 = vadd.f32 %v384_v54, %v347_v53  ;;  %v437_v53 = vld [vmem:[%s1126_s4] sm:$0xff] }
  0xb0   : > { %508 = vmatpush.msrb.mxu0 %v437_v53 }
  0xb1   : > { %v391_v56 = vsel %vm390_vm0, %v387_v55, 0.0 }
  0xb2   : > { %v392_v57 = vrot.slane %v391_v56, 4 }
  0xb4   : > { %v393_v58 = vadd.f32 %v392_v57, %v391_v56  ;;  %v705_v57 = vld [vmem:[%s1126_s4 + $0x108] sm:$0xff] }
  0xb5   : > { %546 = vmatpush.msrb.mxu1 %v705_v57 }
  0xb6   : > { %v394_v60 = vrot.slane %v393_v58, 2 }
  0xb7   : > { %547 = vmatpush.msrb.mxu1 %v704_v59 }
  0xb8   : > { %v395_v0 = vadd.f32 %v394_v60, %v393_v58  ;;  %v687_v58 = vld [vmem:[%s1126_s4 + $0x80] sm:$0xff] }
  0xba   : > { %v396_v4 = vrot.slane %v395_v0, 1 }
  0xbc   : > { %v397_v8 = vadd.f32 %v396_v4, %v395_v0 }
  0xbe   : > { %v398_v12 = vmul.f32 0.25, %v397_v8 }
  0xc0   : > { %v998_v16 = vsub.f32 %v387_v55, %v398_v12  ;;  %v688_v55 = vld [vmem:[%s1126_s4 + $0x88] sm:$0xff] }
  0xc1   : > { %487 = vmatpush.msra.mxu3 %v688_v55 }
  0xc2   : > { %v400_v20 = vmul.f32 %v998_v16, %v998_v16 }
  0xc3   : > { %488 = vmatpush.msra.mxu3 %v687_v58 }
  0xc4   : > { %v401_v24 = vsel %vm390_vm0, %v400_v20, 0.0 }
  0xc5   : > { %v402_v26 = vrot.slane %v401_v24, 4 }
  0xc7   : > { %v403_v30 = vadd.f32 %v402_v26, %v401_v24 }
  0xc9   : > { %v404_v34 = vrot.slane %v403_v30, 2 }
  0xcb   : > { %v405_v38 = vadd.f32 %v404_v34, %v403_v30 }
  0xcd   : > { %v406_v45 = vrot.slane %v405_v38, 1 }
  0xcf   : > { %v407_v50 = vadd.f32 %v406_v45, %v405_v38 }
  0xd1   : > { %v408_v54 = vmul.f32 0.25, %v407_v50  ;;  %v731_v50 = vld [vmem:[%s1128_s6] ss:$0 sm:$0xff] }
  0xd3   : > { %v409_v56 = vadd.f32 1e-05, %v408_v54 }
  0xd5   : > { %732 = vrsqrt.f32 %v409_v56  ;;  %vm416_vm2 = vweird.f32 %v409_v56 }
  0xdb   : > { %v733_v60 = vpop.eup %732 }
  0xdc   : > { %v411_v61 = vmul.f32 %v733_v60, %v409_v56  ;;  %vm417_vm1 = vweird.f32 %v733_v60 }
  0xdd   : > { %vm418_vm3 = vmor %vm416_vm2, %vm417_vm1 }
  0xde   : > { %v412_v62 = vmul.f32 %v733_v60, %v411_v61 }
  0xe0   : > { %v413_v63 = vmul.f32 0.5, %v412_v62 }
  0xe2   : > { %v414_v0 = vsub.f32 1.5, %v413_v63 }
  0xe4   : > { %v415_v2 = vmul.f32 %v733_v60, %v414_v0 }
  0xe6   : > { %v419_v3 = vsel %vm418_vm3, %v733_v60, %v415_v2 }
  0xe7   : > { %v420_v4 = vmul.f32 %v419_v3, %v388_v1 }
  0xe9   : > { %v422_v5 = vperm.slane %v420_v4, 0 }
  0xeb   : > { %v424_v7 = vmul.f32 %v422_v5, %v998_v16 }
  0xed   : > { %v428_v8 = vadd.f32 %v730_v6, %v424_v7 }
  0xef   : > { %v429_v9 = vmax.f32 %v428_v8, 0.0 }
  0xf1   : > { %v431_v10 = vrot.slane %v429_v9, 7 }
  0xf3   : > { %v434_v11 = vsel %vm433_vm4, 0.0, %v431_v10 }
  0xf4   : > { %703 = vmatmul.msk.f32.vlgmr.msrb.gmra.mxu0 %vm435_vm5, %v434_v11  ;;  %v436_v12 = vsel %vm435_vm5, %v434_v11, 0.0 }
  0xf5   : > { %v471_v13 = vrot.slane %v436_v12, 1  ;;  %v530_v14 = vrot.slane %v436_v12, 2 }
  0xf7   : > { %489 = vmatmul.f32.vlgmr.msra.gmra.mxu3 %v471_v13  ;;  %548 = vmatmul.f32.vlgmr.msrb.gmra.mxu1 %v530_v14 }
 0x171   : > { %v510_v15 = vpop.f32.mrf.mxu0 }
 0x174   : > { %v549_v19 = vpop.f32.mrf.mxu1 }
 0x17a   : > { %v490_v17 = vpop.f32.mrf.mxu3 }
 0x17b   : > { %v511_v18 = vadd.f32 %v510_v15, %v490_v17 }
 0x17d   : > { %v552_v20 = vadd.f32 %v549_v19, %v511_v18 }
 0x17f   : > { %v555_v21 = vsel %vm390_vm0, %v552_v20, 0.0 }
 0x180   : > { %v556_v16 = vrot.slane %v555_v21, 4 }
 0x182   : > { %v557_v22 = vadd.f32 %v556_v16, %v555_v21 }
 0x184   : > { %v558_v23 = vrot.slane %v557_v22, 2 }
 0x186   : > { %v559_v24 = vadd.f32 %v558_v23, %v557_v22 }
 0x188   : > { %v560_v25 = vrot.slane %v559_v24, 1 }
 0x18a   : > { %v561_v26 = vadd.f32 %v560_v25, %v559_v24 }
 0x18c   : > { %v562_v27 = vmul.f32 0.25, %v561_v26 }
 0x18e   : > { %v563_v28 = vsub.f32 %v552_v20, %v562_v27 }
 0x190   : > { %v564_v29 = vmul.f32 %v563_v28, %v563_v28 }
 0x192   : > { %v565_v30 = vsel %vm390_vm0, %v564_v29, 0.0 }
 0x193   : > { %v566_v31 = vrot.slane %v565_v30, 4 }
 0x195   : > { %v567_v32 = vadd.f32 %v566_v31, %v565_v30 }
 0x197   : > { %v568_v33 = vrot.slane %v567_v32, 2 }
 0x199   : > { %v569_v34 = vadd.f32 %v568_v33, %v567_v32 }
 0x19b   : > { %v570_v35 = vrot.slane %v569_v34, 1 }
 0x19d   : > { %v571_v36 = vadd.f32 %v570_v35, %v569_v34 }
 0x19f   : > { %v572_v37 = vmul.f32 0.25, %v571_v36 }
 0x1a1   : > { %v573_v38 = vadd.f32 1e-05, %v572_v37 }
 0x1a3   : > { %734 = vrsqrt.f32 %v573_v38  ;;  %vm580_vm7 = vweird.f32 %v573_v38 }
 0x1a9   : > { %v735_v39 = vpop.eup %734 }
 0x1aa   : > { %v575_v40 = vmul.f32 %v735_v39, %v573_v38  ;;  %vm581_vm6 = vweird.f32 %v735_v39 }
 0x1ab   : > { %vm582_vm8 = vmor %vm580_vm7, %vm581_vm6 }
 0x1ac   : > { %v576_v41 = vmul.f32 %v735_v39, %v575_v40 }
 0x1ae   : > { %v577_v42 = vmul.f32 0.5, %v576_v41 }
 0x1b0   : > { %v578_v43 = vsub.f32 1.5, %v577_v42 }
 0x1b2   : > { %v579_v45 = vmul.f32 %v735_v39, %v578_v43 }
 0x1b4   : > { %v583_v46 = vsel %vm582_vm8, %v735_v39, %v579_v45 }
 0x1b5   : > { %v584_v47 = vmul.f32 %v583_v46, %v553_v44 }
 0x1b7   : > { %v586_v48 = vperm.slane %v584_v47, 0 }
 0x1b9   : > { %v588_v51 = vmul.f32 %v586_v48, %v563_v28 }
 0x1bb   : > { %v592_v52 = vadd.f32 %v731_v50, %v588_v51 }
 0x1bd   : > { %v593_v53 = vadd.f32 %v592_v52, %v946_v49 }
 0x1bf   : > { %594 = vst [vmem:[%s273_s21] sm:$0xf] %v593_v53 }
 0x1c0 PF: > { %s17_s24 = sadd.s32 1, %s742_s24  }
 0x1c1   : > { %p14_p4 = scmp.ge.s32.totalorder %s17_s24, 4  }
 0x1c3   :  { %16 = sbr.rel (!%p14_p4) target bundleno = 1 (0x1), region = 82 }

// kernel: generator_forward.13
= control target key start
LH: loop header
LB: loop body
LE: loop exit
PB: predicated region body
PF: predicated region fallthrough
CT: control target
= control target key end

     0   :  { %s569_s15 = smov 0   ;;  %s802_s0 = inlined_call_operand.vmem [shape: f32[2,6,128], index: 0, kind: input, shape index: {}]   ;;  %s803_s1 = inlined_call_operand.vmem [shape: f32[4,128,64], index: 1, kind: input, shape index: {}]   ;;  %s804_s2 = inlined_call_operand.vmem [shape: f32[1,64], index: 2, kind: input, shape index: {}]   ;;  %s805_s3 = inlined_call_operand.vmem [shape: f32[1,64], index: 3, kind: input, shape index: {}]   ;;  %s806_s4 = inlined_call_operand.vmem [shape: f32[2,4,128], index: 4, kind: output, shape index: {}]  }
   0x1 LB: > { %s466_s16 = sadd.s32 4294967295, %s541_s15   ;;  %p470_p0 = scmp.ge.s32.totalorder %s541_s15, 1  ;;  %s541_s15 = sphi %s569_s15, %s14_s15  }
   0x2   : > { %p161_p1 = scmp.lt.s32.totalorder %s541_s15, 3 }
   0x4   : > { %p162_p2 = pnand %p470_p0, %p161_p1 }
   0x5   : > { %p693_p3 = scmp.lt.s32.totalorder (!%p162_p2), %s466_s16, 1  ;;  %s543_s8 = smov (!%p162_p2), 64  }
   0x6   : > { %165 = sbr.rel (%p162_p2) target bundleno = 365 (0x16d), region = 36 }
   0xb   : > { %v488_v0 = vld [vmem:[%s803_s1 + $0xf8] sm:$0xff]  ;;  %v487_v4 = vld [vmem:[%s803_s1 + $0xf0] sm:$0xff]  ;;  %v486_v8 = vld [vmem:[%s803_s1 + $0xe8] sm:$0xff]  ;;  %s809_s16 = smov (!%p693_p3, %s466_s16), 1  ;;  %vm343_vm0 = vcmask 519168   ;;  %vm410_vm4 = vcmask 523264  }
   0xc   : > { %v209_v1 = vld [vmem:[%s803_s1 + $0x78] sm:$0xff]  ;;  %228 = vmatpush.msra.mxu0 %v488_v0  ;;  %v208_v5 = vld [vmem:[%s803_s1 + $0x70] sm:$0xff]  ;;  %v207_v9 = vld [vmem:[%s803_s1 + $0x68] sm:$0xff]  ;;  %s471_s30 = sshll.u32 %s809_s16, 3  ;;  %s472_s9 = sshll.u32 %s809_s16, 2 }
   0xd   : > { %v520_v2 = vld [vmem:[%s803_s1 + $0x1f8] sm:$0xff]  ;;  %248 = vmatpush.msra.mxu1 %v209_v1  ;;  %v519_v6 = vld [vmem:[%s803_s1 + $0x1f0] sm:$0xff]  ;;  %v518_v10 = vld [vmem:[%s803_s1 + $0x1e8] sm:$0xff]  ;;  %s188_s21 = scalar_lea.vmem %s802_s0, %s471_s30  ;;  %s192_s12 = scalar_lea.vmem %s806_s4, %s472_s9 }
   0xe   : > { %v504_v3 = vld [vmem:[%s803_s1 + $0x178] sm:$0xff]  ;;  %303 = vmatpush.msra.mxu2 %v520_v2  ;;  %v503_v7 = vld [vmem:[%s803_s1 + $0x170] sm:$0xff]  ;;  %229 = vmatpush.msra.mxu0 %v487_v4  ;;  %v502_v11 = vld [vmem:[%s803_s1 + $0x168] sm:$0xff] }
   0xf   : > { %323 = vmatpush.msra.mxu3 %v504_v3  ;;  %249 = vmatpush.msra.mxu1 %v208_v5  ;;  %v485_v12 = vld [vmem:[%s803_s1 + $0xe0] sm:$0xff]  ;;  %v484_v16 = vld [vmem:[%s803_s1 + $0xd8] sm:$0xff]  ;;  %v483_v20 = vld [vmem:[%s803_s1 + $0xd0] sm:$0xff] }
  0x10   : > { %304 = vmatpush.msra.mxu2 %v519_v6  ;;  %v206_v13 = vld [vmem:[%s803_s1 + $0x60] sm:$0xff]  ;;  %230 = vmatpush.msra.mxu0 %v486_v8  ;;  %v205_v17 = vld [vmem:[%s803_s1 + $0x58] sm:$0xff]  ;;  %v204_v21 = vld [vmem:[%s803_s1 + $0x50] sm:$0xff] }
  0x11   : > { %324 = vmatpush.msra.mxu3 %v503_v7  ;;  %250 = vmatpush.msra.mxu1 %v207_v9  ;;  %v517_v14 = vld [vmem:[%s803_s1 + $0x1e0] sm:$0xff]  ;;  %v516_v18 = vld [vmem:[%s803_s1 + $0x1d8] sm:$0xff]  ;;  %v515_v22 = vld [vmem:[%s803_s1 + $0x1d0] sm:$0xff] }
  0x12   : > { %v501_v15 = vld [vmem:[%s803_s1 + $0x160] sm:$0xff]  ;;  %305 = vmatpush.msra.mxu2 %v518_v10  ;;  %231 = vmatpush.msra.mxu0 %v485_v12  ;;  %v500_v19 = vld [vmem:[%s803_s1 + $0x158] sm:$0xff]  ;;  %v499_v23 = vld [vmem:[%s803_s1 + $0x150] sm:$0xff] }
  0x13   : > { %325 = vmatpush.msra.mxu3 %v502_v11  ;;  %251 = vmatpush.msra.mxu1 %v206_v13  ;;  %v482_v24 = vld [vmem:[%s803_s1 + $0xc8] sm:$0xff]  ;;  %v481_v28 = vld [vmem:[%s803_s1 + $0xc0] sm:$0xff]  ;;  %v480_v32 = vld [vmem:[%s803_s1 + $0xb8] sm:$0xff] }
  0x14   : > { %306 = vmatpush.msra.mxu2 %v517_v14  ;;  %232 = vmatpush.msra.mxu0 %v484_v16  ;;  %v203_v25 = vld [vmem:[%s803_s1 + $0x48] sm:$0xff]  ;;  %v202_v29 = vld [vmem:[%s803_s1 + $0x40] sm:$0xff]  ;;  %v201_v33 = vld [vmem:[%s803_s1 + $0x38] sm:$0xff] }
  0x15   : > { %326 = vmatpush.msra.mxu3 %v501_v15  ;;  %252 = vmatpush.msra.mxu1 %v205_v17  ;;  %v514_v26 = vld [vmem:[%s803_s1 + $0x1c8] sm:$0xff]  ;;  %v513_v30 = vld [vmem:[%s803_s1 + $0x1c0] sm:$0xff]  ;;  %v512_v34 = vld [vmem:[%s803_s1 + $0x1b8] sm:$0xff] }
  0x16   : > { %307 = vmatpush.msra.mxu2 %v516_v18  ;;  %233 = vmatpush.msra.mxu0 %v483_v20  ;;  %v498_v27 = vld [vmem:[%s803_s1 + $0x148] sm:$0xff]  ;;  %v497_v31 = vld [vmem:[%s803_s1 + $0x140] sm:$0xff]  ;;  %v496_v35 = vld [vmem:[%s803_s1 + $0x138] sm:$0xff] }
  0x17   : > { %327 = vmatpush.msra.mxu3 %v500_v19  ;;  %253 = vmatpush.msra.mxu1 %v204_v21  ;;  %v479_v36 = vld [vmem:[%s803_s1 + $0xb0] sm:$0xff]  ;;  %v478_v40 = vld [vmem:[%s803_s1 + $0xa8] sm:$0xff]  ;;  %v477_v44 = vld [vmem:[%s803_s1 + $0xa0] sm:$0xff] }
  0x18   : > { %308 = vmatpush.msra.mxu2 %v515_v22  ;;  %234 = vmatpush.msra.mxu0 %v482_v24  ;;  %v200_v37 = vld [vmem:[%s803_s1 + $0x30] sm:$0xff]  ;;  %v199_v41 = vld [vmem:[%s803_s1 + $0x28] sm:$0xff]  ;;  %v198_v45 = vld [vmem:[%s803_s1 + $0x20] sm:$0xff] }
  0x19   : > { %328 = vmatpush.msra.mxu3 %v499_v23  ;;  %254 = vmatpush.msra.mxu1 %v203_v25  ;;  %v511_v38 = vld [vmem:[%s803_s1 + $0x1b0] sm:$0xff]  ;;  %v510_v42 = vld [vmem:[%s803_s1 + $0x1a8] sm:$0xff]  ;;  %v509_v46 = vld [vmem:[%s803_s1 + $0x1a0] sm:$0xff] }
  0x1a   : > { %309 = vmatpush.msra.mxu2 %v514_v26  ;;  %235 = vmatpush.msra.mxu0 %v481_v28  ;;  %v495_v39 = vld [vmem:[%s803_s1 + $0x130] sm:$0xff]  ;;  %v494_v43 = vld [vmem:[%s803_s1 + $0x128] sm:$0xff]  ;;  %v493_v47 = vld [vmem:[%s803_s1 + $0x120] sm:$0xff] }
  0x1b   : > { %329 = vmatpush.msra.mxu3 %v498_v27  ;;  %255 = vmatpush.msra.mxu1 %v202_v29  ;;  %v476_v48 = vld [vmem:[%s803_s1 + $0x98] sm:$0xff]  ;;  %v475_v52 = vld [vmem:[%s803_s1 + $0x90] sm:$0xff]  ;;  %v474_v56 = vld [vmem:[%s803_s1 + $0x88] sm:$0xff] }
  0x1c   : > { %310 = vmatpush.msra.mxu2 %v513_v30  ;;  %236 = vmatpush.msra.mxu0 %v480_v32  ;;  %v197_v49 = vld [vmem:[%s803_s1 + $0x18] sm:$0xff]  ;;  %v196_v53 = vld [vmem:[%s803_s1 + $0x10] sm:$0xff]  ;;  %v195_v57 = vld [vmem:[%s803_s1 + $0x8] sm:$0xff] }
  0x1d   : > { %330 = vmatpush.msra.mxu3 %v497_v31  ;;  %256 = vmatpush.msra.mxu1 %v201_v33  ;;  %v508_v50 = vld [vmem:[%s803_s1 + $0x198] sm:$0xff]  ;;  %v507_v54 = vld [vmem:[%s803_s1 + $0x190] sm:$0xff]  ;;  %v506_v58 = vld [vmem:[%s803_s1 + $0x188] sm:$0xff] }
  0x1e   : > { %311 = vmatpush.msra.mxu2 %v512_v34  ;;  %237 = vmatpush.msra.mxu0 %v479_v36  ;;  %v492_v51 = vld [vmem:[%s803_s1 + $0x118] sm:$0xff]  ;;  %v491_v55 = vld [vmem:[%s803_s1 + $0x110] sm:$0xff]  ;;  %v490_v59 = vld [vmem:[%s803_s1 + $0x108] sm:$0xff] }
  0x1f   : > { %331 = vmatpush.msra.mxu3 %v496_v35  ;;  %257 = vmatpush.msra.mxu1 %v200_v37  ;;  %v473_v60 = vld [vmem:[%s803_s1 + $0x80] sm:$0xff] }
  0x20   : > { %312 = vmatpush.msra.mxu2 %v511_v38  ;;  %238 = vmatpush.msra.mxu0 %v478_v40  ;;  %v194_v61 = vld [vmem:[%s803_s1] sm:$0xff] }
  0x21   : > { %332 = vmatpush.msra.mxu3 %v495_v39  ;;  %258 = vmatpush.msra.mxu1 %v199_v41  ;;  %v505_v62 = vld [vmem:[%s803_s1 + $0x180] sm:$0xff] }
  0x22   : > { %313 = vmatpush.msra.mxu2 %v510_v42  ;;  %239 = vmatpush.msra.mxu0 %v477_v44  ;;  %v489_v63 = vld [vmem:[%s803_s1 + $0x100] sm:$0xff] }
  0x23   : > { %333 = vmatpush.msra.mxu3 %v494_v43  ;;  %259 = vmatpush.msra.mxu1 %v198_v45  ;;  %v210_v0 = vld [vmem:[%s188_s21 + $0x1] sm:$0xf] }
  0x24   : > { %314 = vmatpush.msra.mxu2 %v509_v46  ;;  %240 = vmatpush.msra.mxu0 %v476_v48  ;;  %v193_v1 = vld [vmem:[%s188_s21] sm:$0xf] }
  0x25   : > { %334 = vmatpush.msra.mxu3 %v493_v47  ;;  %260 = vmatpush.msra.mxu1 %v197_v49  ;;  %v285_v2 = vld [vmem:[%s188_s21 + $0x2] sm:$0xf] }
  0x26   : > { %315 = vmatpush.msra.mxu2 %v508_v50  ;;  %241 = vmatpush.msra.mxu0 %v475_v52 }
  0x27   : > { %335 = vmatpush.msra.mxu3 %v492_v51  ;;  %261 = vmatpush.msra.mxu1 %v196_v53  ;;  %v380_v51 = vld [vmem:[%s804_s2] sm:$0x1] }
  0x28   : > { %316 = vmatpush.msra.mxu2 %v507_v54  ;;  %242 = vmatpush.msra.mxu0 %v474_v56  ;;  %v532_v56 = vld [vmem:[%s805_s3] ss:$0 sm:$0xff] }
  0x29   : > { %336 = vmatpush.msra.mxu3 %v491_v55  ;;  %262 = vmatpush.msra.mxu1 %v195_v57 }
  0x2a   : > { %317 = vmatpush.msra.mxu2 %v506_v58  ;;  %243 = vmatpush.msra.mxu0 %v473_v60 }
  0x2b   : > { %337 = vmatpush.msra.mxu3 %v490_v59  ;;  %263 = vmatpush.msra.mxu1 %v194_v61 }
  0x2c   : > { %318 = vmatpush.msra.mxu2 %v505_v62  ;;  %244 = vmatmul.f32.vlgmr.msra.gmra.mxu0 %v210_v0 }
  0x2d   : > { %338 = vmatpush.msra.mxu3 %v489_v63  ;;  %264 = vmatmul.f32.vlgmr.msra.gmra.mxu1 %v193_v1 }
  0x2e   : > { %319 = vmatmul.f32.vlgmr.msra.gmra.mxu2 %v285_v2  ;;  %339 = vmatmul.f32.vlgmr.msra.gmra.mxu3 %v210_v0 }
  0xa9   : > { %v245_v3 = vpop.f32.mrf.mxu0 }
  0xaa   : > { %v265_v4 = vpop.f32.mrf.mxu1 }
  0xab   : > { %v266_v5 = vadd.f32 %v265_v4, %v245_v3 }
  0xad   : > { %v344_v6 = vsel %vm343_vm0, %v266_v5, 0.0 }
  0xae   : > { %v345_v7 = vrot.slane %v344_v6, 4 }
  0xb0   : > { %v346_v8 = vadd.f32 %v345_v7, %v344_v6 }
  0xb1   : > { %v320_v9 = vpop.f32.mrf.mxu2  ;;  %v340_v10 = vpop.f32.mrf.mxu3 }
  0xb2   : > { %v341_v11 = vadd.f32 %v340_v10, %v320_v9  ;;  %v347_v12 = vrot.slane %v346_v8, 2 }
  0xb4   : > { %v351_v13 = vsel %vm343_vm0, %v341_v11, 0.0  ;;  %v348_v15 = vadd.f32 %v347_v12, %v346_v8 }
  0xb5   : > { %v352_v14 = vrot.slane %v351_v13, 4 }
  0xb6   : > { %v349_v18 = vrot.slane %v348_v15, 1 }
  0xb7   : > { %v353_v16 = vadd.f32 %v352_v14, %v351_v13 }
  0xb8   : > { %v350_v21 = vadd.f32 %v349_v18, %v348_v15 }
  0xb9   : > { %v354_v17 = vrot.slane %v353_v16, 2 }
  0xbb   : > { %v355_v19 = vadd.f32 %v354_v17, %v353_v16 }
  0xbd   : > { %v356_v20 = vrot.slane %v355_v19, 1 }
  0xbf   : > { %v357_v22 = vadd.f32 %v356_v20, %v355_v19 }
  0xc1   : > { %v358_v23 = vadd.f32 %v357_v22, %v350_v21 }
  0xc3   : > { %v359_v24 = vmul.f32 0.125, %v358_v23 }
  0xc5   : > { %v360_v25 = vsub.f32 %v266_v5, %v359_v24  ;;  %v361_v26 = vsub.f32 %v341_v11, %v359_v24 }
  0xc7   : > { %v362_v27 = vmul.f32 %v360_v25, %v360_v25  ;;  %v370_v28 = vmul.f32 %v361_v26, %v361_v26 }
  0xc9   : > { %v363_v29 = vsel %vm343_vm0, %v362_v27, 0.0  ;;  %v371_v30 = vsel %vm343_vm0, %v370_v28, 0.0 }
  0xca   : > { %v364_v31 = vrot.slane %v363_v29, 4  ;;  %v372_v32 = vrot.slane %v371_v30, 4 }
  0xcc   : > { %v365_v33 = vadd.f32 %v364_v31, %v363_v29  ;;  %v373_v34 = vadd.f32 %v372_v32, %v371_v30 }
  0xce   : > { %v366_v35 = vrot.slane %v365_v33, 2  ;;  %v374_v36 = vrot.slane %v373_v34, 2 }
  0xd0   : > { %v367_v37 = vadd.f32 %v366_v35, %v365_v33  ;;  %v375_v38 = vadd.f32 %v374_v36, %v373_v34 }
  0xd2   : > { %v368_v39 = vrot.slane %v367_v37, 1  ;;  %v376_v40 = vrot.slane %v375_v38, 1 }
  0xd4   : > { %v369_v41 = vadd.f32 %v368_v39, %v367_v37  ;;  %v377_v42 = vadd.f32 %v376_v40, %v375_v38 }
  0xd6   : > { %v378_v43 = vadd.f32 %v377_v42, %v369_v41 }
  0xd8   : > { %v379_v44 = vmul.f32 0.125, %v378_v43 }
  0xda   : > { %v381_v45 = vadd.f32 1e-05, %v379_v44 }
  0xdc   : > { %533 = vrsqrt.f32 %v381_v45  ;;  %vm388_vm2 = vweird.f32 %v381_v45 }
  0xe2   : > { %v534_v46 = vpop.eup %533 }
  0xe3   : > { %v383_v47 = vmul.f32 %v534_v46, %v381_v45  ;;  %vm389_vm1 = vweird.f32 %v534_v46 }
  0xe4   : > { %vm390_vm3 = vmor %vm388_vm2, %vm389_vm1 }
  0xe5   : > { %v384_v48 = vmul.f32 %v534_v46, %v383_v47 }
  0xe7   : > { %v385_v49 = vmul.f32 0.5, %v384_v48 }
  0xe9   : > { %v386_v50 = vsub.f32 1.5, %v385_v49 }
  0xeb   : > { %v387_v52 = vmul.f32 %v534_v46, %v386_v50 }
  0xed   : > { %v391_v53 = vsel %vm390_vm3, %v534_v46, %v387_v52 }
  0xee   : > { %v392_v54 = vmul.f32 %v391_v53, %v380_v51 }
  0xf0   : > { %v395_v55 = vperm.slane %v392_v54, 0 }
  0xf2   : > { %v397_v57 = vmul.f32 %v395_v55, %v360_v25  ;;  %v403_v58 = vmul.f32 %v395_v55, %v361_v26 }
  0xf4   : > { %v401_v59 = vadd.f32 %v532_v56, %v397_v57  ;;  %v404_v60 = vadd.f32 %v532_v56, %v403_v58 }
  0xf6   : > { %v405_v61 = vmax.f32 %v404_v60, 0.0  ;;  %v402_v62 = vmax.f32 %v401_v59, 0.0 }
  0xf8   : > { %407 = vrot.lane.b32.xlu0 %v405_v61, %s543_s8 }
 0x16a   : > { %v408_v63 = vpop.permute.xlu0 %407 }
 0x16b   : > { %v411_v0 = vsel %vm410_vm4, %v402_v62, %v408_v63 }
 0x16c   : > { %412 = vst [vmem:[%s192_s12] sm:$0xf] %v411_v0 }
 0x16d PF: > { %s14_s15 = sadd.s32 1, %s541_s15  }
 0x16e   : > { %p11_p4 = scmp.ge.s32.totalorder %s14_s15, 4  }
 0x170   :  { %13 = sbr.rel (!%p11_p4) target bundleno = 1 (0x1), region = 69 }

// kernel: generator_forward.14
= control target key start
LH: loop header
LB: loop body
LE: loop exit
PB: predicated region body
PF: predicated region fallthrough
CT: control target
= control target key end

     0   :  { %s531_s15 = smov 0   ;;  %s670_s0 = inlined_call_operand.vmem [shape: f32[2,10,64], index: 0, kind: input, shape index: {}]   ;;  %s671_s1 = inlined_call_operand.vmem [shape: f32[4,64,32], index: 1, kind: input, shape index: {}]   ;;  %s672_s2 = inlined_call_operand.vmem [shape: f32[1,32], index: 2, kind: input, shape index: {}]   ;;  %s673_s3 = inlined_call_operand.vmem [shape: f32[1,32], index: 3, kind: input, shape index: {}]   ;;  %s674_s4 = inlined_call_operand.vmem [shape: f32[2,8,64], index: 4, kind: output, shape index: {}]  }
   0x1 LB: > { %s446_s16 = sadd.s32 4294967295, %s503_s15   ;;  %p450_p0 = scmp.ge.s32.totalorder %s503_s15, 1  ;;  %s503_s15 = sphi %s531_s15, %s14_s15  }
   0x2   : > { %p162_p1 = scmp.lt.s32.totalorder %s503_s15, 3 }
   0x4   : > { %p163_p2 = pnand %p450_p0, %p162_p1 }
   0x5   : > { %p548_p3 = scmp.lt.s32.totalorder (!%p163_p2), %s446_s16, 1  ;;  %s505_s18 = smov (!%p163_p2), 32  }
   0x6   : > { %166 = sbr.rel (%p163_p2) target bundleno = 349 (0x15d), region = 36 }
   0xb   : > { %v461_v0 = vld [vmem:[%s671_s1 + $0x78] sm:$0xff]  ;;  %v460_v4 = vld [vmem:[%s671_s1 + $0x70] sm:$0xff]  ;;  %v459_v8 = vld [vmem:[%s671_s1 + $0x68] sm:$0xff]  ;;  %s677_s16 = smov (!%p548_p3, %s446_s16), 1  ;;  %vm215_vm0 = vcmask 523264   ;;  %vm324_vm1 = vcmask 261120  }
   0xc   : > { %v204_v1 = vld [vmem:[%s671_s1 + $0x38] sm:$0xff]  ;;  %227 = vmatpush.msra.mxu0 %v461_v0  ;;  %v203_v5 = vld [vmem:[%s671_s1 + $0x30] sm:$0xff]  ;;  %v202_v9 = vld [vmem:[%s671_s1 + $0x28] sm:$0xff]  ;;  %s484_s12 = sshll.u32 %s677_s16, 4  ;;  %s453_s19 = sshll.u32 %s677_s16, 3 }
   0xd   : > { %v479_v2 = vld [vmem:[%s671_s1 + $0xf8] sm:$0xff]  ;;  %250 = vmatpush.msra.mxu1 %v204_v1  ;;  %v478_v6 = vld [vmem:[%s671_s1 + $0xf0] sm:$0xff]  ;;  %v477_v10 = vld [vmem:[%s671_s1 + $0xe8] sm:$0xff]  ;;  %s191_s29 = scalar_lea.vmem %s670_s0, %s484_s12  ;;  %s195_s22 = scalar_lea.vmem %s674_s4, %s453_s19 }
   0xe   : > { %v471_v3 = vld [vmem:[%s671_s1 + $0xb8] sm:$0xff]  ;;  %292 = vmatpush.msra.mxu2 %v479_v2  ;;  %v470_v7 = vld [vmem:[%s671_s1 + $0xb0] sm:$0xff]  ;;  %228 = vmatpush.msra.mxu0 %v460_v4  ;;  %v469_v11 = vld [vmem:[%s671_s1 + $0xa8] sm:$0xff] }
   0xf   : > { %312 = vmatpush.msra.mxu3 %v471_v3  ;;  %251 = vmatpush.msra.mxu1 %v203_v5  ;;  %v458_v12 = vld [vmem:[%s671_s1 + $0x60] sm:$0xff]  ;;  %v457_v16 = vld [vmem:[%s671_s1 + $0x58] sm:$0xff]  ;;  %v456_v20 = vld [vmem:[%s671_s1 + $0x50] sm:$0xff] }
  0x10   : > { %293 = vmatpush.msra.mxu2 %v478_v6  ;;  %v201_v13 = vld [vmem:[%s671_s1 + $0x20] sm:$0xff]  ;;  %229 = vmatpush.msra.mxu0 %v459_v8  ;;  %v200_v17 = vld [vmem:[%s671_s1 + $0x18] sm:$0xff]  ;;  %v199_v21 = vld [vmem:[%s671_s1 + $0x10] sm:$0xff] }
  0x11   : > { %313 = vmatpush.msra.mxu3 %v470_v7  ;;  %252 = vmatpush.msra.mxu1 %v202_v9  ;;  %v476_v14 = vld [vmem:[%s671_s1 + $0xe0] sm:$0xff]  ;;  %v475_v18 = vld [vmem:[%s671_s1 + $0xd8] sm:$0xff]  ;;  %v474_v22 = vld [vmem:[%s671_s1 + $0xd0] sm:$0xff] }
  0x12   : > { %v468_v15 = vld [vmem:[%s671_s1 + $0xa0] sm:$0xff]  ;;  %294 = vmatpush.msra.mxu2 %v477_v10  ;;  %230 = vmatpush.msra.mxu0 %v458_v12  ;;  %v467_v19 = vld [vmem:[%s671_s1 + $0x98] sm:$0xff]  ;;  %v466_v23 = vld [vmem:[%s671_s1 + $0x90] sm:$0xff] }
  0x13   : > { %314 = vmatpush.msra.mxu3 %v469_v11  ;;  %253 = vmatpush.msra.mxu1 %v201_v13  ;;  %v455_v24 = vld [vmem:[%s671_s1 + $0x48] sm:$0xff]  ;;  %v454_v28 = vld [vmem:[%s671_s1 + $0x40] sm:$0xff] }
  0x14   : > { %295 = vmatpush.msra.mxu2 %v476_v14  ;;  %231 = vmatpush.msra.mxu0 %v457_v16  ;;  %v198_v25 = vld [vmem:[%s671_s1 + $0x8] sm:$0xff]  ;;  %v197_v29 = vld [vmem:[%s671_s1] sm:$0xff] }
  0x15   : > { %315 = vmatpush.msra.mxu3 %v468_v15  ;;  %254 = vmatpush.msra.mxu1 %v200_v17  ;;  %v473_v26 = vld [vmem:[%s671_s1 + $0xc8] sm:$0xff]  ;;  %v472_v30 = vld [vmem:[%s671_s1 + $0xc0] sm:$0xff] }
  0x16   : > { %296 = vmatpush.msra.mxu2 %v475_v18  ;;  %232 = vmatpush.msra.mxu0 %v456_v20  ;;  %v465_v27 = vld [vmem:[%s671_s1 + $0x88] sm:$0xff]  ;;  %v464_v31 = vld [vmem:[%s671_s1 + $0x80] sm:$0xff] }
  0x17   : > { %316 = vmatpush.msra.mxu3 %v467_v19  ;;  %255 = vmatpush.msra.mxu1 %v199_v21  ;;  %v205_v32 = vld [vmem:[%s191_s29 + $0x1] sm:$0xff]  ;;  %v361_v19 = vld [vmem:[%s672_s2] sm:$0x1] }
  0x18   : > { %297 = vmatpush.msra.mxu2 %v474_v22  ;;  %233 = vmatpush.msra.mxu0 %v455_v24  ;;  %v196_v33 = vld [vmem:[%s191_s29] sm:$0xff] }
  0x19   : > { %317 = vmatpush.msra.mxu3 %v466_v23  ;;  %256 = vmatpush.msra.mxu1 %v198_v25  ;;  %v271_v34 = vld [vmem:[%s191_s29 + $0x2] sm:$0xff]  ;;  %v494_v24 = vld [vmem:[%s673_s3] ss:$0 sm:$0xff] }
  0x1a   : > { %298 = vmatpush.msra.mxu2 %v473_v26  ;;  %234 = vmatpush.msra.mxu0 %v454_v28 }
  0x1b   : > { %318 = vmatpush.msra.mxu3 %v465_v27  ;;  %257 = vmatpush.msra.mxu1 %v197_v29 }
  0x1c   : > { %299 = vmatpush.msra.mxu2 %v472_v30  ;;  %462 = vmatmul.msk.f32.vlgmr.msra.gmra.mxu0 %vm215_vm0, %v205_v32 }
  0x1d   : > { %319 = vmatpush.msra.mxu3 %v464_v31  ;;  %463 = vmatmul.msk.f32.vlgmr.msra.gmra.mxu1 %vm215_vm0, %v196_v33 }
  0x1e   : > { %480 = vmatmul.msk.f32.vlgmr.msra.gmra.mxu2 %vm215_vm0, %v271_v34  ;;  %481 = vmatmul.msk.f32.vlgmr.msra.gmra.mxu3 %vm215_vm0, %v205_v32 }
  0x99   : > { %v236_v35 = vpop.f32.mrf.mxu0 }
  0x9a   : > { %v259_v36 = vpop.f32.mrf.mxu1 }
  0x9b   : > { %v260_v37 = vadd.f32 %v259_v36, %v236_v35 }
  0x9d   : > { %v325_v38 = vsel %vm324_vm1, %v260_v37, 0.0 }
  0x9e   : > { %v326_v39 = vrot.slane %v325_v38, 4 }
  0xa0   : > { %v327_v40 = vadd.f32 %v326_v39, %v325_v38 }
  0xa1   : > { %v301_v41 = vpop.f32.mrf.mxu2  ;;  %v321_v42 = vpop.f32.mrf.mxu3 }
  0xa2   : > { %v322_v43 = vadd.f32 %v321_v42, %v301_v41  ;;  %v328_v44 = vrot.slane %v327_v40, 2 }
  0xa4   : > { %v332_v45 = vsel %vm324_vm1, %v322_v43, 0.0  ;;  %v329_v47 = vadd.f32 %v328_v44, %v327_v40 }
  0xa5   : > { %v333_v46 = vrot.slane %v332_v45, 4 }
  0xa6   : > { %v330_v50 = vrot.slane %v329_v47, 1 }
  0xa7   : > { %v334_v48 = vadd.f32 %v333_v46, %v332_v45 }
  0xa8   : > { %v331_v53 = vadd.f32 %v330_v50, %v329_v47 }
  0xa9   : > { %v335_v49 = vrot.slane %v334_v48, 2 }
  0xab   : > { %v336_v51 = vadd.f32 %v335_v49, %v334_v48 }
  0xad   : > { %v337_v52 = vrot.slane %v336_v51, 1 }
  0xaf   : > { %v338_v54 = vadd.f32 %v337_v52, %v336_v51 }
  0xb1   : > { %v339_v55 = vadd.f32 %v338_v54, %v331_v53 }
  0xb3   : > { %v340_v56 = vmul.f32 0.0625, %v339_v55 }
  0xb5   : > { %v341_v57 = vsub.f32 %v260_v37, %v340_v56  ;;  %v342_v58 = vsub.f32 %v322_v43, %v340_v56 }
  0xb7   : > { %v343_v59 = vmul.f32 %v341_v57, %v341_v57  ;;  %v351_v60 = vmul.f32 %v342_v58, %v342_v58 }
  0xb9   : > { %v344_v61 = vsel %vm324_vm1, %v343_v59, 0.0  ;;  %v352_v62 = vsel %vm324_vm1, %v351_v60, 0.0 }
  0xba   : > { %v345_v63 = vrot.slane %v344_v61, 4  ;;  %v353_v0 = vrot.slane %v352_v62, 4 }
  0xbc   : > { %v346_v1 = vadd.f32 %v345_v63, %v344_v61  ;;  %v354_v2 = vadd.f32 %v353_v0, %v352_v62 }
  0xbe   : > { %v347_v3 = vrot.slane %v346_v1, 2  ;;  %v355_v4 = vrot.slane %v354_v2, 2 }
  0xc0   : > { %v348_v5 = vadd.f32 %v347_v3, %v346_v1  ;;  %v356_v6 = vadd.f32 %v355_v4, %v354_v2 }
  0xc2   : > { %v349_v7 = vrot.slane %v348_v5, 1  ;;  %v357_v8 = vrot.slane %v356_v6, 1 }
  0xc4   : > { %v350_v9 = vadd.f32 %v349_v7, %v348_v5  ;;  %v358_v10 = vadd.f32 %v357_v8, %v356_v6 }
  0xc6   : > { %v359_v11 = vadd.f32 %v358_v10, %v350_v9 }
  0xc8   : > { %v360_v12 = vmul.f32 0.0625, %v359_v11 }
  0xca   : > { %v362_v13 = vadd.f32 1e-05, %v360_v12 }
  0xcc   : > { %495 = vrsqrt.f32 %v362_v13  ;;  %vm369_vm3 = vweird.f32 %v362_v13 }
  0xd2   : > { %v496_v14 = vpop.eup %495 }
  0xd3   : > { %v364_v15 = vmul.f32 %v496_v14, %v362_v13  ;;  %vm370_vm2 = vweird.f32 %v496_v14 }
  0xd4   : > { %vm371_vm4 = vmor %vm369_vm3, %vm370_vm2 }
  0xd5   : > { %v365_v16 = vmul.f32 %v496_v14, %v364_v15 }
  0xd7   : > { %v366_v17 = vmul.f32 0.5, %v365_v16 }
  0xd9   : > { %v367_v18 = vsub.f32 1.5, %v366_v17 }
  0xdb   : > { %v368_v20 = vmul.f32 %v496_v14, %v367_v18 }
  0xdd   : > { %v372_v21 = vsel %vm371_vm4, %v496_v14, %v368_v20 }
  0xde   : > { %v373_v22 = vmul.f32 %v372_v21, %v361_v19 }
  0xe0   : > { %v376_v23 = vperm.slane %v373_v22, 0 }
  0xe2   : > { %v378_v25 = vmul.f32 %v376_v23, %v341_v57  ;;  %v384_v26 = vmul.f32 %v376_v23, %v342_v58 }
  0xe4   : > { %v382_v27 = vadd.f32 %v494_v24, %v378_v25  ;;  %v385_v28 = vadd.f32 %v494_v24, %v384_v26 }
  0xe6   : > { %v386_v29 = vmax.f32 %v385_v28, 0.0  ;;  %v383_v30 = vmax.f32 %v382_v27, 0.0 }
  0xe8   : > { %388 = vrot.lane.b32.xlu0 %v386_v29, %s505_s18 }
 0x15a   : > { %v389_v31 = vpop.permute.xlu0 %388 }
 0x15b   : > { %v391_v32 = vsel %vm324_vm1, %v383_v30, %v389_v31 }
 0x15c   : > { %392 = vst.msk [vmem:[%s195_s22] sm:$0xff] %vm215_vm0, %v391_v32 }
 0x15d PF: > { %s14_s15 = sadd.s32 1, %s503_s15  }
 0x15e   : > { %p11_p4 = scmp.ge.s32.totalorder %s14_s15, 4  }
 0x160   :  { %13 = sbr.rel (!%p11_p4) target bundleno = 1 (0x1), region = 69 }

// kernel: generator_forward.15
= control target key start
LH: loop header
LB: loop body
LE: loop exit
PB: predicated region body
PF: predicated region fallthrough
CT: control target
= control target key end

     0   :  { %s619_s15 = smov 0   ;;  %s754_s0 = inlined_call_operand.vmem [shape: f32[2,22,32], index: 0, kind: input, shape index: {}]   ;;  %s755_s1 = inlined_call_operand.vmem [shape: f32[7,32,3], index: 1, kind: input, shape index: {}]   ;;  %s756_s2 = inlined_call_operand.vmem [shape: f32[1,3], index: 2, kind: input, shape index: {}]   ;;  %s757_s3 = inlined_call_operand.vmem [shape: f32[1,3], index: 3, kind: input, shape index: {}]   ;;  %s758_s4 = inlined_call_operand.vmem [shape: f32[2,16,3], index: 4, kind: output, shape index: {}]  }
   0x1 LB: > { %s520_s16 = sadd.s32 4294967295, %s592_s15   ;;  %p524_p0 = scmp.ge.s32.totalorder %s592_s15, 1  ;;  %s592_s15 = sphi %s619_s15, %s14_s15  }
   0x2   : > { %p162_p1 = scmp.lt.s32.totalorder %s592_s15, 3 }
   0x4   : > { %p163_p2 = pnand %p524_p0, %p162_p1 }
   0x5   : > { %p188_p3 = scmp.lt.s32.totalorder (!%p163_p2), %s520_s16, 1 }
   0x6   : > { %166 = sbr.rel (%p163_p2) target bundleno = 187 (0xbb), region = 36 }
   0xb   : > { %v531_v0 = vld [vmem:[%s755_s1 + $0x38] sm:$0xff]  ;;  %v530_v3 = vld [vmem:[%s755_s1 + $0x30] sm:$0xff]  ;;  %v529_v6 = vld [vmem:[%s755_s1 + $0x28] sm:$0xff]  ;;  %s760_s16 = smov (!%p188_p3, %s520_s16), 1  ;;  %vm211_vm0 = vcmask 261120   ;;  %vm462_vm1 = vcmask 23552  }
   0xc   : > { %v203_v1 = vld [vmem:[%s755_s1 + $0x18] sm:$0xff]  ;;  %569 = vmatpush.msra.mxu3 %v531_v0  ;;  %v202_v4 = vld [vmem:[%s755_s1 + $0x10] sm:$0xff]  ;;  %230 = vmatpush.msra.mxu0 %v531_v0  ;;  %v201_v7 = vld [vmem:[%s755_s1 + $0x8] sm:$0xff]  ;;  %s573_s11 = smul.u32 24, %s760_s16 }
   0xd   : > { %v539_v2 = vld [vmem:[%s755_s1 + $0x58] sm:$0xff]  ;;  %259 = vmatpush.msra.mxu1 %v203_v1  ;;  %v538_v5 = vld [vmem:[%s755_s1 + $0x50] sm:$0xff]  ;;  %v537_v8 = vld [vmem:[%s755_s1 + $0x48] sm:$0xff] }
   0xe   : > { %295 = vmatpush.msra.mxu2 %v539_v2  ;;  %570 = vmatpush.msra.mxu3 %v530_v3  ;;  %v528_v9 = vld [vmem:[%s755_s1 + $0x20] sm:$0xff]  ;;  %s669_s3 = scalar_lea.vmem %s754_s0, %s573_s11  ;;  %v563_v12 = vld [vmem:[%s755_s1 + $0xd8] sm:$0xff]  ;;  %v544_v18 = vld [vmem:[%s755_s1 + $0x70] sm:$0xff] }
   0xf   : > { %260 = vmatpush.msra.mxu1 %v202_v4  ;;  %231 = vmatpush.msra.mxu0 %v530_v3  ;;  %v200_v10 = vld [vmem:[%s755_s1] sm:$0xff]  ;;  %v545_v13 = vld [vmem:[%s755_s1 + $0x78] sm:$0xff]  ;;  %v205_v14 = vld [vmem:[%s669_s3 + $0x9] sm:$0xff] }
  0x10   : > { %296 = vmatpush.msra.mxu2 %v538_v5  ;;  %571 = vmatpush.msra.mxu3 %v529_v6  ;;  %v536_v11 = vld [vmem:[%s755_s1 + $0x40] sm:$0xff]  ;;  %v557_v17 = vld [vmem:[%s755_s1 + $0xb8] sm:$0xff]  ;;  %v562_v20 = vld [vmem:[%s755_s1 + $0xd0] sm:$0xff] }
  0x11   : > { %261 = vmatpush.msra.mxu1 %v201_v7  ;;  %232 = vmatpush.msra.mxu0 %v529_v6  ;;  %v198_v15 = vld [vmem:[%s669_s3] sm:$0xff]  ;;  %v556_v21 = vld [vmem:[%s755_s1 + $0xb0] sm:$0xff]  ;;  %v543_v22 = vld [vmem:[%s755_s1 + $0x68] sm:$0xff] }
  0x12   : > { %297 = vmatpush.msra.mxu2 %v537_v8  ;;  %572 = vmatpush.msra.mxu3 %v528_v9  ;;  %v270_v16 = vld [vmem:[%s669_s3 + $0x2] sm:$0xff]  ;;  %v551_v23 = vld [vmem:[%s755_s1 + $0x98] sm:$0xff]  ;;  %v550_v27 = vld [vmem:[%s755_s1 + $0x90] sm:$0xff] }
  0x13   : > { %262 = vmatpush.msra.mxu1 %v200_v10  ;;  %533 = vmatmul.msk.f32.vlgmr.msra.gmra.mxu3 %vm211_vm0, %v205_v14  ;;  %v204_v19 = vld [vmem:[%s669_s3 + $0x1] sm:$0xff]  ;;  %v271_v29 = vld [vmem:[%s669_s3 + $0xa] sm:$0xff] }
  0x14   : > { %298 = vmatpush.msra.mxu2 %v536_v11  ;;  %534 = vmatmul.msk.f32.vlgmr.msra.gmra.mxu1 %vm211_vm0, %v198_v15  ;;  %v561_v24 = vld [vmem:[%s755_s1 + $0xc8] sm:$0xff]  ;;  %v542_v26 = vld [vmem:[%s755_s1 + $0x60] sm:$0xff] }
  0x15   : > { %540 = vmatmul.msk.f32.vlgmr.msra.gmra.mxu2 %vm211_vm0, %v270_v16  ;;  %333 = vmatpush.msrb.mxu3 %v545_v13  ;;  %v555_v25 = vld [vmem:[%s755_s1 + $0xa8] sm:$0xff]  ;;  %v560_v31 = vld [vmem:[%s755_s1 + $0xc0] sm:$0xff] }
  0x16   : > { %447 = vmatpush.msrb.mxu2 %v563_v12  ;;  %233 = vmatpush.msra.mxu0 %v528_v9  ;;  %v199_v28 = vld [vmem:[%s669_s3 + $0x8] sm:$0xff]  ;;  %v554_v33 = vld [vmem:[%s755_s1 + $0xa0] sm:$0xff] }
  0x17   : > { %409 = vmatpush.msrb.mxu1 %v557_v17  ;;  %334 = vmatpush.msrb.mxu3 %v544_v18  ;;  %v308_v30 = vld [vmem:[%s669_s3 + $0x3] sm:$0xff]  ;;  %v309_v38 = vld [vmem:[%s669_s3 + $0xb] sm:$0xff] }
  0x18   : > { %532 = vmatmul.msk.f32.vlgmr.msra.gmra.mxu0 %vm211_vm0, %v204_v19  ;;  %448 = vmatpush.msrb.mxu2 %v562_v20  ;;  %v549_v32 = vld [vmem:[%s755_s1 + $0x88] sm:$0xff]  ;;  %v548_v34 = vld [vmem:[%s755_s1 + $0x80] sm:$0xff] }
  0x19   : > { %410 = vmatpush.msrb.mxu1 %v556_v21  ;;  %335 = vmatpush.msrb.mxu3 %v543_v22  ;;  %v346_v35 = vld [vmem:[%s669_s3 + $0x4] sm:$0xff]  ;;  %v347_v39 = vld [vmem:[%s669_s3 + $0xc] sm:$0xff] }
  0x1a   : > { %371 = vmatpush.msrb.mxu0 %v551_v23  ;;  %449 = vmatpush.msrb.mxu2 %v561_v24  ;;  %v422_v36 = vld [vmem:[%s669_s3 + $0x6] sm:$0xff]  ;;  %v423_v40 = vld [vmem:[%s669_s3 + $0xe] sm:$0xff] }
  0x1b   : > { %411 = vmatpush.msrb.mxu1 %v555_v25  ;;  %336 = vmatpush.msrb.mxu3 %v542_v26  ;;  %v384_v37 = vld [vmem:[%s669_s3 + $0x5] sm:$0xff]  ;;  %v385_v41 = vld [vmem:[%s669_s3 + $0xd] sm:$0xff]  ;;  %s568_s3 = sshll.u32 %s760_s16, 4 }
  0x1c   : > { %372 = vmatpush.msrb.mxu0 %v550_v27  ;;  %535 = vmatmul.msk.f32.gmra.mxu1 %vm211_vm0, %v199_v28  ;;  %s197_s26 = scalar_lea.vmem %s758_s4, %s568_s3 }
  0x1d   : > { %541 = vmatmul.msk.f32.gmra.mxu2 %vm211_vm0, %v271_v29  ;;  %546 = vmatmul.msk.f32.vlgmr.msrb.gmra.mxu3 %vm211_vm0, %v308_v30 }
  0x1e   : > { %450 = vmatpush.msrb.mxu2 %v560_v31  ;;  %373 = vmatpush.msrb.mxu0 %v549_v32 }
  0x1f   : > { %412 = vmatpush.msrb.mxu1 %v554_v33 }
  0x20   : > { %374 = vmatpush.msrb.mxu0 %v548_v34 }
  0x21   : > { %552 = vmatmul.msk.f32.vlgmr.msrb.gmra.mxu0 %vm211_vm0, %v346_v35 }
  0x24   : > { %558 = vmatmul.msk.f32.vlgmr.msrb.gmra.mxu1 %vm211_vm0, %v384_v37 }
  0x25   : > { %564 = vmatmul.msk.f32.vlgmr.msrb.gmra.mxu2 %vm211_vm0, %v422_v36  ;;  %547 = vmatmul.msk.f32.gmra.mxu3 %vm211_vm0, %v309_v38 }
  0x29   : > { %553 = vmatmul.msk.f32.gmra.mxu0 %vm211_vm0, %v347_v39 }
  0x2c   : > { %559 = vmatmul.msk.f32.gmra.mxu1 %vm211_vm0, %v385_v41 }
  0x2d   : > { %565 = vmatmul.msk.f32.gmra.mxu2 %vm211_vm0, %v423_v40 }
  0x91   : > { %v264_v42 = vpop.f32.mrf.mxu1 }
  0x95   : > { %v235_v43 = vpop.f32.mrf.mxu0 }
  0x96   : > { %v238_v44 = vpop.f32.mrf.mxu3  ;;  %v265_v47 = vadd.f32 %v264_v42, %v235_v43 }
  0x98   : > { %v300_v45 = vpop.f32.mrf.mxu2 }
  0x99   : > { %v267_v46 = vpop.f32.mrf.mxu1  ;;  %v306_v49 = vadd.f32 %v300_v45, %v265_v47 }
  0x9a   : > { %v268_v55 = vadd.f32 %v267_v46, %v238_v44 }
  0x9e   : > { %v376_v48 = vpop.f32.mrf.mxu0 }
  0xa0   : > { %v303_v50 = vpop.f32.mrf.mxu2  ;;  %v338_v51 = vpop.f32.mrf.mxu3 }
  0xa1   : > { %v344_v52 = vadd.f32 %v338_v51, %v306_v49  ;;  %v414_v53 = vpop.f32.mrf.mxu1  ;;  %v307_v57 = vadd.f32 %v303_v50, %v268_v55 }
  0xa3   : > { %v382_v54 = vadd.f32 %v376_v48, %v344_v52 }
  0xa5   : > { %v420_v56 = vadd.f32 %v414_v53, %v382_v54 }
  0xa6   : > { %v379_v61 = vpop.f32.mrf.mxu0 }
  0xa8   : > { %v452_v58 = vpop.f32.mrf.mxu2  ;;  %v341_v59 = vpop.f32.mrf.mxu3 }
  0xa9   : > { %v458_v60 = vadd.f32 %v452_v58, %v420_v56  ;;  %v345_v62 = vadd.f32 %v341_v59, %v307_v57  ;;  %v417_v0 = vpop.f32.mrf.mxu1 }
  0xab   : > { %582 = vtanh.f32 %v458_v60  ;;  %v383_v63 = vadd.f32 %v379_v61, %v345_v62 }
  0xad   : > { %v421_v1 = vadd.f32 %v417_v0, %v383_v63 }
  0xb0   : > { %v455_v2 = vpop.f32.mrf.mxu2 }
  0xb1   : > { %v583_v3 = vpop.eup %582  ;;  %v459_v4 = vadd.f32 %v455_v2, %v421_v1 }
  0xb2   : > { %463 = vst.msk [vmem:[%s197_s26] sm:$0xff] %vm462_vm1, %v583_v3 }
  0xb3   : > { %584 = vtanh.f32 %v459_v4 }
  0xb9   : > { %v585_v5 = vpop.eup %584 }
  0xba   : > { %464 = vst.msk [vmem:[%s197_s26 + $0x8] sm:$0xff] %vm462_vm1, %v585_v5 }
  0xbb PF: > { %s14_s15 = sadd.s32 1, %s592_s15  }
  0xbc   : > { %p11_p4 = scmp.ge.s32.totalorder %s14_s15, 4  }
  0xbe   :  { %13 = sbr.rel (!%p11_p4) target bundleno = 1 (0x1), region = 72 }

</bundles_post_ra>
